<compile_context>
chip_gen: v6e
topology: v6e:2x2x1
jax: 0.10.0
libtpu: 0.0.40
codegen_flags: <defaults>
</compile_context>

<pallas_src>
import functools

import numpy as np
import jax
import jax.numpy as jnp
from jax import lax
from jax.experimental import pallas as pl
from jax.experimental.pallas import tpu as pltpu


# Geometry forced by the PyTorch flatten x.view(-1, 30*30).
_H_IN = 126
_W_PAD = 128            # lane-padded width of every feature map
_C1 = _H_IN - 2         # 124  (conv1 "valid" output)
_P1 = _C1 // 2          # 62   (after pool1)
_C2 = _P1 - 2           # 60   (conv2 output)
_P2 = _C2 // 2          # 30   (after pool2)
_FC1, _FC2, _FC3 = 256, 84, 36


# --------------------------------------------------------------------------
# Fused forward kernel: one batch block per grid step.
# --------------------------------------------------------------------------
def _mynet_fused_kernel(
    x_ref,                                                # (Bb, 126, 128) VMEM
    band1_ref, cb1_ref, band2_ref, cb2_ref,               # conv bands/bias (resident)
    selc1_ref, selr1_ref, selc2_ref, selr2_ref,            # pooling 0/1 selectors
    w1_ref, b1_ref, w2_ref, b2_ref, w3_ref, b3_ref,        # FC weights (resident)
    out_ref,                                               # (Bb, 36) VMEM
    p2s_ref,                                               # (30, Bb, 128) VMEM scratch
):
    bb = x_ref.shape[0]

    def conv3x3_relu(img, band_ref, bias, ho):
        # 3x3 "valid" conv as 3 banded MXU matmuls (one per tap row).  The
        # column taps live on the band matrices; rows are handled by cheap
        # stride-1 sublane window slices.  img: (hi, 128) -> (ho, 128).
        acc = jnp.dot(img[0:ho, :], band_ref[0], preferred_element_type=jnp.float32)
        acc = acc + jnp.dot(img[1:ho + 1, :], band_ref[1],
                            preferred_element_type=jnp.float32)
        acc = acc + jnp.dot(img[2:ho + 2, :], band_ref[2],
                            preferred_element_type=jnp.float32)
        return jnp.maximum(acc + bias, 0.0)                # bias + ReLU

    def maxpool2x2(y, selr_ref, selc_ref, hi):
        # 2x2/stride-2 max pool: adjacent-row max (VPU), adjacent-col max
        # (VPU, one-lane shift), then even-col / even-row selection via two
        # shared 0/1 matrices on the MXU (no broadcast, no batched RHS).
        rmax = jnp.maximum(y[0:hi - 1, :], y[1:hi, :])             # (hi-1, 128)
        cmax = jnp.maximum(rmax[:, 0:_W_PAD - 1], rmax[:, 1:_W_PAD])  # (hi-1, 127)
        t = jnp.dot(cmax, selc_ref[...], preferred_element_type=jnp.float32)
        return jnp.dot(selr_ref[...], t, preferred_element_type=jnp.float32)

    def spatial(b, carry):
        img = x_ref[b]                                     # (126, 128) f32
        y1 = conv3x3_relu(img, band1_ref, cb1_ref[...], _C1)        # (124, 128)
        p1 = maxpool2x2(y1, selr1_ref, selc1_ref, _C1)               # (62, 128)
        y2 = conv3x3_relu(p1, band2_ref, cb2_ref[...], _C2)         # (60, 128)
        p2 = maxpool2x2(y2, selr2_ref, selc2_ref, _C2)               # (30, 128)
        # Stage the pooled map row-major-by-r so the FC stage can read each
        # flatten chunk contiguously across the batch.
        for r in range(_P2):
            p2s_ref[r, pl.ds(b, 1), :] = p2[r:r + 1, :]
        return carry

    lax.fori_loop(0, bb, spatial, 0)

    # ---- Batched FC tail (M = block batch) -------------------------------
    # Re-assemble the PyTorch flatten as a lane-dense (Bb, 30*128) slab and do
    # fc1 as ONE K=3840 matmul against the zero-padded weight.
    h = jnp.concatenate([p2s_ref[r] for r in range(_P2)], axis=-1)   # (Bb, 3840)
    h = jnp.maximum(
        jnp.dot(h, w1_ref[...], preferred_element_type=jnp.float32) + b1_ref[...], 0.0)
    h = jnp.maximum(
        jnp.dot(h, w2_ref[...], preferred_element_type=jnp.float32) + b2_ref[...], 0.0)
    z = jnp.dot(h, w3_ref[...], preferred_element_type=jnp.float32) + b3_ref[...]
    out_ref[...] = jax.nn.sigmoid(z)                        # (Bb, 36) in (0, 1)


def _run_fused(x_nhw, prep, block_b):
    n = x_nhw.shape[0]
    grid = (n // block_b,)

    def res2(a):   # whole array, constant block index -> loaded once, resident
        return pl.BlockSpec(a.shape, lambda i: (0, 0))

    def res3(a):
        return pl.BlockSpec(a.shape, lambda i: (0, 0, 0))

    return pl.pallas_call(
        _mynet_fused_kernel,
        out_shape=jax.ShapeDtypeStruct((n, _FC3), jnp.float32),
        grid_spec=pltpu.PrefetchScalarGridSpec(
            num_scalar_prefetch=0,
            grid=grid,
            in_specs=[
                pl.BlockSpec((block_b, _H_IN, _W_PAD), lambda i: (i, 0, 0)),  # x block
                res3(prep["band1"]), res2(prep["cb1"]),
                res3(prep["band2"]), res2(prep["cb2"]),
                res2(prep["selc1"]), res2(prep["selr1"]),
                res2(prep["selc2"]), res2(prep["selr2"]),
                res2(prep["fc1_w"]), res2(prep["fc1_b"]),
                res2(prep["fc2_w"]), res2(prep["fc2_b"]),
                res2(prep["fc3_w"]), res2(prep["fc3_b"]),
            ],
            out_specs=pl.BlockSpec((block_b, _FC3), lambda i: (i, 0)),
            scratch_shapes=[pltpu.VMEM((_P2, block_b, _W_PAD), jnp.float32)],
        ),
        compiler_params=pltpu.CompilerParams(
            # Batch blocks are independent.  On v7x, pltpu.CORE_PARALLEL here
            # (with grid length >= 2 per chip) shards the batch axis across
            # the two TensorCores.
            dimension_semantics=("parallel",),
            vmem_limit_bytes=48 * 1024 * 1024,
        ),
    )(
        x_nhw,
        prep["band1"], prep["cb1"], prep["band2"], prep["cb2"],
        prep["selc1"], prep["selr1"], prep["selc2"], prep["selr2"],
        prep["fc1_w"], prep["fc1_b"], prep["fc2_w"], prep["fc2_b"],
        prep["fc3_w"], prep["fc3_b"],
    )


# --------------------------------------------------------------------------
# Parameter handling
# --------------------------------------------------------------------------
def init_params(key):
    """PyTorch-layout params with default U(-1/sqrt(fan_in), 1/sqrt(fan_in)) init."""
    def uniform(k, shape, fan_in):
        bound = 1.0 / float(fan_in) ** 0.5
        return jax.random.uniform(k, shape, jnp.float32, -bound, bound)

    ks = jax.random.split(key, 10)
    return {
        "conv1_w": uniform(ks[0], (3, 3), 9),        # Conv2d(1, 1, 3x3), squeezed
        "conv1_b": uniform(ks[1], (1,), 9),
        "conv2_w": uniform(ks[2], (3, 3), 9),
        "conv2_b": uniform(ks[3], (1,), 9),
        "fc1_w": uniform(ks[4], (_FC1, _P2 * _P2), _P2 * _P2),   # Linear(900, 256)
        "fc1_b": uniform(ks[5], (_FC1,), _P2 * _P2),
        "fc2_w": uniform(ks[6], (_FC2, _FC1), _FC1),             # Linear(256, 84)
        "fc2_b": uniform(ks[7], (_FC2,), _FC1),
        "fc3_w": uniform(ks[8], (_FC3, _FC2), _FC2),             # Linear(84, 36)
        "fc3_b": uniform(ks[9], (_FC3,), _FC2),
    }


def prepare_params(params):
    """One-time (outside jit) repack into kernel-ready layouts.

    Must be re-run whenever the parameters change (band matrices and the
    packed fc1 weight are derived from the raw weights).
    """
    w1c = np.asarray(jax.device_get(params["conv1_w"]), np.float32)   # (3, 3)
    w2c = np.asarray(jax.device_get(params["conv2_w"]), np.float32)

    def conv_bands(w, out_w):
        # bands[di][j+dj, j] = w[di, dj]  -> inp_rows @ bands[di] does the
        # column taps of conv tap-row di for output columns 0..out_w-1.
        bands = np.zeros((3, _W_PAD, _W_PAD), np.float32)
        j = np.arange(out_w)
        for di in range(3):
            for dj in range(3):
                bands[di, j + dj, j] = w[di, dj]
        return jnp.asarray(bands)

    def col_selector(out_w):
        # (127, 128) with sel[2q, q] = 1: picks column-pair maxes at even cols.
        s = np.zeros((_W_PAD - 1, _W_PAD), np.float32)
        s[2 * np.arange(out_w), np.arange(out_w)] = 1.0
        return jnp.asarray(s)

    def row_selector(out_h, in_h):
        # (out_h, in_h) with sel[p, 2p] = 1: picks row-pair maxes at even rows.
        s = np.zeros((out_h, in_h), np.float32)
        s[np.arange(out_h), 2 * np.arange(out_h)] = 1.0
        return jnp.asarray(s)

    # fc1: (256, 900) -> (900, 256) -> (30, 30, 256) [r, c, n] -> lane-pad the
    # c dim to 128 with zeros -> (3840, 256).  Row index r*128 + c matches the
    # in-kernel (Bb, 30*128) flatten, so the PyTorch x.view(-1, 900) is folded
    # into the weight layout.
    fc1 = np.asarray(jax.device_get(params["fc1_w"]), np.float32)
    w1 = fc1.T.reshape(_P2, _P2, _FC1)
    w1p = np.zeros((_P2, _W_PAD, _FC1), np.float32)
    w1p[:, :_P2, :] = w1
    w1p = w1p.reshape(_P2 * _W_PAD, _FC1)

    return {
        "band1": conv_bands(w1c, _C1),
        "cb1": params["conv1_b"].reshape(1, 1).astype(jnp.float32),
        "band2": conv_bands(w2c, _C2),
        "cb2": params["conv2_b"].reshape(1, 1).astype(jnp.float32),
        "selc1": col_selector(_P1), "selr1": row_selector(_P1, _C1 - 1),
        "selc2": col_selector(_P2), "selr2": row_selector(_P2, _C2 - 1),
        "fc1_w": jnp.asarray(w1p),
        "fc1_b": params["fc1_b"].reshape(1, _FC1).astype(jnp.float32),
        "fc2_w": params["fc2_w"].T.astype(jnp.float32),
        "fc2_b": params["fc2_b"].reshape(1, _FC2).astype(jnp.float32),
        "fc3_w": params["fc3_w"].T.astype(jnp.float32),
        "fc3_b": params["fc3_b"].reshape(1, _FC3).astype(jnp.float32),
    }


# --------------------------------------------------------------------------
# Forward pass + pure-JAX reference
# --------------------------------------------------------------------------
@functools.partial(jax.jit, static_argnames=("block_b",))
def mynet_forward(prep, x_nchw, *, block_b=32):
    # block_b guidance: 32 is safe everywhere; raise to 64-128 on v5e/v6e and
    # cap around 48-64 on v7x (64 MiB physical VMEM).
    n, c, h, w = x_nchw.shape
    assert c == 1 and h == _H_IN and w == _H_IN, "MyNet requires (N, 1, 126, 126) input"
    x = x_nchw[:, 0, :, :].astype(jnp.float32)             # squeeze channel -> (N, H, W)
    x = jnp.pad(x, ((0, 0), (0, 0), (0, _W_PAD - _H_IN)))  # lane-pad 126 -> 128
    bb = n if n <= block_b else block_b                    # static batch block size
    pad = (-n) % bb
    if pad:
        x = jnp.pad(x, ((0, pad), (0, 0), (0, 0)))
    out = _run_fused(x, prep, bb)
    return out[:n]                                         # (N, 36)


def mynet_reference(params, x_nchw):
    """Pure-JAX (XLA) reference matching the PyTorch module."""
    x = x_nchw.astype(jnp.float32)

    def conv_pool(z, w, b):
        y = lax.conv_general_dilated(
            z, w.reshape(1, 1, 3, 3), (1, 1), "VALID",
            dimension_numbers=("NCHW", "OIHW", "NCHW"))
        y = jax.nn.relu(y + b.reshape(1, 1, 1, 1))
        return lax.reduce_window(y, -jnp.inf, lax.max,
                                 (1, 1, 2, 2), (1, 1, 2, 2), "VALID")

    x = conv_pool(x, params["conv1_w"], params["conv1_b"])
    x = conv_pool(x, params["conv2_w"], params["conv2_b"])
    x = x.reshape(x.shape[0], -1)
    x = jax.nn.relu(x @ params["fc1_w"].T + params["fc1_b"])
    x = jax.nn.relu(x @ params["fc2_w"].T + params["fc2_b"])
    return jax.nn.sigmoid(x @ params["fc3_w"].T + params["fc3_b"])


if __name__ == "__main__":
    key = jax.random.PRNGKey(0)
    pkey, xkey = jax.random.split(key)
    params = init_params(pkey)
    prep = prepare_params(params)

    x = jax.random.uniform(xkey, (2, 1, _H_IN, _H_IN), jnp.float32)  # batch=2, 1ch, 126x126
    out = mynet_forward(prep, x)
    jax.block_until_ready(out)

    assert out.shape == (2, _FC3) and out.dtype == jnp.float32
    ref = mynet_reference(params, x)
    assert jnp.allclose(out, ref, atol=1e-3, rtol=1e-3), "mismatch vs pure-JAX reference"
    print("KERNEL_OK")
</pallas_src>

<mosaic_0001>
module attributes {stable_mosaic.version = 11 : i64} {
  func.func @_mynet_fused_kernel(%arg0: i32, %arg1: memref<2x126x128xf32, #tpu.memory_space<vmem>>, %arg2: memref<3x128x128xf32, #tpu.memory_space<vmem>>, %arg3: memref<1x1xf32, #tpu.memory_space<vmem>>, %arg4: memref<3x128x128xf32, #tpu.memory_space<vmem>>, %arg5: memref<1x1xf32, #tpu.memory_space<vmem>>, %arg6: memref<127x128xf32, #tpu.memory_space<vmem>>, %arg7: memref<62x123xf32, #tpu.memory_space<vmem>>, %arg8: memref<127x128xf32, #tpu.memory_space<vmem>>, %arg9: memref<30x59xf32, #tpu.memory_space<vmem>>, %arg10: memref<3840x256xf32, #tpu.memory_space<vmem>>, %arg11: memref<1x256xf32, #tpu.memory_space<vmem>>, %arg12: memref<256x84xf32, #tpu.memory_space<vmem>>, %arg13: memref<1x84xf32, #tpu.memory_space<vmem>>, %arg14: memref<84x36xf32, #tpu.memory_space<vmem>>, %arg15: memref<1x36xf32, #tpu.memory_space<vmem>>, %arg16: memref<2x36xf32, #tpu.memory_space<vmem>>, %arg17: memref<30x2x128xf32, #tpu.memory_space<vmem>>) attributes {dimension_semantics = [#tpu.dimension_semantics<parallel>], iteration_bounds = array<i64: 1>, scalar_prefetch = 0 : i64, scratch_operands = 1 : i64, tpu.core_type = #tpu.core_type<tc>, window_params = [{transform_indices = @transform_0, window_bounds = array<i64: 2, 126, 128>}, {pipeline_mode = #tpu.pipeline_mode<synchronous>, transform_indices = @transform_1, window_bounds = array<i64: 3, 128, 128>}, {pipeline_mode = #tpu.pipeline_mode<synchronous>, transform_indices = @transform_2, window_bounds = array<i64: 1, 1>}, {pipeline_mode = #tpu.pipeline_mode<synchronous>, transform_indices = @transform_3, window_bounds = array<i64: 3, 128, 128>}, {pipeline_mode = #tpu.pipeline_mode<synchronous>, transform_indices = @transform_4, window_bounds = array<i64: 1, 1>}, {pipeline_mode = #tpu.pipeline_mode<synchronous>, transform_indices = @transform_5, window_bounds = array<i64: 127, 128>}, {pipeline_mode = #tpu.pipeline_mode<synchronous>, transform_indices = @transform_6, window_bounds = array<i64: 62, 123>}, {pipeline_mode = #tpu.pipeline_mode<synchronous>, transform_indices = @transform_7, window_bounds = array<i64: 127, 128>}, {pipeline_mode = #tpu.pipeline_mode<synchronous>, transform_indices = @transform_8, window_bounds = array<i64: 30, 59>}, {pipeline_mode = #tpu.pipeline_mode<synchronous>, transform_indices = @transform_9, window_bounds = array<i64: 3840, 256>}, {pipeline_mode = #tpu.pipeline_mode<synchronous>, transform_indices = @transform_10, window_bounds = array<i64: 1, 256>}, {pipeline_mode = #tpu.pipeline_mode<synchronous>, transform_indices = @transform_11, window_bounds = array<i64: 256, 84>}, {pipeline_mode = #tpu.pipeline_mode<synchronous>, transform_indices = @transform_12, window_bounds = array<i64: 1, 84>}, {pipeline_mode = #tpu.pipeline_mode<synchronous>, transform_indices = @transform_13, window_bounds = array<i64: 84, 36>}, {pipeline_mode = #tpu.pipeline_mode<synchronous>, transform_indices = @transform_14, window_bounds = array<i64: 1, 36>}, {transform_indices = @transform_15, window_bounds = array<i64: 2, 36>}]} {
    %c0_i32 = arith.constant 0 : i32
    %c2_i32 = arith.constant 2 : i32
    %0 = arith.addi %c0_i32, %c2_i32 : i32
    %c1_i32 = arith.constant 1 : i32
    scf.for %arg18 = %c0_i32 to %0 step %c1_i32  : i32 {
      %89 = arith.index_cast %arg18 : i32 to index
      %c0_80 = arith.constant 0 : index
      %c0_81 = arith.constant 0 : index
      %90 = vector.load %arg1[%89, %c0_80, %c0_81] : memref<2x126x128xf32, #tpu.memory_space<vmem>>, vector<1x126x128xf32>
      %91 = vector.shape_cast %90 : vector<1x126x128xf32> to vector<126x128xf32>
      %c0_82 = arith.constant 0 : index
      %c0_83 = arith.constant 0 : index
      %92 = vector.load %arg3[%c0_82, %c0_83] : memref<1x1xf32, #tpu.memory_space<vmem>>, vector<1x1xf32>
      %93 = vector.extract_strided_slice %91 {offsets = [0, 0], sizes = [124, 128], strides = [1, 1]} : vector<126x128xf32> to vector<124x128xf32>
      %c0_84 = arith.constant 0 : index
      %c0_85 = arith.constant 0 : index
      %c0_86 = arith.constant 0 : index
      %94 = vector.load %arg2[%c0_84, %c0_85, %c0_86] : memref<3x128x128xf32, #tpu.memory_space<vmem>>, vector<1x128x128xf32>
      %95 = vector.shape_cast %94 : vector<1x128x128xf32> to vector<128x128xf32>
      %cst_87 = arith.constant dense<0.000000e+00> : vector<124x128xf32>
      %96 = tpu.matmul %93, %95, %cst_87 {dimension_numbers = #tpu.dot_dimension_numbers<[1], [0], [0], [1], [0, 0, 1, 1], [], []>} : vector<124x128xf32>, vector<128x128xf32>, vector<124x128xf32> -> vector<124x128xf32>
      %97 = vector.extract_strided_slice %91 {offsets = [1, 0], sizes = [124, 128], strides = [1, 1]} : vector<126x128xf32> to vector<124x128xf32>
      %c1_88 = arith.constant 1 : index
      %c0_89 = arith.constant 0 : index
      %c0_90 = arith.constant 0 : index
      %98 = vector.load %arg2[%c1_88, %c0_89, %c0_90] : memref<3x128x128xf32, #tpu.memory_space<vmem>>, vector<1x128x128xf32>
      %99 = vector.shape_cast %98 : vector<1x128x128xf32> to vector<128x128xf32>
      %cst_91 = arith.constant dense<0.000000e+00> : vector<124x128xf32>
      %100 = tpu.matmul %97, %99, %cst_91 {dimension_numbers = #tpu.dot_dimension_numbers<[1], [0], [0], [1], [0, 0, 1, 1], [], []>} : vector<124x128xf32>, vector<128x128xf32>, vector<124x128xf32> -> vector<124x128xf32>
      %101 = arith.addf %96, %100 : vector<124x128xf32>
      %102 = vector.extract_strided_slice %91 {offsets = [2, 0], sizes = [124, 128], strides = [1, 1]} : vector<126x128xf32> to vector<124x128xf32>
      %c2_92 = arith.constant 2 : index
      %c0_93 = arith.constant 0 : index
      %c0_94 = arith.constant 0 : index
      %103 = vector.load %arg2[%c2_92, %c0_93, %c0_94] : memref<3x128x128xf32, #tpu.memory_space<vmem>>, vector<1x128x128xf32>
      %104 = vector.shape_cast %103 : vector<1x128x128xf32> to vector<128x128xf32>
      %cst_95 = arith.constant dense<0.000000e+00> : vector<124x128xf32>
      %105 = tpu.matmul %102, %104, %cst_95 {dimension_numbers = #tpu.dot_dimension_numbers<[1], [0], [0], [1], [0, 0, 1, 1], [], []>} : vector<124x128xf32>, vector<128x128xf32>, vector<124x128xf32> -> vector<124x128xf32>
      %106 = arith.addf %101, %105 : vector<124x128xf32>
      %107 = vector.broadcast %92 : vector<1x1xf32> to vector<124x128xf32>
      %108 = arith.addf %106, %107 : vector<124x128xf32>
      %cst_96 = arith.constant 0.000000e+00 : f32
      %109 = vector.broadcast %cst_96 : f32 to vector<124x128xf32>
      %110 = arith.maximumf %108, %109 : vector<124x128xf32>
      %111 = vector.extract_strided_slice %110 {offsets = [0, 0], sizes = [123, 128], strides = [1, 1]} : vector<124x128xf32> to vector<123x128xf32>
      %112 = vector.extract_strided_slice %110 {offsets = [1, 0], sizes = [123, 128], strides = [1, 1]} : vector<124x128xf32> to vector<123x128xf32>
      %113 = arith.maximumf %111, %112 : vector<123x128xf32>
      %114 = vector.extract_strided_slice %113 {offsets = [0, 0], sizes = [123, 127], strides = [1, 1]} : vector<123x128xf32> to vector<123x127xf32>
      %115 = vector.extract_strided_slice %113 {offsets = [0, 1], sizes = [123, 127], strides = [1, 1]} : vector<123x128xf32> to vector<123x127xf32>
      %116 = arith.maximumf %114, %115 : vector<123x127xf32>
      %c0_97 = arith.constant 0 : index
      %c0_98 = arith.constant 0 : index
      %117 = vector.load %arg6[%c0_97, %c0_98] : memref<127x128xf32, #tpu.memory_space<vmem>>, vector<127x128xf32>
      %cst_99 = arith.constant dense<0.000000e+00> : vector<123x128xf32>
      %118 = tpu.matmul %116, %117, %cst_99 {dimension_numbers = #tpu.dot_dimension_numbers<[1], [0], [0], [1], [0, 0, 1, 1], [], []>} : vector<123x127xf32>, vector<127x128xf32>, vector<123x128xf32> -> vector<123x128xf32>
      %c0_100 = arith.constant 0 : index
      %c0_101 = arith.constant 0 : index
      %119 = vector.load %arg7[%c0_100, %c0_101] : memref<62x123xf32, #tpu.memory_space<vmem>>, vector<62x123xf32>
      %cst_102 = arith.constant dense<0.000000e+00> : vector<62x128xf32>
      %120 = tpu.matmul %119, %118, %cst_102 {dimension_numbers = #tpu.dot_dimension_numbers<[1], [0], [0], [1], [0, 0, 1, 1], [], []>} : vector<62x123xf32>, vector<123x128xf32>, vector<62x128xf32> -> vector<62x128xf32>
      %c0_103 = arith.constant 0 : index
      %c0_104 = arith.constant 0 : index
      %121 = vector.load %arg5[%c0_103, %c0_104] : memref<1x1xf32, #tpu.memory_space<vmem>>, vector<1x1xf32>
      %122 = vector.extract_strided_slice %120 {offsets = [0, 0], sizes = [60, 128], strides = [1, 1]} : vector<62x128xf32> to vector<60x128xf32>
      %c0_105 = arith.constant 0 : index
      %c0_106 = arith.constant 0 : index
      %c0_107 = arith.constant 0 : index
      %123 = vector.load %arg4[%c0_105, %c0_106, %c0_107] : memref<3x128x128xf32, #tpu.memory_space<vmem>>, vector<1x128x128xf32>
      %124 = vector.shape_cast %123 : vector<1x128x128xf32> to vector<128x128xf32>
      %cst_108 = arith.constant dense<0.000000e+00> : vector<60x128xf32>
      %125 = tpu.matmul %122, %124, %cst_108 {dimension_numbers = #tpu.dot_dimension_numbers<[1], [0], [0], [1], [0, 0, 1, 1], [], []>} : vector<60x128xf32>, vector<128x128xf32>, vector<60x128xf32> -> vector<60x128xf32>
      %126 = vector.extract_strided_slice %120 {offsets = [1, 0], sizes = [60, 128], strides = [1, 1]} : vector<62x128xf32> to vector<60x128xf32>
      %c1_109 = arith.constant 1 : index
      %c0_110 = arith.constant 0 : index
      %c0_111 = arith.constant 0 : index
      %127 = vector.load %arg4[%c1_109, %c0_110, %c0_111] : memref<3x128x128xf32, #tpu.memory_space<vmem>>, vector<1x128x128xf32>
      %128 = vector.shape_cast %127 : vector<1x128x128xf32> to vector<128x128xf32>
      %cst_112 = arith.constant dense<0.000000e+00> : vector<60x128xf32>
      %129 = tpu.matmul %126, %128, %cst_112 {dimension_numbers = #tpu.dot_dimension_numbers<[1], [0], [0], [1], [0, 0, 1, 1], [], []>} : vector<60x128xf32>, vector<128x128xf32>, vector<60x128xf32> -> vector<60x128xf32>
      %130 = arith.addf %125, %129 : vector<60x128xf32>
      %131 = vector.extract_strided_slice %120 {offsets = [2, 0], sizes = [60, 128], strides = [1, 1]} : vector<62x128xf32> to vector<60x128xf32>
      %c2_113 = arith.constant 2 : index
      %c0_114 = arith.constant 0 : index
      %c0_115 = arith.constant 0 : index
      %132 = vector.load %arg4[%c2_113, %c0_114, %c0_115] : memref<3x128x128xf32, #tpu.memory_space<vmem>>, vector<1x128x128xf32>
      %133 = vector.shape_cast %132 : vector<1x128x128xf32> to vector<128x128xf32>
      %cst_116 = arith.constant dense<0.000000e+00> : vector<60x128xf32>
      %134 = tpu.matmul %131, %133, %cst_116 {dimension_numbers = #tpu.dot_dimension_numbers<[1], [0], [0], [1], [0, 0, 1, 1], [], []>} : vector<60x128xf32>, vector<128x128xf32>, vector<60x128xf32> -> vector<60x128xf32>
      %135 = arith.addf %130, %134 : vector<60x128xf32>
      %136 = vector.broadcast %121 : vector<1x1xf32> to vector<60x128xf32>
      %137 = arith.addf %135, %136 : vector<60x128xf32>
      %cst_117 = arith.constant 0.000000e+00 : f32
      %138 = vector.broadcast %cst_117 : f32 to vector<60x128xf32>
      %139 = arith.maximumf %137, %138 : vector<60x128xf32>
      %140 = vector.extract_strided_slice %139 {offsets = [0, 0], sizes = [59, 128], strides = [1, 1]} : vector<60x128xf32> to vector<59x128xf32>
      %141 = vector.extract_strided_slice %139 {offsets = [1, 0], sizes = [59, 128], strides = [1, 1]} : vector<60x128xf32> to vector<59x128xf32>
      %142 = arith.maximumf %140, %141 : vector<59x128xf32>
      %143 = vector.extract_strided_slice %142 {offsets = [0, 0], sizes = [59, 127], strides = [1, 1]} : vector<59x128xf32> to vector<59x127xf32>
      %144 = vector.extract_strided_slice %142 {offsets = [0, 1], sizes = [59, 127], strides = [1, 1]} : vector<59x128xf32> to vector<59x127xf32>
      %145 = arith.maximumf %143, %144 : vector<59x127xf32>
      %c0_118 = arith.constant 0 : index
      %c0_119 = arith.constant 0 : index
      %146 = vector.load %arg8[%c0_118, %c0_119] : memref<127x128xf32, #tpu.memory_space<vmem>>, vector<127x128xf32>
      %cst_120 = arith.constant dense<0.000000e+00> : vector<59x128xf32>
      %147 = tpu.matmul %145, %146, %cst_120 {dimension_numbers = #tpu.dot_dimension_numbers<[1], [0], [0], [1], [0, 0, 1, 1], [], []>} : vector<59x127xf32>, vector<127x128xf32>, vector<59x128xf32> -> vector<59x128xf32>
      %c0_121 = arith.constant 0 : index
      %c0_122 = arith.constant 0 : index
      %148 = vector.load %arg9[%c0_121, %c0_122] : memref<30x59xf32, #tpu.memory_space<vmem>>, vector<30x59xf32>
      %cst_123 = arith.constant dense<0.000000e+00> : vector<30x128xf32>
      %149 = tpu.matmul %148, %147, %cst_123 {dimension_numbers = #tpu.dot_dimension_numbers<[1], [0], [0], [1], [0, 0, 1, 1], [], []>} : vector<30x59xf32>, vector<59x128xf32>, vector<30x128xf32> -> vector<30x128xf32>
      %150 = vector.extract_strided_slice %149 {offsets = [0, 0], sizes = [1, 128], strides = [1, 1]} : vector<30x128xf32> to vector<1x128xf32>
      %c0_124 = arith.constant 0 : index
      %151 = arith.index_cast %arg18 : i32 to index
      %c0_125 = arith.constant 0 : index
      %152 = vector.load %arg17[%c0_124, %151, %c0_125] : memref<30x2x128xf32, #tpu.memory_space<vmem>>, vector<1x1x128xf32>
      %153 = vector.shape_cast %152 : vector<1x1x128xf32> to vector<1x128xf32>
      %154 = vector.shape_cast %150 : vector<1x128xf32> to vector<1x1x128xf32>
      tpu.vector_store %arg17[%c0_124, %151, %c0_125], %154 {strides = array<i32>} : memref<30x2x128xf32, #tpu.memory_space<vmem>>, vector<1x1x128xf32>,
      %155 = vector.extract_strided_slice %149 {offsets = [1, 0], sizes = [1, 128], strides = [1, 1]} : vector<30x128xf32> to vector<1x128xf32>
      %c1_126 = arith.constant 1 : index
      %156 = arith.index_cast %arg18 : i32 to index
      %c0_127 = arith.constant 0 : index
      %157 = vector.load %arg17[%c1_126, %156, %c0_127] : memref<30x2x128xf32, #tpu.memory_space<vmem>>, vector<1x1x128xf32>
      %158 = vector.shape_cast %157 : vector<1x1x128xf32> to vector<1x128xf32>
      %159 = vector.shape_cast %155 : vector<1x128xf32> to vector<1x1x128xf32>
      tpu.vector_store %arg17[%c1_126, %156, %c0_127], %159 {strides = array<i32>} : memref<30x2x128xf32, #tpu.memory_space<vmem>>, vector<1x1x128xf32>,
      %160 = vector.extract_strided_slice %149 {offsets = [2, 0], sizes = [1, 128], strides = [1, 1]} : vector<30x128xf32> to vector<1x128xf32>
      %c2_128 = arith.constant 2 : index
      %161 = arith.index_cast %arg18 : i32 to index
      %c0_129 = arith.constant 0 : index
      %162 = vector.load %arg17[%c2_128, %161, %c0_129] : memref<30x2x128xf32, #tpu.memory_space<vmem>>, vector<1x1x128xf32>
      %163 = vector.shape_cast %162 : vector<1x1x128xf32> to vector<1x128xf32>
      %164 = vector.shape_cast %160 : vector<1x128xf32> to vector<1x1x128xf32>
      tpu.vector_store %arg17[%c2_128, %161, %c0_129], %164 {strides = array<i32>} : memref<30x2x128xf32, #tpu.memory_space<vmem>>, vector<1x1x128xf32>,
      %165 = vector.extract_strided_slice %149 {offsets = [3, 0], sizes = [1, 128], strides = [1, 1]} : vector<30x128xf32> to vector<1x128xf32>
      %c3_130 = arith.constant 3 : index
      %166 = arith.index_cast %arg18 : i32 to index
      %c0_131 = arith.constant 0 : index
      %167 = vector.load %arg17[%c3_130, %166, %c0_131] : memref<30x2x128xf32, #tpu.memory_space<vmem>>, vector<1x1x128xf32>
      %168 = vector.shape_cast %167 : vector<1x1x128xf32> to vector<1x128xf32>
      %169 = vector.shape_cast %165 : vector<1x128xf32> to vector<1x1x128xf32>
      tpu.vector_store %arg17[%c3_130, %166, %c0_131], %169 {strides = array<i32>} : memref<30x2x128xf32, #tpu.memory_space<vmem>>, vector<1x1x128xf32>,
      %170 = vector.extract_strided_slice %149 {offsets = [4, 0], sizes = [1, 128], strides = [1, 1]} : vector<30x128xf32> to vector<1x128xf32>
      %c4_132 = arith.constant 4 : index
      %171 = arith.index_cast %arg18 : i32 to index
      %c0_133 = arith.constant 0 : index
      %172 = vector.load %arg17[%c4_132, %171, %c0_133] : memref<30x2x128xf32, #tpu.memory_space<vmem>>, vector<1x1x128xf32>
      %173 = vector.shape_cast %172 : vector<1x1x128xf32> to vector<1x128xf32>
      %174 = vector.shape_cast %170 : vector<1x128xf32> to vector<1x1x128xf32>
      tpu.vector_store %arg17[%c4_132, %171, %c0_133], %174 {strides = array<i32>} : memref<30x2x128xf32, #tpu.memory_space<vmem>>, vector<1x1x128xf32>,
      %175 = vector.extract_strided_slice %149 {offsets = [5, 0], sizes = [1, 128], strides = [1, 1]} : vector<30x128xf32> to vector<1x128xf32>
      %c5_134 = arith.constant 5 : index
      %176 = arith.index_cast %arg18 : i32 to index
      %c0_135 = arith.constant 0 : index
      %177 = vector.load %arg17[%c5_134, %176, %c0_135] : memref<30x2x128xf32, #tpu.memory_space<vmem>>, vector<1x1x128xf32>
      %178 = vector.shape_cast %177 : vector<1x1x128xf32> to vector<1x128xf32>
      %179 = vector.shape_cast %175 : vector<1x128xf32> to vector<1x1x128xf32>
      tpu.vector_store %arg17[%c5_134, %176, %c0_135], %179 {strides = array<i32>} : memref<30x2x128xf32, #tpu.memory_space<vmem>>, vector<1x1x128xf32>,
      %180 = vector.extract_strided_slice %149 {offsets = [6, 0], sizes = [1, 128], strides = [1, 1]} : vector<30x128xf32> to vector<1x128xf32>
      %c6_136 = arith.constant 6 : index
      %181 = arith.index_cast %arg18 : i32 to index
      %c0_137 = arith.constant 0 : index
      %182 = vector.load %arg17[%c6_136, %181, %c0_137] : memref<30x2x128xf32, #tpu.memory_space<vmem>>, vector<1x1x128xf32>
      %183 = vector.shape_cast %182 : vector<1x1x128xf32> to vector<1x128xf32>
      %184 = vector.shape_cast %180 : vector<1x128xf32> to vector<1x1x128xf32>
      tpu.vector_store %arg17[%c6_136, %181, %c0_137], %184 {strides = array<i32>} : memref<30x2x128xf32, #tpu.memory_space<vmem>>, vector<1x1x128xf32>,
      %185 = vector.extract_strided_slice %149 {offsets = [7, 0], sizes = [1, 128], strides = [1, 1]} : vector<30x128xf32> to vector<1x128xf32>
      %c7_138 = arith.constant 7 : index
      %186 = arith.index_cast %arg18 : i32 to index
      %c0_139 = arith.constant 0 : index
      %187 = vector.load %arg17[%c7_138, %186, %c0_139] : memref<30x2x128xf32, #tpu.memory_space<vmem>>, vector<1x1x128xf32>
      %188 = vector.shape_cast %187 : vector<1x1x128xf32> to vector<1x128xf32>
      %189 = vector.shape_cast %185 : vector<1x128xf32> to vector<1x1x128xf32>
      tpu.vector_store %arg17[%c7_138, %186, %c0_139], %189 {strides = array<i32>} : memref<30x2x128xf32, #tpu.memory_space<vmem>>, vector<1x1x128xf32>,
      %190 = vector.extract_strided_slice %149 {offsets = [8, 0], sizes = [1, 128], strides = [1, 1]} : vector<30x128xf32> to vector<1x128xf32>
      %c8_140 = arith.constant 8 : index
      %191 = arith.index_cast %arg18 : i32 to index
      %c0_141 = arith.constant 0 : index
      %192 = vector.load %arg17[%c8_140, %191, %c0_141] : memref<30x2x128xf32, #tpu.memory_space<vmem>>, vector<1x1x128xf32>
      %193 = vector.shape_cast %192 : vector<1x1x128xf32> to vector<1x128xf32>
      %194 = vector.shape_cast %190 : vector<1x128xf32> to vector<1x1x128xf32>
      tpu.vector_store %arg17[%c8_140, %191, %c0_141], %194 {strides = array<i32>} : memref<30x2x128xf32, #tpu.memory_space<vmem>>, vector<1x1x128xf32>,
      %195 = vector.extract_strided_slice %149 {offsets = [9, 0], sizes = [1, 128], strides = [1, 1]} : vector<30x128xf32> to vector<1x128xf32>
      %c9_142 = arith.constant 9 : index
      %196 = arith.index_cast %arg18 : i32 to index
      %c0_143 = arith.constant 0 : index
      %197 = vector.load %arg17[%c9_142, %196, %c0_143] : memref<30x2x128xf32, #tpu.memory_space<vmem>>, vector<1x1x128xf32>
      %198 = vector.shape_cast %197 : vector<1x1x128xf32> to vector<1x128xf32>
      %199 = vector.shape_cast %195 : vector<1x128xf32> to vector<1x1x128xf32>
      tpu.vector_store %arg17[%c9_142, %196, %c0_143], %199 {strides = array<i32>} : memref<30x2x128xf32, #tpu.memory_space<vmem>>, vector<1x1x128xf32>,
      %200 = vector.extract_strided_slice %149 {offsets = [10, 0], sizes = [1, 128], strides = [1, 1]} : vector<30x128xf32> to vector<1x128xf32>
      %c10_144 = arith.constant 10 : index
      %201 = arith.index_cast %arg18 : i32 to index
      %c0_145 = arith.constant 0 : index
      %202 = vector.load %arg17[%c10_144, %201, %c0_145] : memref<30x2x128xf32, #tpu.memory_space<vmem>>, vector<1x1x128xf32>
      %203 = vector.shape_cast %202 : vector<1x1x128xf32> to vector<1x128xf32>
      %204 = vector.shape_cast %200 : vector<1x128xf32> to vector<1x1x128xf32>
      tpu.vector_store %arg17[%c10_144, %201, %c0_145], %204 {strides = array<i32>} : memref<30x2x128xf32, #tpu.memory_space<vmem>>, vector<1x1x128xf32>,
      %205 = vector.extract_strided_slice %149 {offsets = [11, 0], sizes = [1, 128], strides = [1, 1]} : vector<30x128xf32> to vector<1x128xf32>
      %c11_146 = arith.constant 11 : index
      %206 = arith.index_cast %arg18 : i32 to index
      %c0_147 = arith.constant 0 : index
      %207 = vector.load %arg17[%c11_146, %206, %c0_147] : memref<30x2x128xf32, #tpu.memory_space<vmem>>, vector<1x1x128xf32>
      %208 = vector.shape_cast %207 : vector<1x1x128xf32> to vector<1x128xf32>
      %209 = vector.shape_cast %205 : vector<1x128xf32> to vector<1x1x128xf32>
      tpu.vector_store %arg17[%c11_146, %206, %c0_147], %209 {strides = array<i32>} : memref<30x2x128xf32, #tpu.memory_space<vmem>>, vector<1x1x128xf32>,
      %210 = vector.extract_strided_slice %149 {offsets = [12, 0], sizes = [1, 128], strides = [1, 1]} : vector<30x128xf32> to vector<1x128xf32>
      %c12_148 = arith.constant 12 : index
      %211 = arith.index_cast %arg18 : i32 to index
      %c0_149 = arith.constant 0 : index
      %212 = vector.load %arg17[%c12_148, %211, %c0_149] : memref<30x2x128xf32, #tpu.memory_space<vmem>>, vector<1x1x128xf32>
      %213 = vector.shape_cast %212 : vector<1x1x128xf32> to vector<1x128xf32>
      %214 = vector.shape_cast %210 : vector<1x128xf32> to vector<1x1x128xf32>
      tpu.vector_store %arg17[%c12_148, %211, %c0_149], %214 {strides = array<i32>} : memref<30x2x128xf32, #tpu.memory_space<vmem>>, vector<1x1x128xf32>,
      %215 = vector.extract_strided_slice %149 {offsets = [13, 0], sizes = [1, 128], strides = [1, 1]} : vector<30x128xf32> to vector<1x128xf32>
      %c13_150 = arith.constant 13 : index
      %216 = arith.index_cast %arg18 : i32 to index
      %c0_151 = arith.constant 0 : index
      %217 = vector.load %arg17[%c13_150, %216, %c0_151] : memref<30x2x128xf32, #tpu.memory_space<vmem>>, vector<1x1x128xf32>
      %218 = vector.shape_cast %217 : vector<1x1x128xf32> to vector<1x128xf32>
      %219 = vector.shape_cast %215 : vector<1x128xf32> to vector<1x1x128xf32>
      tpu.vector_store %arg17[%c13_150, %216, %c0_151], %219 {strides = array<i32>} : memref<30x2x128xf32, #tpu.memory_space<vmem>>, vector<1x1x128xf32>,
      %220 = vector.extract_strided_slice %149 {offsets = [14, 0], sizes = [1, 128], strides = [1, 1]} : vector<30x128xf32> to vector<1x128xf32>
      %c14_152 = arith.constant 14 : index
      %221 = arith.index_cast %arg18 : i32 to index
      %c0_153 = arith.constant 0 : index
      %222 = vector.load %arg17[%c14_152, %221, %c0_153] : memref<30x2x128xf32, #tpu.memory_space<vmem>>, vector<1x1x128xf32>
      %223 = vector.shape_cast %222 : vector<1x1x128xf32> to vector<1x128xf32>
      %224 = vector.shape_cast %220 : vector<1x128xf32> to vector<1x1x128xf32>
      tpu.vector_store %arg17[%c14_152, %221, %c0_153], %224 {strides = array<i32>} : memref<30x2x128xf32, #tpu.memory_space<vmem>>, vector<1x1x128xf32>,
      %225 = vector.extract_strided_slice %149 {offsets = [15, 0], sizes = [1, 128], strides = [1, 1]} : vector<30x128xf32> to vector<1x128xf32>
      %c15_154 = arith.constant 15 : index
      %226 = arith.index_cast %arg18 : i32 to index
      %c0_155 = arith.constant 0 : index
      %227 = vector.load %arg17[%c15_154, %226, %c0_155] : memref<30x2x128xf32, #tpu.memory_space<vmem>>, vector<1x1x128xf32>
      %228 = vector.shape_cast %227 : vector<1x1x128xf32> to vector<1x128xf32>
      %229 = vector.shape_cast %225 : vector<1x128xf32> to vector<1x1x128xf32>
      tpu.vector_store %arg17[%c15_154, %226, %c0_155], %229 {strides = array<i32>} : memref<30x2x128xf32, #tpu.memory_space<vmem>>, vector<1x1x128xf32>,
      %230 = vector.extract_strided_slice %149 {offsets = [16, 0], sizes = [1, 128], strides = [1, 1]} : vector<30x128xf32> to vector<1x128xf32>
      %c16_156 = arith.constant 16 : index
      %231 = arith.index_cast %arg18 : i32 to index
      %c0_157 = arith.constant 0 : index
      %232 = vector.load %arg17[%c16_156, %231, %c0_157] : memref<30x2x128xf32, #tpu.memory_space<vmem>>, vector<1x1x128xf32>
      %233 = vector.shape_cast %232 : vector<1x1x128xf32> to vector<1x128xf32>
      %234 = vector.shape_cast %230 : vector<1x128xf32> to vector<1x1x128xf32>
      tpu.vector_store %arg17[%c16_156, %231, %c0_157], %234 {strides = array<i32>} : memref<30x2x128xf32, #tpu.memory_space<vmem>>, vector<1x1x128xf32>,
      %235 = vector.extract_strided_slice %149 {offsets = [17, 0], sizes = [1, 128], strides = [1, 1]} : vector<30x128xf32> to vector<1x128xf32>
      %c17_158 = arith.constant 17 : index
      %236 = arith.index_cast %arg18 : i32 to index
      %c0_159 = arith.constant 0 : index
      %237 = vector.load %arg17[%c17_158, %236, %c0_159] : memref<30x2x128xf32, #tpu.memory_space<vmem>>, vector<1x1x128xf32>
      %238 = vector.shape_cast %237 : vector<1x1x128xf32> to vector<1x128xf32>
      %239 = vector.shape_cast %235 : vector<1x128xf32> to vector<1x1x128xf32>
      tpu.vector_store %arg17[%c17_158, %236, %c0_159], %239 {strides = array<i32>} : memref<30x2x128xf32, #tpu.memory_space<vmem>>, vector<1x1x128xf32>,
      %240 = vector.extract_strided_slice %149 {offsets = [18, 0], sizes = [1, 128], strides = [1, 1]} : vector<30x128xf32> to vector<1x128xf32>
      %c18_160 = arith.constant 18 : index
      %241 = arith.index_cast %arg18 : i32 to index
      %c0_161 = arith.constant 0 : index
      %242 = vector.load %arg17[%c18_160, %241, %c0_161] : memref<30x2x128xf32, #tpu.memory_space<vmem>>, vector<1x1x128xf32>
      %243 = vector.shape_cast %242 : vector<1x1x128xf32> to vector<1x128xf32>
      %244 = vector.shape_cast %240 : vector<1x128xf32> to vector<1x1x128xf32>
      tpu.vector_store %arg17[%c18_160, %241, %c0_161], %244 {strides = array<i32>} : memref<30x2x128xf32, #tpu.memory_space<vmem>>, vector<1x1x128xf32>,
      %245 = vector.extract_strided_slice %149 {offsets = [19, 0], sizes = [1, 128], strides = [1, 1]} : vector<30x128xf32> to vector<1x128xf32>
      %c19_162 = arith.constant 19 : index
      %246 = arith.index_cast %arg18 : i32 to index
      %c0_163 = arith.constant 0 : index
      %247 = vector.load %arg17[%c19_162, %246, %c0_163] : memref<30x2x128xf32, #tpu.memory_space<vmem>>, vector<1x1x128xf32>
      %248 = vector.shape_cast %247 : vector<1x1x128xf32> to vector<1x128xf32>
      %249 = vector.shape_cast %245 : vector<1x128xf32> to vector<1x1x128xf32>
      tpu.vector_store %arg17[%c19_162, %246, %c0_163], %249 {strides = array<i32>} : memref<30x2x128xf32, #tpu.memory_space<vmem>>, vector<1x1x128xf32>,
      %250 = vector.extract_strided_slice %149 {offsets = [20, 0], sizes = [1, 128], strides = [1, 1]} : vector<30x128xf32> to vector<1x128xf32>
      %c20_164 = arith.constant 20 : index
      %251 = arith.index_cast %arg18 : i32 to index
      %c0_165 = arith.constant 0 : index
      %252 = vector.load %arg17[%c20_164, %251, %c0_165] : memref<30x2x128xf32, #tpu.memory_space<vmem>>, vector<1x1x128xf32>
      %253 = vector.shape_cast %252 : vector<1x1x128xf32> to vector<1x128xf32>
      %254 = vector.shape_cast %250 : vector<1x128xf32> to vector<1x1x128xf32>
      tpu.vector_store %arg17[%c20_164, %251, %c0_165], %254 {strides = array<i32>} : memref<30x2x128xf32, #tpu.memory_space<vmem>>, vector<1x1x128xf32>,
      %255 = vector.extract_strided_slice %149 {offsets = [21, 0], sizes = [1, 128], strides = [1, 1]} : vector<30x128xf32> to vector<1x128xf32>
      %c21_166 = arith.constant 21 : index
      %256 = arith.index_cast %arg18 : i32 to index
      %c0_167 = arith.constant 0 : index
      %257 = vector.load %arg17[%c21_166, %256, %c0_167] : memref<30x2x128xf32, #tpu.memory_space<vmem>>, vector<1x1x128xf32>
      %258 = vector.shape_cast %257 : vector<1x1x128xf32> to vector<1x128xf32>
      %259 = vector.shape_cast %255 : vector<1x128xf32> to vector<1x1x128xf32>
      tpu.vector_store %arg17[%c21_166, %256, %c0_167], %259 {strides = array<i32>} : memref<30x2x128xf32, #tpu.memory_space<vmem>>, vector<1x1x128xf32>,
      %260 = vector.extract_strided_slice %149 {offsets = [22, 0], sizes = [1, 128], strides = [1, 1]} : vector<30x128xf32> to vector<1x128xf32>
      %c22_168 = arith.constant 22 : index
      %261 = arith.index_cast %arg18 : i32 to index
      %c0_169 = arith.constant 0 : index
      %262 = vector.load %arg17[%c22_168, %261, %c0_169] : memref<30x2x128xf32, #tpu.memory_space<vmem>>, vector<1x1x128xf32>
      %263 = vector.shape_cast %262 : vector<1x1x128xf32> to vector<1x128xf32>
      %264 = vector.shape_cast %260 : vector<1x128xf32> to vector<1x1x128xf32>
      tpu.vector_store %arg17[%c22_168, %261, %c0_169], %264 {strides = array<i32>} : memref<30x2x128xf32, #tpu.memory_space<vmem>>, vector<1x1x128xf32>,
      %265 = vector.extract_strided_slice %149 {offsets = [23, 0], sizes = [1, 128], strides = [1, 1]} : vector<30x128xf32> to vector<1x128xf32>
      %c23_170 = arith.constant 23 : index
      %266 = arith.index_cast %arg18 : i32 to index
      %c0_171 = arith.constant 0 : index
      %267 = vector.load %arg17[%c23_170, %266, %c0_171] : memref<30x2x128xf32, #tpu.memory_space<vmem>>, vector<1x1x128xf32>
      %268 = vector.shape_cast %267 : vector<1x1x128xf32> to vector<1x128xf32>
      %269 = vector.shape_cast %265 : vector<1x128xf32> to vector<1x1x128xf32>
      tpu.vector_store %arg17[%c23_170, %266, %c0_171], %269 {strides = array<i32>} : memref<30x2x128xf32, #tpu.memory_space<vmem>>, vector<1x1x128xf32>,
      %270 = vector.extract_strided_slice %149 {offsets = [24, 0], sizes = [1, 128], strides = [1, 1]} : vector<30x128xf32> to vector<1x128xf32>
      %c24_172 = arith.constant 24 : index
      %271 = arith.index_cast %arg18 : i32 to index
      %c0_173 = arith.constant 0 : index
      %272 = vector.load %arg17[%c24_172, %271, %c0_173] : memref<30x2x128xf32, #tpu.memory_space<vmem>>, vector<1x1x128xf32>
      %273 = vector.shape_cast %272 : vector<1x1x128xf32> to vector<1x128xf32>
      %274 = vector.shape_cast %270 : vector<1x128xf32> to vector<1x1x128xf32>
      tpu.vector_store %arg17[%c24_172, %271, %c0_173], %274 {strides = array<i32>} : memref<30x2x128xf32, #tpu.memory_space<vmem>>, vector<1x1x128xf32>,
      %275 = vector.extract_strided_slice %149 {offsets = [25, 0], sizes = [1, 128], strides = [1, 1]} : vector<30x128xf32> to vector<1x128xf32>
      %c25_174 = arith.constant 25 : index
      %276 = arith.index_cast %arg18 : i32 to index
      %c0_175 = arith.constant 0 : index
      %277 = vector.load %arg17[%c25_174, %276, %c0_175] : memref<30x2x128xf32, #tpu.memory_space<vmem>>, vector<1x1x128xf32>
      %278 = vector.shape_cast %277 : vector<1x1x128xf32> to vector<1x128xf32>
      %279 = vector.shape_cast %275 : vector<1x128xf32> to vector<1x1x128xf32>
      tpu.vector_store %arg17[%c25_174, %276, %c0_175], %279 {strides = array<i32>} : memref<30x2x128xf32, #tpu.memory_space<vmem>>, vector<1x1x128xf32>,
      %280 = vector.extract_strided_slice %149 {offsets = [26, 0], sizes = [1, 128], strides = [1, 1]} : vector<30x128xf32> to vector<1x128xf32>
      %c26_176 = arith.constant 26 : index
      %281 = arith.index_cast %arg18 : i32 to index
      %c0_177 = arith.constant 0 : index
      %282 = vector.load %arg17[%c26_176, %281, %c0_177] : memref<30x2x128xf32, #tpu.memory_space<vmem>>, vector<1x1x128xf32>
      %283 = vector.shape_cast %282 : vector<1x1x128xf32> to vector<1x128xf32>
      %284 = vector.shape_cast %280 : vector<1x128xf32> to vector<1x1x128xf32>
      tpu.vector_store %arg17[%c26_176, %281, %c0_177], %284 {strides = array<i32>} : memref<30x2x128xf32, #tpu.memory_space<vmem>>, vector<1x1x128xf32>,
      %285 = vector.extract_strided_slice %149 {offsets = [27, 0], sizes = [1, 128], strides = [1, 1]} : vector<30x128xf32> to vector<1x128xf32>
      %c27_178 = arith.constant 27 : index
      %286 = arith.index_cast %arg18 : i32 to index
      %c0_179 = arith.constant 0 : index
      %287 = vector.load %arg17[%c27_178, %286, %c0_179] : memref<30x2x128xf32, #tpu.memory_space<vmem>>, vector<1x1x128xf32>
      %288 = vector.shape_cast %287 : vector<1x1x128xf32> to vector<1x128xf32>
      %289 = vector.shape_cast %285 : vector<1x128xf32> to vector<1x1x128xf32>
      tpu.vector_store %arg17[%c27_178, %286, %c0_179], %289 {strides = array<i32>} : memref<30x2x128xf32, #tpu.memory_space<vmem>>, vector<1x1x128xf32>,
      %290 = vector.extract_strided_slice %149 {offsets = [28, 0], sizes = [1, 128], strides = [1, 1]} : vector<30x128xf32> to vector<1x128xf32>
      %c28_180 = arith.constant 28 : index
      %291 = arith.index_cast %arg18 : i32 to index
      %c0_181 = arith.constant 0 : index
      %292 = vector.load %arg17[%c28_180, %291, %c0_181] : memref<30x2x128xf32, #tpu.memory_space<vmem>>, vector<1x1x128xf32>
      %293 = vector.shape_cast %292 : vector<1x1x128xf32> to vector<1x128xf32>
      %294 = vector.shape_cast %290 : vector<1x128xf32> to vector<1x1x128xf32>
      tpu.vector_store %arg17[%c28_180, %291, %c0_181], %294 {strides = array<i32>} : memref<30x2x128xf32, #tpu.memory_space<vmem>>, vector<1x1x128xf32>,
      %295 = vector.extract_strided_slice %149 {offsets = [29, 0], sizes = [1, 128], strides = [1, 1]} : vector<30x128xf32> to vector<1x128xf32>
      %c29_182 = arith.constant 29 : index
      %296 = arith.index_cast %arg18 : i32 to index
      %c0_183 = arith.constant 0 : index
      %297 = vector.load %arg17[%c29_182, %296, %c0_183] : memref<30x2x128xf32, #tpu.memory_space<vmem>>, vector<1x1x128xf32>
      %298 = vector.shape_cast %297 : vector<1x1x128xf32> to vector<1x128xf32>
      %299 = vector.shape_cast %295 : vector<1x128xf32> to vector<1x1x128xf32>
      tpu.vector_store %arg17[%c29_182, %296, %c0_183], %299 {strides = array<i32>} : memref<30x2x128xf32, #tpu.memory_space<vmem>>, vector<1x1x128xf32>,
    }
    %c2_i32_0 = arith.constant 2 : i32
    %c0 = arith.constant 0 : index
    %c0_1 = arith.constant 0 : index
    %c0_2 = arith.constant 0 : index
    %1 = vector.load %arg17[%c0, %c0_1, %c0_2] : memref<30x2x128xf32, #tpu.memory_space<vmem>>, vector<1x2x128xf32>
    %2 = vector.shape_cast %1 : vector<1x2x128xf32> to vector<2x128xf32>
    %c1 = arith.constant 1 : index
    %c0_3 = arith.constant 0 : index
    %c0_4 = arith.constant 0 : index
    %3 = vector.load %arg17[%c1, %c0_3, %c0_4] : memref<30x2x128xf32, #tpu.memory_space<vmem>>, vector<1x2x128xf32>
    %4 = vector.shape_cast %3 : vector<1x2x128xf32> to vector<2x128xf32>
    %c2 = arith.constant 2 : index
    %c0_5 = arith.constant 0 : index
    %c0_6 = arith.constant 0 : index
    %5 = vector.load %arg17[%c2, %c0_5, %c0_6] : memref<30x2x128xf32, #tpu.memory_space<vmem>>, vector<1x2x128xf32>
    %6 = vector.shape_cast %5 : vector<1x2x128xf32> to vector<2x128xf32>
    %c3 = arith.constant 3 : index
    %c0_7 = arith.constant 0 : index
    %c0_8 = arith.constant 0 : index
    %7 = vector.load %arg17[%c3, %c0_7, %c0_8] : memref<30x2x128xf32, #tpu.memory_space<vmem>>, vector<1x2x128xf32>
    %8 = vector.shape_cast %7 : vector<1x2x128xf32> to vector<2x128xf32>
    %c4 = arith.constant 4 : index
    %c0_9 = arith.constant 0 : index
    %c0_10 = arith.constant 0 : index
    %9 = vector.load %arg17[%c4, %c0_9, %c0_10] : memref<30x2x128xf32, #tpu.memory_space<vmem>>, vector<1x2x128xf32>
    %10 = vector.shape_cast %9 : vector<1x2x128xf32> to vector<2x128xf32>
    %c5 = arith.constant 5 : index
    %c0_11 = arith.constant 0 : index
    %c0_12 = arith.constant 0 : index
    %11 = vector.load %arg17[%c5, %c0_11, %c0_12] : memref<30x2x128xf32, #tpu.memory_space<vmem>>, vector<1x2x128xf32>
    %12 = vector.shape_cast %11 : vector<1x2x128xf32> to vector<2x128xf32>
    %c6 = arith.constant 6 : index
    %c0_13 = arith.constant 0 : index
    %c0_14 = arith.constant 0 : index
    %13 = vector.load %arg17[%c6, %c0_13, %c0_14] : memref<30x2x128xf32, #tpu.memory_space<vmem>>, vector<1x2x128xf32>
    %14 = vector.shape_cast %13 : vector<1x2x128xf32> to vector<2x128xf32>
    %c7 = arith.constant 7 : index
    %c0_15 = arith.constant 0 : index
    %c0_16 = arith.constant 0 : index
    %15 = vector.load %arg17[%c7, %c0_15, %c0_16] : memref<30x2x128xf32, #tpu.memory_space<vmem>>, vector<1x2x128xf32>
    %16 = vector.shape_cast %15 : vector<1x2x128xf32> to vector<2x128xf32>
    %c8 = arith.constant 8 : index
    %c0_17 = arith.constant 0 : index
    %c0_18 = arith.constant 0 : index
    %17 = vector.load %arg17[%c8, %c0_17, %c0_18] : memref<30x2x128xf32, #tpu.memory_space<vmem>>, vector<1x2x128xf32>
    %18 = vector.shape_cast %17 : vector<1x2x128xf32> to vector<2x128xf32>
    %c9 = arith.constant 9 : index
    %c0_19 = arith.constant 0 : index
    %c0_20 = arith.constant 0 : index
    %19 = vector.load %arg17[%c9, %c0_19, %c0_20] : memref<30x2x128xf32, #tpu.memory_space<vmem>>, vector<1x2x128xf32>
    %20 = vector.shape_cast %19 : vector<1x2x128xf32> to vector<2x128xf32>
    %c10 = arith.constant 10 : index
    %c0_21 = arith.constant 0 : index
    %c0_22 = arith.constant 0 : index
    %21 = vector.load %arg17[%c10, %c0_21, %c0_22] : memref<30x2x128xf32, #tpu.memory_space<vmem>>, vector<1x2x128xf32>
    %22 = vector.shape_cast %21 : vector<1x2x128xf32> to vector<2x128xf32>
    %c11 = arith.constant 11 : index
    %c0_23 = arith.constant 0 : index
    %c0_24 = arith.constant 0 : index
    %23 = vector.load %arg17[%c11, %c0_23, %c0_24] : memref<30x2x128xf32, #tpu.memory_space<vmem>>, vector<1x2x128xf32>
    %24 = vector.shape_cast %23 : vector<1x2x128xf32> to vector<2x128xf32>
    %c12 = arith.constant 12 : index
    %c0_25 = arith.constant 0 : index
    %c0_26 = arith.constant 0 : index
    %25 = vector.load %arg17[%c12, %c0_25, %c0_26] : memref<30x2x128xf32, #tpu.memory_space<vmem>>, vector<1x2x128xf32>
    %26 = vector.shape_cast %25 : vector<1x2x128xf32> to vector<2x128xf32>
    %c13 = arith.constant 13 : index
    %c0_27 = arith.constant 0 : index
    %c0_28 = arith.constant 0 : index
    %27 = vector.load %arg17[%c13, %c0_27, %c0_28] : memref<30x2x128xf32, #tpu.memory_space<vmem>>, vector<1x2x128xf32>
    %28 = vector.shape_cast %27 : vector<1x2x128xf32> to vector<2x128xf32>
    %c14 = arith.constant 14 : index
    %c0_29 = arith.constant 0 : index
    %c0_30 = arith.constant 0 : index
    %29 = vector.load %arg17[%c14, %c0_29, %c0_30] : memref<30x2x128xf32, #tpu.memory_space<vmem>>, vector<1x2x128xf32>
    %30 = vector.shape_cast %29 : vector<1x2x128xf32> to vector<2x128xf32>
    %c15 = arith.constant 15 : index
    %c0_31 = arith.constant 0 : index
    %c0_32 = arith.constant 0 : index
    %31 = vector.load %arg17[%c15, %c0_31, %c0_32] : memref<30x2x128xf32, #tpu.memory_space<vmem>>, vector<1x2x128xf32>
    %32 = vector.shape_cast %31 : vector<1x2x128xf32> to vector<2x128xf32>
    %c16 = arith.constant 16 : index
    %c0_33 = arith.constant 0 : index
    %c0_34 = arith.constant 0 : index
    %33 = vector.load %arg17[%c16, %c0_33, %c0_34] : memref<30x2x128xf32, #tpu.memory_space<vmem>>, vector<1x2x128xf32>
    %34 = vector.shape_cast %33 : vector<1x2x128xf32> to vector<2x128xf32>
    %c17 = arith.constant 17 : index
    %c0_35 = arith.constant 0 : index
    %c0_36 = arith.constant 0 : index
    %35 = vector.load %arg17[%c17, %c0_35, %c0_36] : memref<30x2x128xf32, #tpu.memory_space<vmem>>, vector<1x2x128xf32>
    %36 = vector.shape_cast %35 : vector<1x2x128xf32> to vector<2x128xf32>
    %c18 = arith.constant 18 : index
    %c0_37 = arith.constant 0 : index
    %c0_38 = arith.constant 0 : index
    %37 = vector.load %arg17[%c18, %c0_37, %c0_38] : memref<30x2x128xf32, #tpu.memory_space<vmem>>, vector<1x2x128xf32>
    %38 = vector.shape_cast %37 : vector<1x2x128xf32> to vector<2x128xf32>
    %c19 = arith.constant 19 : index
    %c0_39 = arith.constant 0 : index
    %c0_40 = arith.constant 0 : index
    %39 = vector.load %arg17[%c19, %c0_39, %c0_40] : memref<30x2x128xf32, #tpu.memory_space<vmem>>, vector<1x2x128xf32>
    %40 = vector.shape_cast %39 : vector<1x2x128xf32> to vector<2x128xf32>
    %c20 = arith.constant 20 : index
    %c0_41 = arith.constant 0 : index
    %c0_42 = arith.constant 0 : index
    %41 = vector.load %arg17[%c20, %c0_41, %c0_42] : memref<30x2x128xf32, #tpu.memory_space<vmem>>, vector<1x2x128xf32>
    %42 = vector.shape_cast %41 : vector<1x2x128xf32> to vector<2x128xf32>
    %c21 = arith.constant 21 : index
    %c0_43 = arith.constant 0 : index
    %c0_44 = arith.constant 0 : index
    %43 = vector.load %arg17[%c21, %c0_43, %c0_44] : memref<30x2x128xf32, #tpu.memory_space<vmem>>, vector<1x2x128xf32>
    %44 = vector.shape_cast %43 : vector<1x2x128xf32> to vector<2x128xf32>
    %c22 = arith.constant 22 : index
    %c0_45 = arith.constant 0 : index
    %c0_46 = arith.constant 0 : index
    %45 = vector.load %arg17[%c22, %c0_45, %c0_46] : memref<30x2x128xf32, #tpu.memory_space<vmem>>, vector<1x2x128xf32>
    %46 = vector.shape_cast %45 : vector<1x2x128xf32> to vector<2x128xf32>
    %c23 = arith.constant 23 : index
    %c0_47 = arith.constant 0 : index
    %c0_48 = arith.constant 0 : index
    %47 = vector.load %arg17[%c23, %c0_47, %c0_48] : memref<30x2x128xf32, #tpu.memory_space<vmem>>, vector<1x2x128xf32>
    %48 = vector.shape_cast %47 : vector<1x2x128xf32> to vector<2x128xf32>
    %c24 = arith.constant 24 : index
    %c0_49 = arith.constant 0 : index
    %c0_50 = arith.constant 0 : index
    %49 = vector.load %arg17[%c24, %c0_49, %c0_50] : memref<30x2x128xf32, #tpu.memory_space<vmem>>, vector<1x2x128xf32>
    %50 = vector.shape_cast %49 : vector<1x2x128xf32> to vector<2x128xf32>
    %c25 = arith.constant 25 : index
    %c0_51 = arith.constant 0 : index
    %c0_52 = arith.constant 0 : index
    %51 = vector.load %arg17[%c25, %c0_51, %c0_52] : memref<30x2x128xf32, #tpu.memory_space<vmem>>, vector<1x2x128xf32>
    %52 = vector.shape_cast %51 : vector<1x2x128xf32> to vector<2x128xf32>
    %c26 = arith.constant 26 : index
    %c0_53 = arith.constant 0 : index
    %c0_54 = arith.constant 0 : index
    %53 = vector.load %arg17[%c26, %c0_53, %c0_54] : memref<30x2x128xf32, #tpu.memory_space<vmem>>, vector<1x2x128xf32>
    %54 = vector.shape_cast %53 : vector<1x2x128xf32> to vector<2x128xf32>
    %c27 = arith.constant 27 : index
    %c0_55 = arith.constant 0 : index
    %c0_56 = arith.constant 0 : index
    %55 = vector.load %arg17[%c27, %c0_55, %c0_56] : memref<30x2x128xf32, #tpu.memory_space<vmem>>, vector<1x2x128xf32>
    %56 = vector.shape_cast %55 : vector<1x2x128xf32> to vector<2x128xf32>
    %c28 = arith.constant 28 : index
    %c0_57 = arith.constant 0 : index
    %c0_58 = arith.constant 0 : index
    %57 = vector.load %arg17[%c28, %c0_57, %c0_58] : memref<30x2x128xf32, #tpu.memory_space<vmem>>, vector<1x2x128xf32>
    %58 = vector.shape_cast %57 : vector<1x2x128xf32> to vector<2x128xf32>
    %c29 = arith.constant 29 : index
    %c0_59 = arith.constant 0 : index
    %c0_60 = arith.constant 0 : index
    %59 = vector.load %arg17[%c29, %c0_59, %c0_60] : memref<30x2x128xf32, #tpu.memory_space<vmem>>, vector<1x2x128xf32>
    %60 = vector.shape_cast %59 : vector<1x2x128xf32> to vector<2x128xf32>
    %61 = tpu.concatenate %2, %4, %6, %8, %10, %12, %14, %16, %18, %20, %22, %24, %26, %28, %30, %32 in 1 : vector<2x128xf32>, vector<2x128xf32>, vector<2x128xf32>, vector<2x128xf32>, vector<2x128xf32>, vector<2x128xf32>, vector<2x128xf32>, vector<2x128xf32>, vector<2x128xf32>, vector<2x128xf32>, vector<2x128xf32>, vector<2x128xf32>, vector<2x128xf32>, vector<2x128xf32>, vector<2x128xf32>, vector<2x128xf32> -> vector<2x2048xf32>
    %62 = tpu.concatenate %34, %36, %38, %40, %42, %44, %46, %48, %50, %52, %54, %56, %58, %60 in 1 : vector<2x128xf32>, vector<2x128xf32>, vector<2x128xf32>, vector<2x128xf32>, vector<2x128xf32>, vector<2x128xf32>, vector<2x128xf32>, vector<2x128xf32>, vector<2x128xf32>, vector<2x128xf32>, vector<2x128xf32>, vector<2x128xf32>, vector<2x128xf32>, vector<2x128xf32> -> vector<2x1792xf32>
    %63 = tpu.concatenate %61, %62 in 1 : vector<2x2048xf32>, vector<2x1792xf32> -> vector<2x3840xf32>
    %c0_61 = arith.constant 0 : index
    %c0_62 = arith.constant 0 : index
    %64 = vector.load %arg10[%c0_61, %c0_62] : memref<3840x256xf32, #tpu.memory_space<vmem>>, vector<3840x256xf32>
    %cst = arith.constant dense<0.000000e+00> : vector<2x256xf32>
    %65 = tpu.matmul %63, %64, %cst {dimension_numbers = #tpu.dot_dimension_numbers<[1], [0], [0], [1], [0, 0, 1, 1], [], []>} : vector<2x3840xf32>, vector<3840x256xf32>, vector<2x256xf32> -> vector<2x256xf32>
    %c0_63 = arith.constant 0 : index
    %c0_64 = arith.constant 0 : index
    %66 = vector.load %arg11[%c0_63, %c0_64] : memref<1x256xf32, #tpu.memory_space<vmem>>, vector<1x256xf32>
    %67 = vector.broadcast %66 : vector<1x256xf32> to vector<2x256xf32>
    %68 = arith.addf %65, %67 : vector<2x256xf32>
    %cst_65 = arith.constant 0.000000e+00 : f32
    %69 = vector.broadcast %cst_65 : f32 to vector<2x256xf32>
    %70 = arith.maximumf %68, %69 : vector<2x256xf32>
    %c0_66 = arith.constant 0 : index
    %c0_67 = arith.constant 0 : index
    %71 = vector.load %arg12[%c0_66, %c0_67] : memref<256x84xf32, #tpu.memory_space<vmem>>, vector<256x84xf32>
    %cst_68 = arith.constant dense<0.000000e+00> : vector<2x84xf32>
    %72 = tpu.matmul %70, %71, %cst_68 {dimension_numbers = #tpu.dot_dimension_numbers<[1], [0], [0], [1], [0, 0, 1, 1], [], []>} : vector<2x256xf32>, vector<256x84xf32>, vector<2x84xf32> -> vector<2x84xf32>
    %c0_69 = arith.constant 0 : index
    %c0_70 = arith.constant 0 : index
    %73 = vector.load %arg13[%c0_69, %c0_70] : memref<1x84xf32, #tpu.memory_space<vmem>>, vector<1x84xf32>
    %74 = vector.broadcast %73 : vector<1x84xf32> to vector<2x84xf32>
    %75 = arith.addf %72, %74 : vector<2x84xf32>
    %cst_71 = arith.constant 0.000000e+00 : f32
    %76 = vector.broadcast %cst_71 : f32 to vector<2x84xf32>
    %77 = arith.maximumf %75, %76 : vector<2x84xf32>
    %c0_72 = arith.constant 0 : index
    %c0_73 = arith.constant 0 : index
    %78 = vector.load %arg14[%c0_72, %c0_73] : memref<84x36xf32, #tpu.memory_space<vmem>>, vector<84x36xf32>
    %cst_74 = arith.constant dense<0.000000e+00> : vector<2x36xf32>
    %79 = tpu.matmul %77, %78, %cst_74 {dimension_numbers = #tpu.dot_dimension_numbers<[1], [0], [0], [1], [0, 0, 1, 1], [], []>} : vector<2x84xf32>, vector<84x36xf32>, vector<2x36xf32> -> vector<2x36xf32>
    %c0_75 = arith.constant 0 : index
    %c0_76 = arith.constant 0 : index
    %80 = vector.load %arg15[%c0_75, %c0_76] : memref<1x36xf32, #tpu.memory_space<vmem>>, vector<1x36xf32>
    %81 = vector.broadcast %80 : vector<1x36xf32> to vector<2x36xf32>
    %82 = arith.addf %79, %81 : vector<2x36xf32>
    %83 = arith.negf %82 : vector<2x36xf32>
    %84 = math.exp %83 : vector<2x36xf32>
    %cst_77 = arith.constant 1.000000e+00 : f32
    %85 = vector.broadcast %cst_77 : f32 to vector<2x36xf32>
    %86 = arith.addf %85, %84 : vector<2x36xf32>
    %87 = arith.divf %85, %86 : vector<2x36xf32>
    %c0_78 = arith.constant 0 : index
    %c0_79 = arith.constant 0 : index
    %88 = vector.load %arg16[%c0_78, %c0_79] : memref<2x36xf32, #tpu.memory_space<vmem>>, vector<2x36xf32>
    tpu.vector_store %arg16[%c0_78, %c0_79], %87 {strides = array<i32>} : memref<2x36xf32, #tpu.memory_space<vmem>>, vector<2x36xf32>,
    return
  }
  func.func @transform_0(%arg0: i32) -> (i32, i32, i32) {
    %c0_i32 = arith.constant 0 : i32
    %c0_i32_0 = arith.constant 0 : i32
    %c0_i32_1 = arith.constant 0 : i32
    return %arg0, %c0_i32, %c0_i32_0 : i32, i32, i32
  }
  func.func @transform_1(%arg0: i32) -> (i32, i32, i32) {
    %c0_i32 = arith.constant 0 : i32
    %c0_i32_0 = arith.constant 0 : i32
    %c0_i32_1 = arith.constant 0 : i32
    %c0_i32_2 = arith.constant 0 : i32
    return %c0_i32, %c0_i32_0, %c0_i32_1 : i32, i32, i32
  }
  func.func @transform_2(%arg0: i32) -> (i32, i32) {
    %c0_i32 = arith.constant 0 : i32
    %c0_i32_0 = arith.constant 0 : i32
    %c0_i32_1 = arith.constant 0 : i32
    return %c0_i32, %c0_i32_0 : i32, i32
  }
  func.func @transform_3(%arg0: i32) -> (i32, i32, i32) {
    %c0_i32 = arith.constant 0 : i32
    %c0_i32_0 = arith.constant 0 : i32
    %c0_i32_1 = arith.constant 0 : i32
    %c0_i32_2 = arith.constant 0 : i32
    return %c0_i32, %c0_i32_0, %c0_i32_1 : i32, i32, i32
  }
  func.func @transform_4(%arg0: i32) -> (i32, i32) {
    %c0_i32 = arith.constant 0 : i32
    %c0_i32_0 = arith.constant 0 : i32
    %c0_i32_1 = arith.constant 0 : i32
    return %c0_i32, %c0_i32_0 : i32, i32
  }
  func.func @transform_5(%arg0: i32) -> (i32, i32) {
    %c0_i32 = arith.constant 0 : i32
    %c0_i32_0 = arith.constant 0 : i32
    %c0_i32_1 = arith.constant 0 : i32
    return %c0_i32, %c0_i32_0 : i32, i32
  }
  func.func @transform_6(%arg0: i32) -> (i32, i32) {
    %c0_i32 = arith.constant 0 : i32
    %c0_i32_0 = arith.constant 0 : i32
    %c0_i32_1 = arith.constant 0 : i32
    return %c0_i32, %c0_i32_0 : i32, i32
  }
  func.func @transform_7(%arg0: i32) -> (i32, i32) {
    %c0_i32 = arith.constant 0 : i32
    %c0_i32_0 = arith.constant 0 : i32
    %c0_i32_1 = arith.constant 0 : i32
    return %c0_i32, %c0_i32_0 : i32, i32
  }
  func.func @transform_8(%arg0: i32) -> (i32, i32) {
    %c0_i32 = arith.constant 0 : i32
    %c0_i32_0 = arith.constant 0 : i32
    %c0_i32_1 = arith.constant 0 : i32
    return %c0_i32, %c0_i32_0 : i32, i32
  }
  func.func @transform_9(%arg0: i32) -> (i32, i32) {
    %c0_i32 = arith.constant 0 : i32
    %c0_i32_0 = arith.constant 0 : i32
    %c0_i32_1 = arith.constant 0 : i32
    return %c0_i32, %c0_i32_0 : i32, i32
  }
  func.func @transform_10(%arg0: i32) -> (i32, i32) {
    %c0_i32 = arith.constant 0 : i32
    %c0_i32_0 = arith.constant 0 : i32
    %c0_i32_1 = arith.constant 0 : i32
    return %c0_i32, %c0_i32_0 : i32, i32
  }
  func.func @transform_11(%arg0: i32) -> (i32, i32) {
    %c0_i32 = arith.constant 0 : i32
    %c0_i32_0 = arith.constant 0 : i32
    %c0_i32_1 = arith.constant 0 : i32
    return %c0_i32, %c0_i32_0 : i32, i32
  }
  func.func @transform_12(%arg0: i32) -> (i32, i32) {
    %c0_i32 = arith.constant 0 : i32
    %c0_i32_0 = arith.constant 0 : i32
    %c0_i32_1 = arith.constant 0 : i32
    return %c0_i32, %c0_i32_0 : i32, i32
  }
  func.func @transform_13(%arg0: i32) -> (i32, i32) {
    %c0_i32 = arith.constant 0 : i32
    %c0_i32_0 = arith.constant 0 : i32
    %c0_i32_1 = arith.constant 0 : i32
    return %c0_i32, %c0_i32_0 : i32, i32
  }
  func.func @transform_14(%arg0: i32) -> (i32, i32) {
    %c0_i32 = arith.constant 0 : i32
    %c0_i32_0 = arith.constant 0 : i32
    %c0_i32_1 = arith.constant 0 : i32
    return %c0_i32, %c0_i32_0 : i32, i32
  }
  func.func @transform_15(%arg0: i32) -> (i32, i32) {
    %c0_i32 = arith.constant 0 : i32
    %c0_i32_0 = arith.constant 0 : i32
    return %arg0, %c0_i32 : i32, i32
  }
}

</mosaic_0001>

<bundles_post_ra>
// kernel: mynet_forward.1
= control target key start
LH: loop header
LB: loop body
LE: loop exit
PB: predicated region body
PF: predicated region fallthrough
CT: control target
= control target key end

     0   :  { %s6491_s0 = inlined_call_operand.vmem [shape: f32[2,126,128], index: 0, kind: input, shape index: {}]   ;;  %s6492_s1 = inlined_call_operand.hbm [shape: f32[3,128,128], index: 1, kind: input, shape index: {}]   ;;  %s6493_s2 = inlined_call_operand.<no memory space> [shape: f32[1,1], index: 2, kind: input, shape index: {}]   ;;  %s6494_s3 = inlined_call_operand.hbm [shape: f32[3,128,128], index: 3, kind: input, shape index: {}]   ;;  %s6495_s5 = inlined_call_operand.hbm [shape: f32[127,128], index: 5, kind: input, shape index: {}]   ;;  %s6496_s6 = inlined_call_operand.hbm [shape: f32[62,123], index: 6, kind: input, shape index: {}]   ;;  %s6497_s7 = inlined_call_operand.hbm [shape: f32[127,128], index: 7, kind: input, shape index: {}]   ;;  %s6498_s8 = inlined_call_operand.hbm [shape: f32[30,59], index: 8, kind: input, shape index: {}]   ;;  %s6499_s9 = inlined_call_operand.hbm [shape: f32[3840,256], index: 9, kind: input, shape index: {}]   ;;  %s6500_s10 = inlined_call_operand.hbm [shape: f32[1,256], index: 10, kind: input, shape index: {}]   ;;  %s6501_s11 = inlined_call_operand.vmem [shape: f32[256,84], index: 11, kind: input, shape index: {}]   ;;  %s6502_s12 = inlined_call_operand.hbm [shape: f32[1,84], index: 12, kind: input, shape index: {}]   ;;  %s6503_s13 = inlined_call_operand.vmem [shape: f32[84,36], index: 13, kind: input, shape index: {}]   ;;  %s6504_s14 = inlined_call_operand.hbm [shape: f32[1,36], index: 14, kind: input, shape index: {}]   ;;  %s6505_s15 = inlined_call_operand.hbm [shape: f32[2,36], index: 15, kind: output, shape index: {}]   ;;  %s6506_s4 = inlined_call_operand.<no memory space> [shape: f32[1,1], index: 4, kind: input, shape index: {}]  }
   0x1   :  { %v20_v0 = vstv %s6493_s2  ;;  %v22_v1 = vstv %s6506_s4 }
   0x2   :  { %21 = vst [vmem:[#allocation3] sm:$0x1] %v20_v0  ;;  %23 = vst [vmem:[#allocation4] sm:$0x1] %v22_v1 }
   0x3   :  { %24 = vsyncpa [#allocation6], 0 }
   0x4   :  { %25 = vsyncpa [#allocation9], 0 }
   0x5   :  { %26 = vsyncpa [#allocation12], 0 }
   0x6   :  { %27 = vsyncpa [#allocation15], 0 }
   0x7   :  { %28 = vsyncpa [#allocation18], 0 }
   0x8   :  { %29 = vsyncpa [#allocation21], 0 }
   0x9   :  { %30 = vsyncpa [#allocation7], 0  ;;  %s5800_s22 = smov [#allocation8]   ;;  %s5801_s24 = smov [#allocation11]  }
   0xa   :  { %s52_s23 = sshll.u32 %s5800_s22, 4  ;;  %s78_s25 = sshll.u32 %s5801_s24, 4  ;;  %s53_s23 = int_to_ptr.vmem [resolvable:$true] %s52_s23  ;;  %s79_s25 = int_to_ptr.vmem [resolvable:$true] %s78_s25 }
   0xb   :  { %s5566_s2 = scalar_lea.vmem %s53_s23, 6144  ;;  %p5571_p1 = scmp.lt.s32.totalorder %s53_s23, %s53_s23 }
   0xc   :  { %p5567_p0 = scmp.ne.s32.totalorder %s53_s23, %s5566_s2  ;;  %p5572_p2 = scmp.lt.s32.totalorder %s5566_s2, %s5566_s2 }
   0xe   :  { %p5573_p3 = por %p5572_p2, %p5571_p1 }
  0x10   :  { %p5574_p4 = pnand %p5573_p3, %p5567_p0 }
  0x12   :  { %5577 = shalt.err (!%p5574_p4)
}
  0x13   :  { %s5802_s4 = smov 128   ;;  %s5803_s26 = smov 8  }
  0x14   :  { %58 = dma.hbm_to_vmem [thread:$0]  %s6494_s3, 6144, %s53_s23, [#allocation9], %s5802_s4, %s5802_s4, %s5803_s26  }
  0x15   :  { %s5586_s29 = scalar_lea.vmem %s79_s25, 1024  ;;  %p5591_p6 = scmp.lt.s32.totalorder %s79_s25, %s79_s25 }
  0x16   :  { %p5587_p5 = scmp.ne.s32.totalorder %s79_s25, %s5586_s29  ;;  %p5592_p7 = scmp.lt.s32.totalorder %s5586_s29, %s5586_s29 }
  0x18   :  { %p5593_p8 = por %p5592_p7, %p5591_p6 }
  0x1a   :  { %p5594_p9 = pnand %p5593_p8, %p5587_p5 }
  0x1c   :  { %5597 = shalt.err (!%p5594_p9)
}
  0x1d   :  { %84 = dma.hbm_to_vmem [thread:$0]  %s6496_s6, 1024, %s79_s25, [#allocation12], %s5802_s4, %s5802_s4, %s5803_s26  }
  0x1e   :  { %s5804_s17 = smov [#allocation14]   ;;  %s5805_s19 = smov [#allocation17]  }
  0x1f   :  { %s102_s18 = sshll.u32 %s5804_s17, 4  ;;  %s127_s20 = sshll.u32 %s5805_s19, 4  ;;  %s103_s18 = int_to_ptr.vmem [resolvable:$true] %s102_s18  ;;  %s128_s20 = int_to_ptr.vmem [resolvable:$true] %s127_s20 }
  0x20   :  { %s5606_s3 = scalar_lea.vmem %s103_s18, 512  ;;  %p5611_p11 = scmp.lt.s32.totalorder %s103_s18, %s103_s18 }
  0x21   :  { %p5607_p10 = scmp.ne.s32.totalorder %s103_s18, %s5606_s3  ;;  %p5612_p12 = scmp.lt.s32.totalorder %s5606_s3, %s5606_s3 }
  0x23   :  { %p5613_p13 = por %p5612_p12, %p5611_p11 }
  0x25   :  { %p5614_p0 = pnand %p5613_p13, %p5607_p10 }
  0x27   :  { %5617 = shalt.err (!%p5614_p0)
}
  0x28   :  { %108 = dma.hbm_to_vmem [thread:$0]  %s6498_s8, 512, %s103_s18, [#allocation15], %s5802_s4, %s5802_s4, %s5803_s26  }
  0x29   :  { %s5626_s6 = scalar_lea.vmem %s128_s20, 32  ;;  %p5631_p2 = scmp.lt.s32.totalorder %s128_s20, %s128_s20 }
  0x2a   :  { %p5627_p1 = scmp.ne.s32.totalorder %s128_s20, %s5626_s6  ;;  %p5632_p3 = scmp.lt.s32.totalorder %s5626_s6, %s5626_s6 }
  0x2c   :  { %p5633_p4 = por %p5632_p3, %p5631_p2 }
  0x2e   :  { %p5634_p5 = pnand %p5633_p4, %p5627_p1 }
  0x30   :  { %5637 = shalt.err (!%p5634_p5)
}
  0x31   :  { %130 = dma.hbm_to_vmem [thread:$0]  %s6500_s10, 32, %s128_s20, [#allocation18]  }
  0x32   :  { %s5806_s25 = smov [#allocation5]   ;;  %s5807_s27 = smov [#allocation10]  }
  0x33   :  { %s38_s2 = sshll.u32 %s5806_s25, 4  ;;  %s66_s28 = sshll.u32 %s5807_s27, 4  ;;  %s39_s2 = int_to_ptr.vmem [resolvable:$true] %s38_s2  ;;  %s67_s28 = int_to_ptr.vmem [resolvable:$true] %s66_s28 }
  0x34   :  { %s5646_s29 = scalar_lea.vmem %s39_s2, 6144  ;;  %p5651_p7 = scmp.lt.s32.totalorder %s39_s2, %s39_s2 }
  0x35   :  { %p5647_p6 = scmp.ne.s32.totalorder %s39_s2, %s5646_s29  ;;  %p5652_p8 = scmp.lt.s32.totalorder %s5646_s29, %s5646_s29 }
  0x37   :  { %p5653_p9 = por %p5652_p8, %p5651_p7 }
  0x39   :  { %p5654_p10 = pnand %p5653_p9, %p5647_p6 }
  0x3b   :  { %5657 = shalt.err (!%p5654_p10)
}
  0x3c   :  { %44 = dma.hbm_to_vmem [thread:$0]  %s6492_s1, 6144, %s39_s2, [#allocation6], %s5802_s4, %s5802_s4, %s5803_s26  }
  0x3d   :  { %s5666_s10 = scalar_lea.vmem %s67_s28, 2048  ;;  %p5671_p12 = scmp.lt.s32.totalorder %s67_s28, %s67_s28 }
  0x3e   :  { %p5667_p11 = scmp.ne.s32.totalorder %s67_s28, %s5666_s10  ;;  %p5672_p13 = scmp.lt.s32.totalorder %s5666_s10, %s5666_s10 }
  0x40   :  { %p5673_p0 = por %p5672_p13, %p5671_p12 }
  0x42   :  { %p5674_p1 = pnand %p5673_p0, %p5667_p11 }
  0x44   :  { %5677 = shalt.err (!%p5674_p1)
}
  0x45   :  { %72 = dma.hbm_to_vmem [thread:$0]  %s6495_s5, 2048, %s67_s28, [#allocation9], %s5802_s4, %s5802_s4, %s5803_s26  }
  0x46   :  { %s5808_s18 = smov [#allocation13]   ;;  %s5809_s20 = smov [#allocation16]  }
  0x47   :  { %s90_s19 = sshll.u32 %s5808_s18, 4  ;;  %s114_s3 = sshll.u32 %s5809_s20, 4  ;;  %s91_s19 = int_to_ptr.vmem [resolvable:$true] %s90_s19  ;;  %s115_s3 = int_to_ptr.vmem [resolvable:$true] %s114_s3 }
  0x48   :  { %s5686_s1 = scalar_lea.vmem %s91_s19, 2048  ;;  %p5691_p3 = scmp.lt.s32.totalorder %s91_s19, %s91_s19 }
  0x49   :  { %p5687_p2 = scmp.ne.s32.totalorder %s91_s19, %s5686_s1  ;;  %p5692_p4 = scmp.lt.s32.totalorder %s5686_s1, %s5686_s1 }
  0x4b   :  { %p5693_p5 = por %p5692_p4, %p5691_p3 }
  0x4d   :  { %p5694_p6 = pnand %p5693_p5, %p5687_p2 }
  0x4f   :  { %5697 = shalt.err (!%p5694_p6)
}
  0x50   :  { %96 = dma.hbm_to_vmem [thread:$0]  %s6497_s7, 2048, %s91_s19, [#allocation12], %s5802_s4, %s5802_s4, %s5803_s26  }
  0x51   :  { %s5706_s5 = scalar_lea.vmem %s115_s3, 122880  ;;  %p5711_p8 = scmp.lt.s32.totalorder %s115_s3, %s115_s3 }
  0x52   :  { %p5707_p7 = scmp.ne.s32.totalorder %s115_s3, %s5706_s5  ;;  %p5712_p9 = scmp.lt.s32.totalorder %s5706_s5, %s5706_s5 }
  0x54   :  { %p5713_p10 = por %p5712_p9, %p5711_p8 }
  0x56   :  { %p5714_p11 = pnand %p5713_p10, %p5707_p7 }
  0x58   :  { %5717 = shalt.err (!%p5714_p11)
}
  0x59   :  { %s5810_s6 = smov 256   ;;  %s5811_s23 = smov 16  }
  0x5a   :  { %120 = dma.hbm_to_vmem [thread:$0]  %s6499_s9, 122880, %s115_s3, [#allocation15], %s5810_s6, %s5810_s6, %s5811_s23  }
  0x5b   :  { %s5812_s2 = smov [#allocation19]   ;;  %s5813_s28 = smov [#allocation20]  }
  0x5c   :  { %s139_s27 = sshll.u32 %s5812_s2, 4  ;;  %s151_s29 = sshll.u32 %s5813_s28, 4  ;;  %s140_s27 = int_to_ptr.vmem [resolvable:$true] %s139_s27  ;;  %s152_s29 = int_to_ptr.vmem [resolvable:$true] %s151_s29 }
  0x5d   :  { %s5726_s7 = scalar_lea.vmem %s140_s27, 16  ;;  %s5730_s4 = scalar_lea.vmem %s140_s27, 32 }
  0x5e   :  { %p5727_p12 = scmp.ne.s32.totalorder %s140_s27, %s5726_s7  ;;  %p5731_p13 = scmp.lt.s32.totalorder %s140_s27, %s140_s27 }
  0x5f   :  { %p5732_p0 = scmp.lt.s32.totalorder %s5730_s4, %s5726_s7 }
  0x61   :  { %p5733_p1 = por %p5732_p0, %p5731_p13 }
  0x63   :  { %p5734_p2 = pnand %p5733_p1, %p5727_p12 }
  0x65   :  { %5737 = shalt.err (!%p5734_p2)
}
  0x66   :  { %142 = dma.hbm_to_vmem [thread:$0]  %s6502_s12, 16, %s140_s27, [#allocation18]  }
  0x67   :  { %s5746_s30 = scalar_lea.vmem %s152_s29, 16  ;;  %s5750_s9 = scalar_lea.vmem %s152_s29, 32 }
  0x68   :  { %p5747_p3 = scmp.ne.s32.totalorder %s152_s29, %s5746_s30  ;;  %p5751_p4 = scmp.lt.s32.totalorder %s152_s29, %s152_s29 }
  0x69   :  { %p5752_p5 = scmp.lt.s32.totalorder %s5750_s9, %s5746_s30 }
  0x6b   :  { %p5753_p6 = por %p5752_p5, %p5751_p4 }
  0x6d   :  { %p5754_p7 = pnand %p5753_p6, %p5747_p3 }
  0x6f   :  { %5757 = shalt.err (!%p5754_p7)
}
  0x70   :  { %154 = dma.hbm_to_vmem [thread:$0]  %s6504_s14, 16, %s152_s29, [#allocation21]  }
  0x71   :  { %5782 = dma.done.wait [#allocation6], 6144  }
  0x72   :  { %5783 = vsyncadd [#allocation6], 4294961152 }
  0x73   :  { %5784 = dma.done.wait [#allocation9], 8192  }
  0x74   :  { %5785 = vsyncadd [#allocation9], 4294959104 }
  0x75   :  { %5786 = dma.done.wait [#allocation12], 3072  }
  0x76   :  { %5787 = vsyncadd [#allocation12], 4294964224 }
  0x77   :  { %5788 = dma.done.wait [#allocation15], 123392  }
  0x78   :  { %5789 = vsyncadd [#allocation15], 4294843904 }
  0x79   :  { %5790 = dma.done.wait [#allocation18], 48  }
  0x7a   :  { %5791 = vsyncadd [#allocation18], 4294967248 }
  0x7b   :  { %5792 = dma.done.wait [#allocation21], 16  }
  0x7c   :  { %5793 = vsyncadd [#allocation21], 4294967280  ;;  %s5953_s12 = smov 0  }
  0x7d LB: > { %v242_v2 = vld [vmem:[#allocation5 + $0xf8] sm:$0xff]  ;;  %v241_v4 = vld [vmem:[#allocation5 + $0xf0] sm:$0xff]  ;;  %v240_v6 = vld [vmem:[#allocation5 + $0xe8] sm:$0xff]  ;;  %s4650_s14 = sshll.u32 %s5798_s12, 7  ;;  %vm259_vm0 = vcmask 1046528   ;;  %v5814_v59 = vmov 0   ;;  %s5798_s12 = sphi %s5953_s12, %s190_s12  }
  0x7e   : > { %v225_v3 = vld [vmem:[#allocation5 + $0x78] sm:$0xff]  ;;  %5034 = vmatprep.subr.mxu0 %v242_v2  ;;  %v224_v5 = vld [vmem:[#allocation5 + $0x70] sm:$0xff]  ;;  %v223_v7 = vld [vmem:[#allocation5 + $0x68] sm:$0xff]  ;;  %s5962_s19 = scalar_lea.vmem %s6491_s0, %s4650_s14  ;;  %5552 = vset.pattern.permute.xlu0 %v5814_v59  ;;  %vm614_vm1 = vcmask 1045504   ;;  %s5815_s20 = smov 127   ;;  %vm1039_vm2 = vcmask 1039360  }
  0x7f   : > { %5090 = vmatprep.subr.mxu1 %v225_v3  ;;  %5035 = vmatpush3.msra.mxu0 %v242_v2  ;;  %v239_v8 = vld [vmem:[#allocation5 + $0xe0] sm:$0xff]  ;;  %v238_v10 = vld [vmem:[#allocation5 + $0xd8] sm:$0xff]  ;;  %v237_v12 = vld [vmem:[#allocation5 + $0xd0] sm:$0xff]  ;;  %vm1244_vm3 = vcmask 1006592   ;;  %vm1269_vm4 = vcmask 1042432   ;;  %vm2062_vm5 = vcmask 482304  }
  0x80   : > { %5091 = vmatpush3.msra.mxu1 %v225_v3  ;;  %5036 = vmatprep.subr.mxu0 %v241_v4  ;;  %v222_v9 = vld [vmem:[#allocation5 + $0x60] sm:$0xff]  ;;  %v221_v11 = vld [vmem:[#allocation5 + $0x58] sm:$0xff]  ;;  %v220_v13 = vld [vmem:[#allocation5 + $0x50] sm:$0xff]  ;;  %s6312_s3 = scalar_lea.vmem [#allocation2], %s5798_s12  ;;  %s190_s12 = sadd.s32 1, %s5798_s12  }
  0x81   : > { %5092 = vmatprep.subr.mxu1 %v224_v5  ;;  %5037 = vmatpush3.msra.mxu0 %v241_v4  ;;  %v236_v14 = vld [vmem:[#allocation5 + $0xc8] sm:$0xff]  ;;  %v235_v16 = vld [vmem:[#allocation5 + $0xc0] sm:$0xff]  ;;  %v234_v18 = vld [vmem:[#allocation5 + $0xb8] sm:$0xff]  ;;  %p187_p8 = scmp.ge.s32.totalorder %s190_s12, 2  }
  0x82   : > { %5093 = vmatpush3.msra.mxu1 %v224_v5  ;;  %5038 = vmatprep.subr.mxu0 %v240_v6  ;;  %v219_v15 = vld [vmem:[#allocation5 + $0x48] sm:$0xff]  ;;  %v218_v17 = vld [vmem:[#allocation5 + $0x40] sm:$0xff]  ;;  %v217_v19 = vld [vmem:[#allocation5 + $0x38] sm:$0xff]  ;;  %vm4482_vm6 = vcmask (%p187_p8), 1043456   ;;  %vm5817_vm7 = vmmov (%p187_p8), 0   ;;  %vm4478_vm8 = vcmask (%p187_p8), 687104  }
  0x83   : > { %5094 = vmatprep.subr.mxu1 %v223_v7  ;;  %5039 = vmatpush3.msra.mxu0 %v240_v6  ;;  %v233_v20 = vld [vmem:[#allocation5 + $0xb0] sm:$0xff]  ;;  %v232_v22 = vld [vmem:[#allocation5 + $0xa8] sm:$0xff]  ;;  %v231_v24 = vld [vmem:[#allocation5 + $0xa0] sm:$0xff]  ;;  %vm4562_vm9 = vcmask (%p187_p8), 287744  }
  0x84   : > { %5095 = vmatpush3.msra.mxu1 %v223_v7  ;;  %5040 = vmatprep.subr.mxu0 %v239_v8  ;;  %v216_v21 = vld [vmem:[#allocation5 + $0x30] sm:$0xff]  ;;  %v215_v23 = vld [vmem:[#allocation5 + $0x28] sm:$0xff]  ;;  %v214_v25 = vld [vmem:[#allocation5 + $0x20] sm:$0xff] }
  0x85   : > { %5096 = vmatprep.subr.mxu1 %v222_v9  ;;  %5041 = vmatpush3.msra.mxu0 %v239_v8  ;;  %v230_v26 = vld [vmem:[#allocation5 + $0x98] sm:$0xff]  ;;  %v5965_v28 = vld [vmem:[%s5962_s19] sm:$0xff]  ;;  %v5968_v29 = vld [vmem:[%s5962_s19 + $0x8] sm:$0xff] }
  0x86   : > { %5097 = vmatpush3.msra.mxu1 %v222_v9  ;;  %5042 = vmatprep.subr.mxu0 %v238_v10  ;;  %v213_v27 = vld [vmem:[#allocation5 + $0x18] sm:$0xff]  ;;  %v229_v30 = vld [vmem:[#allocation5 + $0x90] sm:$0xff]  ;;  %v260_v33 = vrot.slane %v5965_v28, 1  ;;  %v261_v34 = vrot.slane %v5968_v29, 1  ;;  %v228_v36 = vld [vmem:[#allocation5 + $0x88] sm:$0xff] }
  0x87   : > { %5098 = vmatprep.subr.mxu1 %v221_v11  ;;  %5043 = vmatpush3.msra.mxu0 %v238_v10  ;;  %v212_v31 = vld [vmem:[#allocation5 + $0x10] sm:$0xff]  ;;  %v5976_v35 = vld [vmem:[%s5962_s19 + $0x18] sm:$0xff]  ;;  %v211_v37 = vld [vmem:[#allocation5 + $0x8] sm:$0xff] }
  0x88   : > { %5099 = vmatpush3.msra.mxu1 %v221_v11  ;;  %5044 = vmatprep.subr.mxu0 %v237_v12  ;;  %v5971_v32 = vld [vmem:[%s5962_s19 + $0x10] sm:$0xff]  ;;  %v227_v39 = vld [vmem:[#allocation5 + $0x80] sm:$0xff]  ;;  %v265_v41 = vrot.slane %v5976_v35, 1  ;;  %v262_v42 = vsel %vm259_vm0, %v260_v33, %v261_v34  ;;  %v5985_v44 = vld [vmem:[%s5962_s19 + $0x28] sm:$0xff] }
  0x89   : > { %5100 = vmatprep.subr.mxu1 %v220_v13  ;;  %5045 = vmatpush3.msra.mxu0 %v237_v12  ;;  %v263_v38 = vrot.slane %v5971_v32, 1  ;;  %v210_v40 = vld [vmem:[#allocation5] sm:$0xff]  ;;  %v613_v46 = vld [vmem:[#allocation5 + $0x178] sm:$0xff]  ;;  %v269_v49 = vrot.slane %v5985_v44, 1  ;;  %v612_v51 = vld [vmem:[#allocation5 + $0x170] sm:$0xff] }
  0x8a   : > { %5101 = vmatpush3.msra.mxu1 %v220_v13  ;;  %5046 = vmatprep.subr.mxu0 %v236_v14  ;;  %v5982_v43 = vld [vmem:[%s5962_s19 + $0x20] sm:$0xff]  ;;  %v5993_v50 = vld [vmem:[%s5962_s19 + $0x30] sm:$0xff]  ;;  %v5997_v52 = vld [vmem:[%s5962_s19 + $0x38] sm:$0xff] }
  0x8b   : > { %5102 = vmatprep.subr.mxu1 %v219_v15  ;;  %5047 = vmatpush3.msra.mxu0 %v236_v14  ;;  %v264_v45 = vsel %vm259_vm0, %v261_v34, %v263_v38  ;;  %v266_v47 = vsel %vm259_vm0, %v263_v38, %v265_v41  ;;  %v267_v48 = vrot.slane %v5982_v43, 1  ;;  %v611_v54 = vld [vmem:[#allocation5 + $0x168] sm:$0xff]  ;;  %v271_v55 = vrot.slane %v5993_v50, 1  ;;  %v610_v60 = vld [vmem:[#allocation5 + $0x160] sm:$0xff]  ;;  %v609_v63 = vld [vmem:[#allocation5 + $0x158] sm:$0xff] }
  0x8c   : > { %5103 = vmatpush3.msra.mxu1 %v219_v15  ;;  %5048 = vmatprep.subr.mxu0 %v235_v16  ;;  %v273_v57 = vrot.slane %v5997_v52, 1  ;;  %v6005_v58 = vld [vmem:[%s5962_s19 + $0x40] sm:$0xff]  ;;  %v6010_v61 = vld [vmem:[%s5962_s19 + $0x48] sm:$0xff]  ;;  %v6018_v3 = vld [vmem:[%s5962_s19 + $0x50] sm:$0xff]  ;;  %v615_v34 = vrot.slane %v5965_v28, 2 }
  0x8d   : > { %5104 = vmatprep.subr.mxu1 %v218_v17  ;;  %5049 = vmatpush3.msra.mxu0 %v235_v16  ;;  %v268_v53 = vsel %vm259_vm0, %v265_v41, %v267_v48  ;;  %v270_v56 = vsel %vm259_vm0, %v267_v48, %v269_v49  ;;  %v272_v62 = vsel %vm259_vm0, %v269_v49, %v271_v55  ;;  %v275_v0 = vrot.slane %v6005_v58, 1  ;;  %v608_v4 = vld [vmem:[#allocation5 + $0x150] sm:$0xff]  ;;  %v6022_v5 = vld [vmem:[%s5962_s19 + $0x58] sm:$0xff]  ;;  %v607_v7 = vld [vmem:[#allocation5 + $0x148] sm:$0xff] }
  0x8e   : > { %5105 = vmatpush3.msra.mxu1 %v218_v17  ;;  %5050 = vmatprep.subr.mxu0 %v234_v18  ;;  %v274_v1 = vsel %vm259_vm0, %v271_v55, %v273_v57  ;;  %v277_v2 = vrot.slane %v6010_v61, 1  ;;  %v279_v8 = vrot.slane %v6018_v3, 1  ;;  %v281_v10 = vrot.slane %v6022_v5, 1  ;;  %v6030_v11 = vld [vmem:[%s5962_s19 + $0x60] sm:$0xff]  ;;  %v6034_v13 = vld [vmem:[%s5962_s19 + $0x68] sm:$0xff]  ;;  %v605_v15 = vld [vmem:[#allocation5 + $0x138] sm:$0xff] }
  0x8f   : > { %5106 = vmatprep.subr.mxu1 %v217_v19  ;;  %5051 = vmatpush3.msra.mxu0 %v234_v18  ;;  %v276_v6 = vsel %vm259_vm0, %v273_v57, %v275_v0  ;;  %v606_v12 = vld [vmem:[#allocation5 + $0x140] sm:$0xff]  ;;  %v283_v16 = vrot.slane %v6030_v11, 1  ;;  %v285_v18 = vrot.slane %v6034_v13, 1  ;;  %v599_v38 = vld [vmem:[#allocation5 + $0x108] sm:$0xff]  ;;  %v4651_v41 = vld [vmem:[#allocation3] ss:$0 sm:$0xff] }
  0x90   : > { %5107 = vmatpush3.msra.mxu1 %v217_v19  ;;  %5052 = vmatprep.subr.mxu0 %v233_v20  ;;  %v278_v9 = vsel %vm259_vm0, %v275_v0, %v277_v2  ;;  %v280_v14 = vsel %vm259_vm0, %v277_v2, %v279_v8  ;;  %v282_v17 = vsel %vm259_vm0, %v279_v8, %v281_v10  ;;  %v6042_v19 = vld [vmem:[%s5962_s19 + $0x70] sm:$0xff]  ;;  %v628_v49 = vrot.slane %v5997_v52, 2  ;;  %v1032_v8 = vld [vmem:[#allocation10 + $0x48] sm:$0xff] }
  0x91   : > { %5108 = vmatprep.subr.mxu1 %v216_v21  ;;  %5053 = vmatpush3.msra.mxu0 %v233_v20  ;;  %v604_v20 = vld [vmem:[#allocation5 + $0x130] sm:$0xff]  ;;  %v638_v57 = vrot.slane %v6030_v11, 2  ;;  %v1038_v2 = vld [vmem:[#allocation10 + $0x78] sm:$0x7f] }
  0x92   : > { %5109 = vmatpush3.msra.mxu1 %v216_v21  ;;  %5054 = vmatprep.subr.mxu0 %v232_v22  ;;  %v6046_v21 = vld [vmem:[%s5962_s19 + $0x78] sm:$0x3f] }
  0x93   : > { %5110 = vmatprep.subr.mxu1 %v215_v23  ;;  %5055 = vmatpush3.msra.mxu0 %v232_v22  ;;  %v284_v22 = vsel %vm259_vm0, %v281_v10, %v283_v16  ;;  %v1030_v10 = vld [vmem:[#allocation10 + $0x38] sm:$0xff] }
  0x94   : > { %5111 = vmatpush3.msra.mxu1 %v215_v23  ;;  %5056 = vmatprep.subr.mxu0 %v231_v24  ;;  %v603_v23 = vld [vmem:[#allocation5 + $0x128] sm:$0xff] }
  0x95   : > { %5112 = vmatprep.subr.mxu1 %v214_v25  ;;  %5057 = vmatpush3.msra.mxu0 %v231_v24  ;;  %v287_v24 = vrot.slane %v6042_v19, 1 }
  0x96   : > { %5113 = vmatpush3.msra.mxu1 %v214_v25  ;;  %5058 = vmatprep.subr.mxu0 %v230_v26  ;;  %v286_v25 = vsel %vm259_vm0, %v283_v16, %v285_v18 }
  0x97   : > { %5114 = vmatprep.subr.mxu1 %v213_v27  ;;  %5059 = vmatpush3.msra.mxu0 %v230_v26  ;;  %v289_v26 = vrot.slane %v6046_v21, 1 }
  0x98   : > { %5115 = vmatpush3.msra.mxu1 %v213_v27  ;;  %5060 = vmatprep.subr.mxu0 %v229_v30  ;;  %v602_v27 = vld [vmem:[#allocation5 + $0x120] sm:$0xff] }
  0x99   : > { %5116 = vmatprep.subr.mxu1 %v212_v31  ;;  %5061 = vmatpush3.msra.mxu0 %v229_v30  ;;  %v288_v30 = vsel %vm259_vm0, %v285_v18, %v287_v24  ;;  %v290_v33 = vsel %vm259_vm0, %v287_v24, %v289_v26 }
  0x9a   : > { %5117 = vmatpush3.msra.mxu1 %v212_v31  ;;  %5062 = vmatprep.subr.mxu0 %v228_v36  ;;  %v601_v31 = vld [vmem:[#allocation5 + $0x118] sm:$0xff] }
  0x9b   : > { %5118 = vmatprep.subr.mxu1 %v211_v37  ;;  %5063 = vmatpush3.msra.mxu0 %v228_v36  ;;  %v616_v36 = vrot.slane %v5968_v29, 2 }
  0x9c   : > { %5119 = vmatpush3.msra.mxu1 %v211_v37  ;;  %5064 = vmatprep.subr.mxu0 %v227_v39  ;;  %v600_v37 = vld [vmem:[#allocation5 + $0x110] sm:$0xff] }
  0x9d   : > { %5120 = vmatprep.subr.mxu1 %v210_v40  ;;  %5065 = vmatpush3.msra.mxu0 %v227_v39  ;;  %v618_v39 = vrot.slane %v5971_v32, 2 }
  0x9e   : > { %5066 = vmatprep.mubr.f32.mxu0 %v262_v42  ;;  %5121 = vmatpush3.msra.mxu1 %v210_v40  ;;  %v617_v40 = vsel %vm614_vm1, %v615_v34, %v616_v36 }
  0x9f   : > { %5122 = vmatprep.mubr.f32.mxu1 %v5965_v28  ;;  %5067 = vmatmul.mubr.f32.vlgmr.msra.gmra.mxu0 %v264_v45  ;;  %v620_v28 = vrot.slane %v5976_v35, 2  ;;  %v619_v42 = vsel %vm614_vm1, %v616_v36, %v618_v39 }
  0xa0   : > { %5123 = vmatmul.mubr.f32.vlgmr.msra.gmra.mxu1 %v5968_v29  ;;  %5146 = vmatprep.subr.mxu0 %v613_v46  ;;  %v598_v29 = vld [vmem:[#allocation5 + $0x100] sm:$0xff] }
  0xa1   : > { %5069 = vmatprep.mubr.f32.mxu0 %v266_v47  ;;  %5147 = vmatpush3.msra.mxu0 %v613_v46  ;;  %v621_v45 = vsel %vm614_vm1, %v618_v39, %v620_v28  ;;  %v624_v46 = vrot.slane %v5985_v44, 2  ;;  %v626_v47 = vrot.slane %v5993_v50, 2 }
  0xa2   : > { %5125 = vmatprep.mubr.f32.mxu1 %v5971_v32  ;;  %5148 = vmatprep.subr.mxu0 %v612_v51  ;;  %v622_v32 = vrot.slane %v5982_v43, 2 }
  0xa3   : > { %5149 = vmatpush3.msra.mxu0 %v612_v51  ;;  %829 = vperm.xlu0 %5552, %v4651_v41   ;;  %v629_v51 = vsel %vm614_vm1, %v626_v47, %v628_v49 }
  0xa4   : > { %5126 = vmatmul.mubr.f32.gmra.mxu1 %v5976_v35  ;;  %5070 = vmatmul.mubr.f32.gmra.mxu0 %v268_v53  ;;  %v623_v35 = vsel %vm614_vm1, %v620_v28, %v622_v32  ;;  %v625_v48 = vsel %vm614_vm1, %v622_v32, %v624_v46  ;;  %v632_v53 = vrot.slane %v6010_v61, 2 }
  0xa5   : > { %5150 = vmatprep.subr.mxu0 %v611_v54  ;;  %5072 = vmatprep.mubr.f32.mxu0 %v270_v56 }
  0xa6   : > { %5151 = vmatpush3.msra.mxu0 %v611_v54  ;;  %5128 = vmatprep.mubr.f32.mxu1 %v5982_v43  ;;  %v627_v43 = vsel %vm614_vm1, %v624_v46, %v626_v47 }
  0xa7   : > { %5152 = vmatprep.subr.mxu0 %v610_v60  ;;  %5553 = vset.pattern.permute.xlu1 %v5814_v59  ;;  %v640_v59 = vrot.slane %v6034_v13, 2 }
  0xa8   : > { %5153 = vmatpush3.msra.mxu0 %v610_v60  ;;  %5129 = vmatmul.mubr.f32.gmra.mxu1 %v5985_v44  ;;  %v630_v44 = vrot.slane %v6005_v58, 2 }
  0xa9   : > { %5073 = vmatmul.mubr.f32.gmra.mxu0 %v272_v62  ;;  %5154 = vmatprep.subr.mxu0 %v609_v63  ;;  %v641_v62 = vsel %vm614_vm1, %v638_v57, %v640_v59 }
  0xaa   : > { %5155 = vmatpush3.msra.mxu0 %v609_v63  ;;  %5075 = vmatprep.mubr.f32.mxu0 %v274_v1  ;;  %v631_v54 = vsel %vm614_vm1, %v628_v49, %v630_v44  ;;  %v633_v55 = vsel %vm614_vm1, %v630_v44, %v632_v53  ;;  %v644_v63 = vrot.slane %v6046_v21, 2  ;;  %v1025_v49 = vld [vmem:[#allocation10 + $0x10] sm:$0xff] }
  0xab   : > { %5156 = vmatprep.subr.mxu0 %v608_v4  ;;  %5131 = vmatprep.mubr.f32.mxu1 %v5993_v50  ;;  %v634_v50 = vrot.slane %v6018_v3, 2 }
  0xac   : > { %5157 = vmatpush3.msra.mxu0 %v608_v4  ;;  %5132 = vmatmul.mubr.f32.gmra.mxu1 %v5997_v52  ;;  %v636_v52 = vrot.slane %v6022_v5, 2  ;;  %v1036_v4 = vld [vmem:[#allocation10 + $0x68] sm:$0xff] }
  0xad   : > { %5076 = vmatmul.mubr.f32.gmra.mxu0 %v276_v6  ;;  %5158 = vmatprep.subr.mxu0 %v607_v7  ;;  %v635_v56 = vsel %vm614_vm1, %v632_v53, %v634_v50  ;;  %v1034_v6 = vld [vmem:[#allocation10 + $0x58] sm:$0xff]  ;;  %v1024_v53 = vld [vmem:[#allocation10 + $0x8] sm:$0xff] }
  0xae   : > { %5159 = vmatpush3.msra.mxu0 %v607_v7  ;;  %5078 = vmatprep.mubr.f32.mxu0 %v278_v9  ;;  %v639_v60 = vsel %vm614_vm1, %v636_v52, %v638_v57  ;;  %v1033_v7 = vld [vmem:[#allocation10 + $0x50] sm:$0xff]  ;;  %v1031_v9 = vld [vmem:[#allocation10 + $0x40] sm:$0xff] }
  0xaf   : > { %5160 = vmatprep.subr.mxu0 %v606_v12  ;;  %5134 = vmatprep.mubr.f32.mxu1 %v6005_v58  ;;  %v637_v58 = vsel %vm614_vm1, %v634_v50, %v636_v52 }
  0xb0   : > { %5161 = vmatpush3.msra.mxu0 %v606_v12  ;;  %5135 = vmatmul.mubr.f32.gmra.mxu1 %v6010_v61  ;;  %v642_v61 = vrot.slane %v6042_v19, 2  ;;  %v1028_v12 = vld [vmem:[#allocation10 + $0x28] sm:$0xff] }
  0xb1   : > { %5079 = vmatmul.mubr.f32.gmra.mxu0 %v280_v14  ;;  %5162 = vmatprep.subr.mxu0 %v605_v15  ;;  %v1026_v14 = vld [vmem:[#allocation10 + $0x18] sm:$0xff] }
  0xb2   : > { %5163 = vmatpush3.msra.mxu0 %v605_v15  ;;  %5081 = vmatprep.mubr.f32.mxu0 %v282_v17  ;;  %v643_v0 = vsel %vm614_vm1, %v640_v59, %v642_v61  ;;  %v645_v1 = vsel %vm614_vm1, %v642_v61, %v644_v63  ;;  %v1023_v59 = vld [vmem:[#allocation10] sm:$0xff] }
  0xb3   : > { %5164 = vmatprep.subr.mxu0 %v604_v20  ;;  %5137 = vmatprep.mubr.f32.mxu1 %v6018_v3  ;;  %v1037_v3 = vld [vmem:[#allocation10 + $0x70] sm:$0xff] }
  0xb4   : > { %5165 = vmatpush3.msra.mxu0 %v604_v20  ;;  %5138 = vmatmul.mubr.f32.gmra.mxu1 %v6022_v5  ;;  %v1035_v5 = vld [vmem:[#allocation10 + $0x60] sm:$0xff] }
  0xb5   : > { %5082 = vmatmul.mubr.f32.gmra.mxu0 %v284_v22  ;;  %5166 = vmatprep.subr.mxu0 %v603_v23 }
  0xb6   : > { %5167 = vmatpush3.msra.mxu0 %v603_v23  ;;  %5084 = vmatprep.mubr.f32.mxu0 %v286_v25 }
  0xb7   : > { %5168 = vmatprep.subr.mxu0 %v602_v27  ;;  %5140 = vmatprep.mubr.f32.mxu1 %v6030_v11  ;;  %v1029_v11 = vld [vmem:[#allocation10 + $0x30] sm:$0xff] }
  0xb8   : > { %5169 = vmatpush3.msra.mxu0 %v602_v27  ;;  %5141 = vmatmul.mubr.f32.gmra.mxu1 %v6034_v13  ;;  %v1027_v13 = vld [vmem:[#allocation10 + $0x20] sm:$0xff] }
  0xb9   : > { %5085 = vmatmul.mubr.f32.gmra.mxu0 %v288_v30  ;;  %5170 = vmatprep.subr.mxu0 %v601_v31 }
  0xba   : > { %5171 = vmatpush3.msra.mxu0 %v601_v31  ;;  %5087 = vmatprep.mubr.f32.mxu0 %v290_v33 }
  0xbb   : > { %5172 = vmatprep.subr.mxu0 %v600_v37  ;;  %5143 = vmatprep.mubr.f32.mxu1 %v6042_v19 }
  0xbc   : > { %5173 = vmatpush3.msra.mxu0 %v600_v37  ;;  %5144 = vmatmul.mubr.f32.gmra.mxu1 %v6046_v21 }
  0xbd   : > { %5088 = vmatmul.mubr.f32.gmra.mxu0 %v289_v26  ;;  %5174 = vmatprep.subr.mxu0 %v599_v38 }
  0xbe   : > { %5175 = vmatpush3.msra.mxu0 %v599_v38  ;;  %5178 = vmatprep.mubr.f32.mxu0 %v617_v40 }
  0xbf   : > { %5176 = vmatprep.subr.mxu0 %v598_v29  ;;  %5202 = vmatprep.subr.msk.mxu1 %vm259_vm0, %v1038_v2 }
  0xc0   : > { %5177 = vmatpush3.msra.mxu0 %v598_v29  ;;  %5203 = vmatpush3.msk.msra.mxu1 %vm259_vm0, %v1038_v2 }
  0xc1   : > { %5179 = vmatmul.mubr.f32.vlgmr.msra.gmra.mxu0 %v619_v42  ;;  %5204 = vmatprep.subr.mxu1 %v1037_v3 }
  0xc2   : > { %5181 = vmatprep.mubr.f32.mxu0 %v621_v45  ;;  %5205 = vmatpush3.msra.mxu1 %v1037_v3 }
  0xc3   : > { %5206 = vmatprep.subr.mxu1 %v1036_v4 }
  0xc4   : > { %5207 = vmatpush3.msra.mxu1 %v1036_v4 }
  0xc5   : > { %5182 = vmatmul.mubr.f32.gmra.mxu0 %v623_v35  ;;  %5208 = vmatprep.subr.mxu1 %v1035_v5 }
  0xc6   : > { %5184 = vmatprep.mubr.f32.mxu0 %v625_v48  ;;  %5209 = vmatpush3.msra.mxu1 %v1035_v5 }
  0xc7   : > { %5210 = vmatprep.subr.mxu1 %v1034_v6 }
  0xc8   : > { %5211 = vmatpush3.msra.mxu1 %v1034_v6 }
  0xc9   : > { %5185 = vmatmul.mubr.f32.gmra.mxu0 %v627_v43  ;;  %5212 = vmatprep.subr.mxu1 %v1033_v7 }
  0xca   : > { %5187 = vmatprep.mubr.f32.mxu0 %v629_v51  ;;  %5213 = vmatpush3.msra.mxu1 %v1033_v7 }
  0xcb   : > { %5214 = vmatprep.subr.mxu1 %v1032_v8 }
  0xcc   : > { %5215 = vmatpush3.msra.mxu1 %v1032_v8 }
  0xcd   : > { %5188 = vmatmul.mubr.f32.gmra.mxu0 %v631_v54  ;;  %5216 = vmatprep.subr.mxu1 %v1031_v9 }
  0xce   : > { %5190 = vmatprep.mubr.f32.mxu0 %v633_v55  ;;  %5217 = vmatpush3.msra.mxu1 %v1031_v9 }
  0xcf   : > { %5218 = vmatprep.subr.mxu1 %v1030_v10 }
  0xd0   : > { %5219 = vmatpush3.msra.mxu1 %v1030_v10 }
  0xd1   : > { %5191 = vmatmul.mubr.f32.gmra.mxu0 %v635_v56  ;;  %5220 = vmatprep.subr.mxu1 %v1029_v11 }
  0xd2   : > { %5193 = vmatprep.mubr.f32.mxu0 %v637_v58  ;;  %5221 = vmatpush3.msra.mxu1 %v1029_v11 }
  0xd3   : > { %5222 = vmatprep.subr.mxu1 %v1028_v12 }
  0xd4   : > { %5223 = vmatpush3.msra.mxu1 %v1028_v12 }
  0xd5   : > { %5194 = vmatmul.mubr.f32.gmra.mxu0 %v639_v60  ;;  %5224 = vmatprep.subr.mxu1 %v1027_v13 }
  0xd6   : > { %5196 = vmatprep.mubr.f32.mxu0 %v641_v62  ;;  %5225 = vmatpush3.msra.mxu1 %v1027_v13 }
  0xd7   : > { %5226 = vmatprep.subr.mxu1 %v1026_v14 }
  0xd8   : > { %5227 = vmatpush3.msra.mxu1 %v1026_v14 }
  0xd9   : > { %5197 = vmatmul.mubr.f32.gmra.mxu0 %v643_v0  ;;  %5228 = vmatprep.subr.mxu1 %v1025_v49 }
  0xda   : > { %5199 = vmatprep.mubr.f32.mxu0 %v645_v1  ;;  %5229 = vmatpush3.msra.mxu1 %v1025_v49 }
  0xdb   : > { %5230 = vmatprep.subr.mxu1 %v1024_v53 }
  0xdc   : > { %5231 = vmatpush3.msra.mxu1 %v1024_v53 }
  0xdd   : > { %5200 = vmatmul.mubr.f32.gmra.mxu0 %v644_v63  ;;  %5232 = vmatprep.subr.mxu1 %v1023_v59 }
  0xde   : > { %5233 = vmatpush3.msra.mxu1 %v1023_v59 }
 0x11e   : > { %v6110_v45 = vpop.permute.xlu0 %829 }
 0x15f   : > { %v5068_v15 = vpop.f32.mrf.mxu0 }
 0x160   : > { %v5124_v16 = vpop.f32.mrf.mxu1 }
 0x161   : > { %v373_v17 = vpop.f32.mrf.mxu0  ;;  %v524_v42 = vadd.f32 %v5124_v16, %v5068_v15 }
 0x162   : > { %v518_v18 = vpop.f32.mrf.mxu1 }
 0x163   : > { %v519_v46 = vadd.f32 %v518_v18, %v373_v17 }
 0x164   : > { %v5071_v19 = vpop.f32.mrf.mxu0  ;;  %v5127_v20 = vpop.f32.mrf.mxu1 }
 0x165   : > { %v534_v43 = vadd.f32 %v5127_v20, %v5071_v19 }
 0x166   : > { %v383_v21 = vpop.f32.mrf.mxu0  ;;  %v528_v23 = vpop.f32.mrf.mxu1 }
 0x167   : > { %v529_v50 = vadd.f32 %v528_v23, %v383_v21 }
 0x168   : > { %v5130_v26 = vpop.f32.mrf.mxu1 }
 0x169   : > { %v5074_v22 = vpop.f32.mrf.mxu0 }
 0x16a   : > { %v538_v31 = vpop.f32.mrf.mxu1  ;;  %v544_v60 = vadd.f32 %v5130_v26, %v5074_v22 }
 0x16b   : > { %v393_v24 = vpop.f32.mrf.mxu0 }
 0x16c   : > { %v5133_v36 = vpop.f32.mrf.mxu1  ;;  %v539_v63 = vadd.f32 %v538_v31, %v393_v24 }
 0x16d   : > { %v5077_v25 = vpop.f32.mrf.mxu0 }
 0x16e   : > { %v548_v39 = vpop.f32.mrf.mxu1  ;;  %v554_v8 = vadd.f32 %v5133_v36, %v5077_v25 }
 0x16f   : > { %v403_v27 = vpop.f32.mrf.mxu0 }
 0x170   : > { %v5136_v29 = vpop.f32.mrf.mxu1  ;;  %v549_v11 = vadd.f32 %v548_v39, %v403_v27 }
 0x171   : > { %v6094_v30 = vpop.f32.mrf.mxu0 }
 0x172   : > { %v558_v35 = vpop.f32.mrf.mxu1  ;;  %v564_v22 = vadd.f32 %v5136_v29, %v6094_v30 }
 0x173   : > { %v6096_v33 = vpop.f32.mrf.mxu0 }
 0x174   : > { %v5139_v55 = vpop.f32.mrf.mxu1  ;;  %v559_v25 = vadd.f32 %v558_v35, %v6096_v33 }
 0x175   : > { %v6098_v34 = vpop.f32.mrf.mxu0 }
 0x176   : > { %v568_v1 = vpop.f32.mrf.mxu1  ;;  %v574_v35 = vadd.f32 %v5139_v55, %v6098_v34 }
 0x177   : > { %v6100_v37 = vpop.f32.mrf.mxu0 }
 0x178   : > { %v5142_v15 = vpop.f32.mrf.mxu1 }
 0x179   : > { %v6102_v38 = vpop.f32.mrf.mxu0 }
 0x17a   : > { %v578_v39 = vpop.f32.mrf.mxu1  ;;  %v584_v59 = vadd.f32 %v5142_v15, %v6102_v38 }
 0x17b   : > { %v6104_v40 = vpop.f32.mrf.mxu0 }
 0x17d   : > { %v6106_v28 = vpop.f32.mrf.mxu0 }
 0x17f   : > { %v6108_v41 = vpop.f32.mrf.mxu0 }
 0x181   : > { %v5180_v32 = vpop.f32.mrf.mxu0 }
 0x182   : > { %v808_v47 = vadd.f32 %v5180_v32, %v524_v42 }
 0x183   : > { %v728_v48 = vpop.f32.mrf.mxu0 }
 0x184   : > { %v807_v44 = vadd.f32 %v728_v48, %v519_v46  ;;  %v833_v51 = vadd.f32 %v6110_v45, %v808_v47 }
 0x185   : > { %v5183_v54 = vpop.f32.mrf.mxu0 }
 0x186   : > { %v832_v52 = vadd.f32 %v6110_v45, %v807_v44  ;;  %v810_v56 = vadd.f32 %v5183_v54, %v534_v43  ;;  %v849_v58 = vmax.f32 %v833_v51, 0.0  ;;  %v569_v43 = vadd.f32 %v568_v1, %v6100_v37 }
 0x187   : > { %v738_v57 = vpop.f32.mrf.mxu0 }
 0x188   : > { %v848_v61 = vmax.f32 %v832_v52, 0.0  ;;  %v809_v62 = vadd.f32 %v738_v57, %v529_v50  ;;  %v835_v3 = vadd.f32 %v6110_v45, %v810_v56  ;;  %v881_v7 = vrot.slane %v849_v58, 1  ;;  %v5145_v50 = vpop.f32.mrf.mxu1 }
 0x189   : > { %v5186_v0 = vpop.f32.mrf.mxu0 }
 0x18a   : > { %v880_v2 = vrot.slane %v848_v61, 1  ;;  %v834_v4 = vadd.f32 %v6110_v45, %v809_v62  ;;  %v812_v5 = vadd.f32 %v5186_v0, %v544_v60  ;;  %v851_v16 = vmax.f32 %v835_v3, 0.0 }
 0x18b   : > { %v748_v6 = vpop.f32.mrf.mxu0 }
 0x18c   : > { %v850_v9 = vmax.f32 %v834_v4, 0.0  ;;  %v811_v10 = vadd.f32 %v748_v6, %v539_v63  ;;  %v6117_v12 = vadd.f32 %v6110_v45, %v812_v5  ;;  %v882_v14 = vsel %vm259_vm0, %v880_v2, %v881_v7  ;;  %v588_v4 = vpop.f32.mrf.mxu1 }
 0x18d   : > { %v5189_v13 = vpop.f32.mrf.mxu0  ;;  %v6121_v20 = vmax.f32 %v848_v61, %v882_v14  ;;  %v885_v42 = vrot.slane %v851_v16, 1  ;;  %v579_v63 = vadd.f32 %v578_v39, %v6104_v40  ;;  %v589_v14 = vadd.f32 %v588_v4, %v6108_v41 }
 0x18e   : > { %v883_v17 = vrot.slane %v850_v9, 1  ;;  %v836_v18 = vadd.f32 %v6110_v45, %v811_v10  ;;  %v814_v19 = vadd.f32 %v5189_v13, %v554_v8  ;;  %v853_v26 = vmax.f32 %v6117_v12, 0.0 }
 0x18f   : > { %v758_v21 = vpop.f32.mrf.mxu0  ;;  %959 = vrot.lane.b32.xlu0 %v6121_v20, %s5815_s20  ;;  %v594_v10 = vadd.f32 %v5145_v50, %v6106_v28 }
 0x190   : > { %v852_v23 = vmax.f32 %v836_v18, 0.0  ;;  %v813_v24 = vadd.f32 %v758_v21, %v549_v11  ;;  %v6127_v27 = vadd.f32 %v6110_v45, %v814_v19  ;;  %v884_v36 = vsel %vm259_vm0, %v881_v7, %v883_v17 }
 0x191   : > { %v5192_v31 = vpop.f32.mrf.mxu0  ;;  %v6133_v46 = vmax.f32 %v849_v58, %v884_v36  ;;  %v886_v49 = vsel %vm259_vm0, %v883_v17, %v885_v42  ;;  %v889_v44 = vrot.slane %v853_v26, 1 }
 0x192   : > { %v887_v32 = vrot.slane %v852_v23, 1  ;;  %v838_v30 = vadd.f32 %v6110_v45, %v813_v24  ;;  %v816_v29 = vadd.f32 %v5192_v31, %v564_v22  ;;  %v855_v51 = vmax.f32 %v6127_v27, 0.0 }
 0x193   : > { %v768_v33 = vpop.f32.mrf.mxu0  ;;  %961 = vrot.lane.b32.xlu1 %v6133_v46, %s5815_s20  ;;  %v6144_v57 = vmax.f32 %v850_v9, %v886_v49 }
 0x194   : > { %v854_v47 = vmax.f32 %v838_v30, 0.0  ;;  %v815_v48 = vadd.f32 %v768_v33, %v559_v25  ;;  %v888_v54 = vsel %vm259_vm0, %v885_v42, %v887_v32  ;;  %v841_v56 = vadd.f32 %v6110_v45, %v816_v29 }
 0x195   : > { %v5195_v53 = vpop.f32.mrf.mxu0  ;;  %v6146_v58 = vmax.f32 %v851_v16, %v888_v54  ;;  %v890_v62 = vsel %vm259_vm0, %v887_v32, %v889_v44  ;;  %v893_v0 = vrot.slane %v855_v51, 1 }
 0x196   : > { %v891_v52 = vrot.slane %v854_v47, 1  ;;  %v840_v34 = vadd.f32 %v6110_v45, %v815_v48  ;;  %v818_v55 = vadd.f32 %v5195_v53, %v574_v35  ;;  %v857_v38 = vmax.f32 %v841_v56, 0.0 }
 0x197   : > { %v778_v37 = vpop.f32.mrf.mxu0  ;;  %963 = vrot.lane.b32.xlu1 %v6144_v57, %s5815_s20  ;;  %965 = vrot.lane.b32.xlu0 %v6146_v58, %s5815_s20  ;;  %v6158_v8 = vmax.f32 %v852_v23, %v890_v62 }
 0x198   : > { %v856_v60 = vmax.f32 %v840_v34, 0.0  ;;  %v817_v61 = vadd.f32 %v778_v37, %v569_v43  ;;  %v843_v1 = vadd.f32 %v6110_v45, %v818_v55  ;;  %v892_v3 = vsel %vm259_vm0, %v889_v44, %v891_v52 }
 0x199   : > { %v5198_v2 = vpop.f32.mrf.mxu0  ;;  %v6160_v40 = vmax.f32 %v853_v26, %v892_v3  ;;  %v894_v13 = vsel %vm259_vm0, %v891_v52, %v893_v0  ;;  %v897_v19 = vrot.slane %v857_v38, 1 }
 0x19a   : > { %v895_v5 = vrot.slane %v856_v60, 1  ;;  %v842_v6 = vadd.f32 %v6110_v45, %v817_v61  ;;  %v820_v7 = vadd.f32 %v5198_v2, %v584_v59  ;;  %v859_v15 = vmax.f32 %v843_v1, 0.0 }
 0x19b   : > { %v788_v9 = vpop.f32.mrf.mxu0  ;;  %967 = vrot.lane.b32.xlu1 %v6158_v8, %s5815_s20  ;;  %969 = vrot.lane.b32.xlu0 %v6160_v40, %s5815_s20  ;;  %v6172_v23 = vmax.f32 %v854_v47, %v894_v13 }
 0x19c   : > { %v858_v11 = vmax.f32 %v842_v6, 0.0  ;;  %v819_v12 = vadd.f32 %v788_v9, %v579_v63  ;;  %v845_v16 = vadd.f32 %v6110_v45, %v820_v7  ;;  %v896_v18 = vsel %vm259_vm0, %v893_v0, %v895_v5 }
 0x19d   : > { %v5201_v17 = vpop.f32.mrf.mxu0  ;;  %v6174_v41 = vmax.f32 %v855_v51, %v896_v18  ;;  %v898_v27 = vsel %vm259_vm0, %v895_v5, %v897_v19  ;;  %v901_v31 = vrot.slane %v859_v15, 1 }
 0x19e   : > { %v899_v28 = vrot.slane %v858_v11, 1  ;;  %v844_v21 = vadd.f32 %v6110_v45, %v819_v12  ;;  %v822_v22 = vadd.f32 %v5201_v17, %v594_v10  ;;  %v861_v36 = vmax.f32 %v845_v16, 0.0 }
 0x19f   : > { %v798_v24 = vpop.f32.mrf.mxu0  ;;  %971 = vrot.lane.b32.xlu1 %v6172_v23, %s5815_s20  ;;  %973 = vrot.lane.b32.xlu0 %v6174_v41, %s5815_s20  ;;  %v935_v33 = vmax.f32 %v856_v60, %v898_v27  ;;  %v1405_v27 = vld [vmem:[#allocation8 + $0xc8] sm:$0xff] }
 0x1a0   : > { %v860_v25 = vmax.f32 %v844_v21, 0.0  ;;  %v821_v26 = vadd.f32 %v798_v24, %v589_v14  ;;  %v900_v39 = vsel %vm259_vm0, %v897_v19, %v899_v28  ;;  %v847_v32 = vadd.f32 %v6110_v45, %v822_v22  ;;  %v1236_v21 = vld [vmem:[#allocation11] sm:$0xff]  ;;  %v1411_v22 = vld [vmem:[#allocation8 + $0xf8] sm:$0xff] }
 0x1a1   : > { %v936_v29 = vmax.f32 %v857_v38, %v900_v39  ;;  %v902_v47 = vsel %vm259_vm0, %v899_v28, %v901_v31  ;;  %v905_v43 = vrot.slane %v861_v36, 1  ;;  %5290 = vmatprep.mubr.msk.f32.mxu0 %vm1244_vm3, %v1236_v21  ;;  %5302 = vmatprep.subr.mxu1 %v1411_v22  ;;  %v1408_v24 = vld [vmem:[#allocation8 + $0xe0] sm:$0xff]  ;;  %v1402_v39 = vld [vmem:[#allocation8 + $0xb0] sm:$0xff] }
 0x1a2   : > { %v903_v42 = vrot.slane %v860_v25, 1  ;;  %v846_v30 = vadd.f32 %v6110_v45, %v821_v26  ;;  %v863_v44 = vmax.f32 %v847_v32, 0.0  ;;  %v937_v53 = vmax.f32 %v858_v11, %v902_v47  ;;  %v1406_v26 = vld [vmem:[#allocation8 + $0xd0] sm:$0xff]  ;;  %v1400_v32 = vld [vmem:[#allocation8 + $0xa0] sm:$0xff] }
 0x1a3   : > { %975 = vrot.lane.b32.xlu1 %v935_v33, %s5815_s20  ;;  %977 = vrot.lane.b32.xlu0 %v936_v29, %s5815_s20 }
 0x1a4   : > { %v862_v35 = vmax.f32 %v846_v30, 0.0  ;;  %v904_v48 = vsel %vm259_vm0, %v901_v31, %v903_v42  ;;  %v906_v54 = vsel %vm259_vm0, %v903_v42, %v905_v43  ;;  %v909_v52 = vrot.slane %v863_v44, 1  ;;  %v1404_v31 = vld [vmem:[#allocation8 + $0xc0] sm:$0xff]  ;;  %v1401_v42 = vld [vmem:[#allocation8 + $0xa8] sm:$0xff] }
 0x1a5   : > { %v938_v49 = vmax.f32 %v859_v15, %v904_v48  ;;  %v939_v56 = vmax.f32 %v860_v25, %v906_v54  ;;  %v1407_v25 = vld [vmem:[#allocation8 + $0xd8] sm:$0xff] }
 0x1a6   : > { %v907_v51 = vrot.slane %v862_v35, 1  ;;  %v942_v37 = vmax.f32 %v863_v44, %v909_v52 }
 0x1a7   : > { %979 = vrot.lane.b32.xlu1 %v937_v53, %s5815_s20  ;;  %981 = vrot.lane.b32.xlu0 %v938_v49, %s5815_s20 }
 0x1a8   : > { %v908_v45 = vsel %vm259_vm0, %v905_v43, %v907_v51  ;;  %v910_v34 = vsel %vm259_vm0, %v907_v51, %v909_v52 }
 0x1a9   : > { %v940_v50 = vmax.f32 %v861_v36, %v908_v45  ;;  %v941_v55 = vmax.f32 %v862_v35, %v910_v34  ;;  %v1403_v36 = vld [vmem:[#allocation8 + $0xb8] sm:$0xff]  ;;  %v1237_v34 = vld [vmem:[#allocation11 + $0x8] sm:$0xff] }
 0x1ab   : > { %983 = vrot.lane.b32.xlu1 %v939_v56, %s5815_s20  ;;  %985 = vrot.lane.b32.xlu0 %v940_v50, %s5815_s20 }
 0x1af   : > { %987 = vrot.lane.b32.xlu1 %v941_v55, %s5815_s20  ;;  %989 = vrot.lane.b32.xlu0 %v942_v37, %s5815_s20 }
 0x201   : > { %v960_v59 = vpop.permute.xlu0 %959 }
 0x202   : > { %v1007_v60 = vmax.f32 %v6121_v20, %v960_v59  ;;  %v1393_v59 = vld [vmem:[#allocation8 + $0x70] sm:$0xff] }
 0x204   : > { %5234 = vmatprep.mubr.msk.f32.mxu1 %vm1039_vm2, %v1007_v60  ;;  %v1239_v60 = vld [vmem:[#allocation11 + $0x18] sm:$0xff] }
 0x205   : > { %v962_v61 = vpop.permute.xlu1 %961 }
 0x206   : > { %v1008_v62 = vmax.f32 %v6133_v46, %v962_v61  ;;  %v1392_v61 = vld [vmem:[#allocation8 + $0x68] sm:$0xff] }
 0x208   : > { %5235 = vmatmul.mubr.msk.f32.vlgmr.msra.gmra.mxu1 %vm1039_vm2, %v1008_v62  ;;  %v1240_v62 = vld [vmem:[#allocation11 + $0x20] sm:$0xff] }
 0x209   : > { %v964_v63 = vpop.permute.xlu1 %963  ;;  %v966_v0 = vpop.permute.xlu0 %965  ;;  %5303 = vmatpush3.msra.mxu1 %v1411_v22 }
 0x20a   : > { %v1009_v1 = vmax.f32 %v6144_v57, %v964_v63  ;;  %v1010_v2 = vmax.f32 %v6146_v58, %v966_v0  ;;  %v1391_v63 = vld [vmem:[#allocation8 + $0x60] sm:$0xff]  ;;  %v1241_v0 = vld [vmem:[#allocation11 + $0x28] sm:$0xff] }
 0x20c   : > { %5237 = vmatprep.mubr.msk.f32.mxu1 %vm1039_vm2, %v1009_v1  ;;  %v1390_v1 = vld [vmem:[#allocation8 + $0x58] sm:$0xff] }
 0x20d   : > { %v968_v3 = vpop.permute.xlu1 %967  ;;  %5238 = vmatmul.mubr.msk.f32.gmra.mxu1 %vm1039_vm2, %v1010_v2  ;;  %v970_v4 = vpop.permute.xlu0 %969  ;;  %v1242_v2 = vld [vmem:[#allocation11 + $0x30] sm:$0xff] }
 0x20e   : > { %v1011_v20 = vmax.f32 %v6158_v8, %v968_v3  ;;  %v1012_v38 = vmax.f32 %v6160_v40, %v970_v4  ;;  %v1389_v3 = vld [vmem:[#allocation8 + $0x50] sm:$0xff]  ;;  %v1243_v4 = vld [vmem:[#allocation11 + $0x38] sm:$0x3f] }
 0x210   : > { %5240 = vmatprep.mubr.msk.f32.mxu1 %vm1039_vm2, %v1011_v20  ;;  %v1388_v20 = vld [vmem:[#allocation8 + $0x48] sm:$0xff] }
 0x211   : > { %v972_v46 = vpop.permute.xlu1 %971  ;;  %5241 = vmatmul.mubr.msk.f32.gmra.mxu1 %vm1039_vm2, %v1012_v38  ;;  %v974_v5 = vpop.permute.xlu0 %973  ;;  %v1387_v38 = vld [vmem:[#allocation8 + $0x40] sm:$0xff] }
 0x212   : > { %v1013_v57 = vmax.f32 %v6172_v23, %v972_v46  ;;  %v1014_v58 = vmax.f32 %v6174_v41, %v974_v5  ;;  %v1410_v23 = vld [vmem:[#allocation8 + $0xf0] sm:$0xff]  ;;  %v1409_v41 = vld [vmem:[#allocation8 + $0xe8] sm:$0xff]  ;;  %v1386_v46 = vld [vmem:[#allocation8 + $0x38] sm:$0xff] }
 0x213   : > { %5304 = vmatprep.subr.mxu1 %v1410_v23  ;;  %v1385_v5 = vld [vmem:[#allocation8 + $0x30] sm:$0xff] }
 0x214   : > { %5243 = vmatprep.mubr.msk.f32.mxu1 %vm1039_vm2, %v1013_v57  ;;  %5305 = vmatpush3.msra.mxu1 %v1410_v23  ;;  %v1384_v57 = vld [vmem:[#allocation8 + $0x28] sm:$0xff] }
 0x215   : > { %v976_v6 = vpop.permute.xlu1 %975  ;;  %5244 = vmatmul.mubr.msk.f32.gmra.mxu1 %vm1039_vm2, %v1014_v58  ;;  %v978_v7 = vpop.permute.xlu0 %977  ;;  %5306 = vmatprep.subr.mxu1 %v1409_v41  ;;  %v1383_v58 = vld [vmem:[#allocation8 + $0x20] sm:$0xff] }
 0x216   : > { %v1015_v9 = vmax.f32 %v935_v33, %v976_v6  ;;  %v1016_v8 = vmax.f32 %v936_v29, %v978_v7  ;;  %5307 = vmatpush3.msra.mxu1 %v1409_v41  ;;  %v1382_v6 = vld [vmem:[#allocation8 + $0x18] sm:$0xff]  ;;  %v1381_v7 = vld [vmem:[#allocation8 + $0x10] sm:$0xff] }
 0x217   : > { %5308 = vmatprep.subr.mxu1 %v1408_v24 }
 0x218   : > { %5246 = vmatprep.mubr.msk.f32.mxu1 %vm1039_vm2, %v1015_v9  ;;  %5309 = vmatpush3.msra.mxu1 %v1408_v24  ;;  %v1380_v9 = vld [vmem:[#allocation8 + $0x8] sm:$0xff] }
 0x219   : > { %v980_v40 = vpop.permute.xlu1 %979  ;;  %5247 = vmatmul.mubr.msk.f32.gmra.mxu1 %vm1039_vm2, %v1016_v8  ;;  %v982_v10 = vpop.permute.xlu0 %981  ;;  %5310 = vmatprep.subr.mxu1 %v1407_v25  ;;  %v1399_v8 = vld [vmem:[#allocation8 + $0x98] sm:$0xff] }
 0x21a   : > { %v1017_v11 = vmax.f32 %v937_v53, %v980_v40  ;;  %v1018_v12 = vmax.f32 %v938_v49, %v982_v10  ;;  %5311 = vmatpush3.msra.mxu1 %v1407_v25  ;;  %v1379_v40 = vld [vmem:[#allocation8] sm:$0xff]  ;;  %v1398_v10 = vld [vmem:[#allocation8 + $0x90] sm:$0xff] }
 0x21b   : > { %5312 = vmatprep.subr.mxu1 %v1406_v26 }
 0x21c   : > { %5249 = vmatprep.mubr.msk.f32.mxu1 %vm1039_vm2, %v1017_v11  ;;  %5313 = vmatpush3.msra.mxu1 %v1406_v26  ;;  %v1397_v11 = vld [vmem:[#allocation8 + $0x88] sm:$0xff] }
 0x21d   : > { %v984_v13 = vpop.permute.xlu1 %983  ;;  %5250 = vmatmul.mubr.msk.f32.gmra.mxu1 %vm1039_vm2, %v1018_v12  ;;  %v986_v14 = vpop.permute.xlu0 %985  ;;  %5314 = vmatprep.subr.mxu1 %v1405_v27  ;;  %v1396_v12 = vld [vmem:[#allocation8 + $0x80] sm:$0xff] }
 0x21e   : > { %v1019_v15 = vmax.f32 %v939_v56, %v984_v13  ;;  %v1020_v16 = vmax.f32 %v940_v50, %v986_v14  ;;  %5315 = vmatpush3.msra.mxu1 %v1405_v27  ;;  %v1669_v13 = vld [vmem:[#allocation8 + $0x178] sm:$0xff]  ;;  %v1668_v27 = vld [vmem:[#allocation8 + $0x170] sm:$0xff] }
 0x21f   : > { %5316 = vmatprep.subr.mxu1 %v1404_v31  ;;  %v4678_v14 = vld [vmem:[#allocation4] ss:$0 sm:$0xff] }
 0x220   : > { %5252 = vmatprep.mubr.msk.f32.mxu1 %vm1039_vm2, %v1019_v15  ;;  %5317 = vmatpush3.msra.mxu1 %v1404_v31 }
 0x221   : > { %v988_v17 = vpop.permute.xlu1 %987  ;;  %5253 = vmatmul.mubr.msk.f32.gmra.mxu1 %vm1039_vm2, %v1020_v16  ;;  %v990_v18 = vpop.permute.xlu0 %989  ;;  %5318 = vmatprep.subr.mxu1 %v1403_v36 }
 0x222   : > { %v1021_v19 = vmax.f32 %v941_v55, %v988_v17  ;;  %v1022_v28 = vmax.f32 %v942_v37, %v990_v18  ;;  %5319 = vmatpush3.msra.mxu1 %v1403_v36  ;;  %v1394_v55 = vld [vmem:[#allocation8 + $0x78] sm:$0xff]  ;;  %v1238_v37 = vld [vmem:[#allocation11 + $0x10] sm:$0xff]  ;;  %1812 = vperm.xlu1 %5553, %v4678_v14   ;;  %v1915_v14 = vld [vmem:[#allocation13 + $0x28] sm:$0xff] }
 0x223   : > { %5320 = vmatprep.subr.mxu1 %v1402_v39 }
 0x224   : > { %5255 = vmatprep.mubr.msk.f32.mxu1 %vm1039_vm2, %v1021_v19  ;;  %5321 = vmatpush3.msra.mxu1 %v1402_v39  ;;  %v1667_v39 = vld [vmem:[#allocation8 + $0x168] sm:$0xff] }
 0x225   : > { %5256 = vmatmul.mubr.msk.f32.gmra.mxu1 %vm1039_vm2, %v1022_v28  ;;  %5322 = vmatprep.subr.mxu1 %v1401_v42 }
 0x226   : > { %5323 = vmatpush3.msra.mxu1 %v1401_v42 }
 0x227   : > { %5324 = vmatprep.subr.mxu1 %v1400_v32 }
 0x228   : > { %5325 = vmatpush3.msra.mxu1 %v1400_v32 }
 0x229   : > { %5326 = vmatprep.subr.mxu1 %v1399_v8 }
 0x22a   : > { %5327 = vmatpush3.msra.mxu1 %v1399_v8  ;;  %v1921_v8 = vld [vmem:[#allocation13 + $0x58] sm:$0xff] }
 0x22b   : > { %5328 = vmatprep.subr.mxu1 %v1398_v10 }
 0x22c   : > { %5329 = vmatpush3.msra.mxu1 %v1398_v10  ;;  %v1919_v10 = vld [vmem:[#allocation13 + $0x48] sm:$0xff] }
 0x22d   : > { %5330 = vmatprep.subr.mxu1 %v1397_v11 }
 0x22e   : > { %5331 = vmatpush3.msra.mxu1 %v1397_v11  ;;  %v1918_v11 = vld [vmem:[#allocation13 + $0x40] sm:$0xff] }
 0x22f   : > { %5332 = vmatprep.subr.mxu1 %v1396_v12 }
 0x230   : > { %5333 = vmatpush3.msra.mxu1 %v1396_v12  ;;  %v1917_v12 = vld [vmem:[#allocation13 + $0x38] sm:$0xff] }
 0x231   : > { %5390 = vmatprep.subr.mxu1 %v1669_v13 }
 0x2c8   : > { %v5236_v30 = vpop.f32.mrf.mxu1 }
 0x2ca   : > { %v1157_v29 = vpop.f32.mrf.mxu1 }
 0x2cd   : > { %v5239_v33 = vpop.f32.mrf.mxu1 }
 0x2cf   : > { %v1167_v35 = vpop.f32.mrf.mxu1 }
 0x2d1   : > { %v5242_v47 = vpop.f32.mrf.mxu1 }
 0x2d3   : > { %v1177_v48 = vpop.f32.mrf.mxu1 }
 0x2d5   : > { %v5245_v49 = vpop.f32.mrf.mxu1 }
 0x2d7   : > { %v1187_v43 = vpop.f32.mrf.mxu1 }
 0x2d9   : > { %v5248_v44 = vpop.f32.mrf.mxu1 }
 0x2db   : > { %v1197_v51 = vpop.f32.mrf.mxu1 }
 0x2dd   : > { %v5251_v53 = vpop.f32.mrf.mxu1 }
 0x2df   : > { %v1207_v54 = vpop.f32.mrf.mxu1 }
 0x2e1   : > { %v5254_v45 = vpop.f32.mrf.mxu1 }
 0x2e3   : > { %v1217_v50 = vpop.f32.mrf.mxu1 }
 0x2e5   : > { %v5257_v52 = vpop.f32.mrf.mxu1 }
 0x2e6   : > { %5258 = vmatprep.subr.msk.mxu0 %vm1269_vm4, %v5257_v52 }
 0x2e7   : > { %v1227_v56 = vpop.f32.mrf.mxu1  ;;  %5259 = vmatpush3.msk.msra.mxu0 %vm1269_vm4, %v5257_v52  ;;  %v1661_v52 = vld [vmem:[#allocation8 + $0x138] sm:$0xff] }
 0x2e8   : > { %5260 = vmatprep.subr.mxu0 %v1227_v56 }
 0x2e9   : > { %5261 = vmatpush3.msra.mxu0 %v1227_v56  ;;  %v1660_v56 = vld [vmem:[#allocation8 + $0x130] sm:$0xff] }
 0x2ea   : > { %5262 = vmatprep.subr.mxu0 %v5254_v45 }
 0x2eb   : > { %5263 = vmatpush3.msra.mxu0 %v5254_v45  ;;  %v1662_v45 = vld [vmem:[#allocation8 + $0x140] sm:$0xff] }
 0x2ec   : > { %5264 = vmatprep.subr.mxu0 %v1217_v50 }
 0x2ed   : > { %5265 = vmatpush3.msra.mxu0 %v1217_v50 }
 0x2ee   : > { %5266 = vmatprep.subr.mxu0 %v5251_v53 }
 0x2ef   : > { %5267 = vmatpush3.msra.mxu0 %v5251_v53  ;;  %v1663_v53 = vld [vmem:[#allocation8 + $0x148] sm:$0xff] }
 0x2f0   : > { %5268 = vmatprep.subr.mxu0 %v1207_v54 }
 0x2f1   : > { %5269 = vmatpush3.msra.mxu0 %v1207_v54 }
 0x2f2   : > { %5270 = vmatprep.subr.mxu0 %v5248_v44 }
 0x2f3   : > { %5271 = vmatpush3.msra.mxu0 %v5248_v44 }
 0x2f4   : > { %5272 = vmatprep.subr.mxu0 %v1197_v51 }
 0x2f5   : > { %5273 = vmatpush3.msra.mxu0 %v1197_v51 }
 0x2f6   : > { %5274 = vmatprep.subr.mxu0 %v5245_v49 }
 0x2f7   : > { %5275 = vmatpush3.msra.mxu0 %v5245_v49 }
 0x2f8   : > { %5276 = vmatprep.subr.mxu0 %v1187_v43 }
 0x2f9   : > { %5277 = vmatpush3.msra.mxu0 %v1187_v43  ;;  %v1664_v43 = vld [vmem:[#allocation8 + $0x150] sm:$0xff] }
 0x2fa   : > { %5278 = vmatprep.subr.mxu0 %v5242_v47 }
 0x2fb   : > { %5279 = vmatpush3.msra.mxu0 %v5242_v47 }
 0x2fc   : > { %5280 = vmatprep.subr.mxu0 %v1177_v48 }
 0x2fd   : > { %5281 = vmatpush3.msra.mxu0 %v1177_v48  ;;  %v1665_v48 = vld [vmem:[#allocation8 + $0x158] sm:$0xff] }
 0x2fe   : > { %5282 = vmatprep.subr.mxu0 %v5239_v33 }
 0x2ff   : > { %5283 = vmatpush3.msra.mxu0 %v5239_v33 }
 0x300   : > { %5284 = vmatprep.subr.mxu0 %v1167_v35 }
 0x301   : > { %5285 = vmatpush3.msra.mxu0 %v1167_v35 }
 0x302   : > { %5286 = vmatprep.subr.mxu0 %v5236_v30 }
 0x303   : > { %5287 = vmatpush3.msra.mxu0 %v5236_v30 }
 0x304   : > { %5288 = vmatprep.subr.mxu0 %v1157_v29 }
 0x305   : > { %5289 = vmatpush3.msra.mxu0 %v1157_v29  ;;  %v1666_v29 = vld [vmem:[#allocation8 + $0x160] sm:$0xff] }
 0x306   : > { %5291 = vmatmul.mubr.msk.f32.vlgmr.msra.gmra.mxu0 %vm1244_vm3, %v1237_v34  ;;  %5346 = vmatprep.subr.mxu0 %v1394_v55  ;;  %v1659_v34 = vld [vmem:[#allocation8 + $0x128] sm:$0xff] }
 0x307   : > { %5293 = vmatprep.mubr.msk.f32.mxu0 %vm1244_vm3, %v1238_v37  ;;  %5347 = vmatpush3.msra.mxu0 %v1394_v55  ;;  %v1658_v55 = vld [vmem:[#allocation8 + $0x120] sm:$0xff]  ;;  %v1657_v37 = vld [vmem:[#allocation8 + $0x118] sm:$0xff] }
 0x308   : > { %5348 = vmatprep.subr.mxu0 %v1393_v59 }
 0x309   : > { %5349 = vmatpush3.msra.mxu0 %v1393_v59  ;;  %v1656_v59 = vld [vmem:[#allocation8 + $0x110] sm:$0xff] }
 0x30a   : > { %5294 = vmatmul.mubr.msk.f32.gmra.mxu0 %vm1244_vm3, %v1239_v60  ;;  %5350 = vmatprep.subr.mxu0 %v1392_v61  ;;  %v1655_v60 = vld [vmem:[#allocation8 + $0x108] sm:$0xff] }
 0x30b   : > { %5296 = vmatprep.mubr.msk.f32.mxu0 %vm1244_vm3, %v1240_v62  ;;  %5351 = vmatpush3.msra.mxu0 %v1392_v61  ;;  %v1654_v62 = vld [vmem:[#allocation8 + $0x100] sm:$0xff] }
 0x30c   : > { %5352 = vmatprep.subr.mxu0 %v1391_v63 }
 0x30d   : > { %5353 = vmatpush3.msra.mxu0 %v1391_v63 }
 0x30e   : > { %5297 = vmatmul.mubr.msk.f32.gmra.mxu0 %vm1244_vm3, %v1241_v0  ;;  %5354 = vmatprep.subr.mxu0 %v1390_v1 }
 0x30f   : > { %5299 = vmatprep.mubr.msk.f32.mxu0 %vm1244_vm3, %v1242_v2  ;;  %5355 = vmatpush3.msra.mxu0 %v1390_v1 }
 0x310   : > { %5356 = vmatprep.subr.mxu0 %v1389_v3 }
 0x311   : > { %5357 = vmatpush3.msra.mxu0 %v1389_v3 }
 0x312   : > { %5300 = vmatmul.mubr.msk.f32.gmra.mxu0 %vm1244_vm3, %v1243_v4  ;;  %5358 = vmatprep.subr.mxu0 %v1388_v20 }
 0x313   : > { %5359 = vmatpush3.msra.mxu0 %v1388_v20 }
 0x314   : > { %5360 = vmatprep.subr.mxu0 %v1387_v38 }
 0x315   : > { %5361 = vmatpush3.msra.mxu0 %v1387_v38 }
 0x316   : > { %5362 = vmatprep.subr.mxu0 %v1386_v46 }
 0x317   : > { %5363 = vmatpush3.msra.mxu0 %v1386_v46 }
 0x318   : > { %5364 = vmatprep.subr.mxu0 %v1385_v5 }
 0x319   : > { %5365 = vmatpush3.msra.mxu0 %v1385_v5 }
 0x31a   : > { %5366 = vmatprep.subr.mxu0 %v1384_v57 }
 0x31b   : > { %5367 = vmatpush3.msra.mxu0 %v1384_v57 }
 0x31c   : > { %5368 = vmatprep.subr.mxu0 %v1383_v58 }
 0x31d   : > { %5369 = vmatpush3.msra.mxu0 %v1383_v58  ;;  %v1925_v58 = vld [vmem:[#allocation13 + $0x78] sm:$0x7f] }
 0x31e   : > { %5370 = vmatprep.subr.mxu0 %v1382_v6 }
 0x31f   : > { %5371 = vmatpush3.msra.mxu0 %v1382_v6  ;;  %v1924_v6 = vld [vmem:[#allocation13 + $0x70] sm:$0xff] }
 0x320   : > { %5372 = vmatprep.subr.mxu0 %v1381_v7 }
 0x321   : > { %5373 = vmatpush3.msra.mxu0 %v1381_v7  ;;  %v1923_v7 = vld [vmem:[#allocation13 + $0x68] sm:$0xff] }
 0x322   : > { %5374 = vmatprep.subr.mxu0 %v1380_v9 }
 0x323   : > { %5375 = vmatpush3.msra.mxu0 %v1380_v9  ;;  %v1922_v9 = vld [vmem:[#allocation13 + $0x60] sm:$0xff] }
 0x324   : > { %5376 = vmatprep.subr.mxu0 %v1379_v40 }
 0x325   : > { %5377 = vmatpush3.msra.mxu0 %v1379_v40  ;;  %v1920_v40 = vld [vmem:[#allocation13 + $0x50] sm:$0xff] }
 0x326   : > { %5434 = vmatprep.subr.msk.mxu0 %vm259_vm0, %v1925_v58 }
 0x3c6   : > { %v6231_v15 = vpop.f32.mrf.mxu0 }
 0x3c7   : > { %v1421_v17 = vrot.slane %v6231_v15, 1  ;;  %v1671_v54 = vrot.slane %v6231_v15, 2 }
 0x3c8   : > { %v1339_v16 = vpop.f32.mrf.mxu0 }
 0x3c9   : > { %v1420_v18 = vrot.slane %v1339_v16, 1  ;;  %5378 = vmatprep.mubr.f32.mxu0 %v1339_v16  ;;  %v1670_v51 = vrot.slane %v1339_v16, 2  ;;  %v1913_v16 = vld [vmem:[#allocation13 + $0x18] sm:$0xff] }
 0x3ca   : > { %v6234_v19 = vpop.f32.mrf.mxu0  ;;  %5379 = vmatmul.mubr.f32.vlgmr.msra.gmra.mxu0 %v6231_v15  ;;  %v1914_v15 = vld [vmem:[#allocation13 + $0x20] sm:$0xff] }
 0x3cb   : > { %v1422_v28 = vsel %vm259_vm0, %v1420_v18, %v1421_v17  ;;  %v1425_v22 = vrot.slane %v6234_v19, 1  ;;  %v1672_v50 = vsel %vm614_vm1, %v1670_v51, %v1671_v54  ;;  %v1675_v63 = vrot.slane %v6234_v19, 2  ;;  %5435 = vmatpush3.msk.msra.mxu0 %vm259_vm0, %v1925_v58 }
 0x3cc   : > { %v6238_v21 = vpop.f32.mrf.mxu0  ;;  %5334 = vmatprep.mubr.f32.mxu1 %v1422_v28  ;;  %5436 = vmatprep.subr.mxu0 %v1924_v6 }
 0x3cd   : > { %v1423_v23 = vrot.slane %v6238_v21, 1  ;;  %5381 = vmatprep.mubr.f32.mxu0 %v6238_v21  ;;  %v1673_v61 = vrot.slane %v6238_v21, 2  ;;  %5437 = vmatpush3.msra.mxu0 %v1924_v6 }
 0x3ce   : > { %v6243_v41 = vpop.f32.mrf.mxu0  ;;  %5382 = vmatmul.mubr.f32.gmra.mxu0 %v6234_v19  ;;  %5438 = vmatprep.subr.mxu0 %v1923_v7 }
 0x3cf   : > { %v1429_v24 = vrot.slane %v6243_v41, 1  ;;  %v1424_v25 = vsel %vm259_vm0, %v1421_v17, %v1423_v23  ;;  %v1426_v26 = vsel %vm259_vm0, %v1423_v23, %v1425_v22  ;;  %v1674_v1 = vsel %vm614_vm1, %v1671_v54, %v1673_v61  ;;  %5439 = vmatpush3.msra.mxu0 %v1923_v7 }
 0x3d0   : > { %v6249_v31 = vpop.f32.mrf.mxu0  ;;  %5335 = vmatmul.mubr.f32.vlgmr.msra.gmra.mxu1 %v1424_v25  ;;  %v1679_v2 = vrot.slane %v6243_v41, 2  ;;  %v1676_v3 = vsel %vm614_vm1, %v1673_v61, %v1675_v63  ;;  %5440 = vmatprep.subr.mxu0 %v1922_v9 }
 0x3d1   : > { %v1427_v36 = vrot.slane %v6249_v31, 1  ;;  %5391 = vmatpush3.msra.mxu1 %v1669_v13  ;;  %5337 = vmatprep.mubr.f32.mxu1 %v1426_v26  ;;  %v1677_v0 = vrot.slane %v6249_v31, 2  ;;  %v1916_v13 = vld [vmem:[#allocation13 + $0x30] sm:$0xff] }
 0x3d2   : > { %5392 = vmatprep.subr.mxu1 %v1668_v27  ;;  %v6252_v42 = vpop.f32.mrf.mxu0  ;;  %5384 = vmatprep.mubr.f32.mxu0 %v6249_v31 }
 0x3d3   : > { %v1433_v32 = vrot.slane %v6252_v42, 1  ;;  %5393 = vmatpush3.msra.mxu1 %v1668_v27  ;;  %v1428_v30 = vsel %vm259_vm0, %v1425_v22, %v1427_v36  ;;  %v1430_v33 = vsel %vm259_vm0, %v1427_v36, %v1429_v24  ;;  %5385 = vmatmul.mubr.f32.gmra.mxu0 %v6243_v41  ;;  %v1678_v20 = vsel %vm614_vm1, %v1675_v63, %v1677_v0 }
 0x3d4   : > { %5394 = vmatprep.subr.mxu1 %v1667_v39  ;;  %v6259_v35 = vpop.f32.mrf.mxu0  ;;  %5338 = vmatmul.mubr.f32.gmra.mxu1 %v1428_v30  ;;  %v1683_v38 = vrot.slane %v6252_v42, 2  ;;  %v1680_v46 = vsel %vm614_vm1, %v1677_v0, %v1679_v2 }
 0x3d5   : > { %v1431_v47 = vrot.slane %v6259_v35, 1  ;;  %5395 = vmatpush3.msra.mxu1 %v1667_v39  ;;  %5340 = vmatprep.mubr.f32.mxu1 %v1430_v33  ;;  %v1681_v4 = vrot.slane %v6259_v35, 2 }
 0x3d6   : > { %5396 = vmatprep.subr.mxu1 %v1666_v29  ;;  %5387 = vmatprep.mubr.f32.mxu0 %v6259_v35  ;;  %v1912_v35 = vld [vmem:[#allocation13 + $0x10] sm:$0xff] }
 0x3d7   : > { %5397 = vmatpush3.msra.mxu1 %v1666_v29  ;;  %v1432_v49 = vsel %vm259_vm0, %v1429_v24, %v1431_v47  ;;  %v1434_v44 = vsel %vm259_vm0, %v1431_v47, %v1433_v32  ;;  %5388 = vmatmul.mubr.f32.gmra.mxu0 %v6252_v42  ;;  %v1682_v5 = vsel %vm614_vm1, %v1679_v2, %v1681_v4  ;;  %v1813_v42 = vpop.permute.xlu1 %1812 }
 0x3d8   : > { %5398 = vmatprep.subr.mxu1 %v1665_v48  ;;  %5341 = vmatmul.mubr.f32.gmra.mxu1 %v1432_v49  ;;  %v1684_v57 = vsel %vm614_vm1, %v1681_v4, %v1683_v38 }
 0x3d9   : > { %5399 = vmatpush3.msra.mxu1 %v1665_v48  ;;  %5343 = vmatprep.mubr.f32.mxu1 %v1434_v44 }
 0x3da   : > { %5400 = vmatprep.subr.mxu1 %v1664_v43  ;;  %5441 = vmatpush3.msra.mxu0 %v1922_v9 }
 0x3db   : > { %5401 = vmatpush3.msra.mxu1 %v1664_v43  ;;  %5442 = vmatprep.subr.mxu0 %v1921_v8  ;;  %v1911_v43 = vld [vmem:[#allocation13 + $0x8] sm:$0xff] }
 0x3dc   : > { %5402 = vmatprep.subr.mxu1 %v1663_v53  ;;  %5344 = vmatmul.mubr.f32.gmra.mxu1 %v1433_v32 }
 0x3dd   : > { %5403 = vmatpush3.msra.mxu1 %v1663_v53  ;;  %5422 = vmatprep.mubr.f32.mxu1 %v1672_v50 }
 0x3de   : > { %5404 = vmatprep.subr.mxu1 %v1662_v45  ;;  %5443 = vmatpush3.msra.mxu0 %v1921_v8 }
 0x3df   : > { %5405 = vmatpush3.msra.mxu1 %v1662_v45  ;;  %5444 = vmatprep.subr.mxu0 %v1920_v40 }
 0x3e0   : > { %5406 = vmatprep.subr.mxu1 %v1661_v52  ;;  %5445 = vmatpush3.msra.mxu0 %v1920_v40 }
 0x3e1   : > { %5407 = vmatpush3.msra.mxu1 %v1661_v52  ;;  %5446 = vmatprep.subr.mxu0 %v1919_v10 }
 0x3e2   : > { %5408 = vmatprep.subr.mxu1 %v1660_v56  ;;  %5447 = vmatpush3.msra.mxu0 %v1919_v10 }
 0x3e3   : > { %5409 = vmatpush3.msra.mxu1 %v1660_v56  ;;  %5448 = vmatprep.subr.mxu0 %v1918_v11  ;;  %v1910_v56 = vld [vmem:[#allocation13] sm:$0xff] }
 0x3e4   : > { %5410 = vmatprep.subr.mxu1 %v1659_v34  ;;  %5449 = vmatpush3.msra.mxu0 %v1918_v11 }
 0x3e5   : > { %5411 = vmatpush3.msra.mxu1 %v1659_v34  ;;  %5450 = vmatprep.subr.mxu0 %v1917_v12 }
 0x3e6   : > { %5412 = vmatprep.subr.mxu1 %v1658_v55  ;;  %5451 = vmatpush3.msra.mxu0 %v1917_v12 }
 0x3e7   : > { %5413 = vmatpush3.msra.mxu1 %v1658_v55  ;;  %5452 = vmatprep.subr.mxu0 %v1916_v13 }
 0x3e8   : > { %5414 = vmatprep.subr.mxu1 %v1657_v37  ;;  %5453 = vmatpush3.msra.mxu0 %v1916_v13 }
 0x3e9   : > { %5415 = vmatpush3.msra.mxu1 %v1657_v37  ;;  %5454 = vmatprep.subr.mxu0 %v1915_v14 }
 0x3ea   : > { %5416 = vmatprep.subr.mxu1 %v1656_v59  ;;  %5455 = vmatpush3.msra.mxu0 %v1915_v14 }
 0x3eb   : > { %5417 = vmatpush3.msra.mxu1 %v1656_v59  ;;  %5456 = vmatprep.subr.mxu0 %v1914_v15 }
 0x3ec   : > { %5418 = vmatprep.subr.mxu1 %v1655_v60  ;;  %5457 = vmatpush3.msra.mxu0 %v1914_v15 }
 0x3ed   : > { %5419 = vmatpush3.msra.mxu1 %v1655_v60  ;;  %5458 = vmatprep.subr.mxu0 %v1913_v16 }
 0x3ee   : > { %5420 = vmatprep.subr.mxu1 %v1654_v62  ;;  %5459 = vmatpush3.msra.mxu0 %v1913_v16 }
 0x3ef   : > { %5421 = vmatpush3.msra.mxu1 %v1654_v62  ;;  %5460 = vmatprep.subr.mxu0 %v1912_v35 }
 0x3f0   : > { %5423 = vmatmul.mubr.f32.vlgmr.msra.gmra.mxu1 %v1674_v1  ;;  %5461 = vmatpush3.msra.mxu0 %v1912_v35 }
 0x3f1   : > { %5425 = vmatprep.mubr.f32.mxu1 %v1676_v3  ;;  %5462 = vmatprep.subr.mxu0 %v1911_v43 }
 0x3f2   : > { %5463 = vmatpush3.msra.mxu0 %v1911_v43 }
 0x3f3   : > { %5464 = vmatprep.subr.mxu0 %v1910_v56 }
 0x3f4   : > { %5426 = vmatmul.mubr.f32.gmra.mxu1 %v1678_v20  ;;  %5465 = vmatpush3.msra.mxu0 %v1910_v56 }
 0x3f5   : > { %5428 = vmatprep.mubr.f32.mxu1 %v1680_v46 }
 0x3f8   : > { %5429 = vmatmul.mubr.f32.gmra.mxu1 %v1682_v5 }
 0x3f9   : > { %5431 = vmatprep.mubr.f32.mxu1 %v1684_v57 }
 0x3fc   : > { %5432 = vmatmul.mubr.f32.gmra.mxu1 %v1683_v38 }
 0x48a   : > { %v5380_v28 = vpop.f32.mrf.mxu0 }
 0x48c   : > { %v1614_v23 = vpop.f32.mrf.mxu0 }
 0x48e   : > { %v5383_v24 = vpop.f32.mrf.mxu0 }
 0x490   : > { %v5336_v17 = vpop.f32.mrf.mxu1  ;;  %v1624_v26 = vpop.f32.mrf.mxu0 }
 0x491   : > { %v1620_v36 = vadd.f32 %v5380_v28, %v5336_v17 }
 0x492   : > { %v1509_v18 = vpop.f32.mrf.mxu1 }
 0x493   : > { %v5386_v27 = vpop.f32.mrf.mxu0  ;;  %v1615_v32 = vadd.f32 %v1614_v23, %v1509_v18 }
 0x494   : > { %v5339_v19 = vpop.f32.mrf.mxu1 }
 0x495   : > { %v1634_v30 = vpop.f32.mrf.mxu0  ;;  %v1630_v47 = vadd.f32 %v5383_v24, %v5339_v19 }
 0x496   : > { %v1519_v21 = vpop.f32.mrf.mxu1 }
 0x497   : > { %v1625_v51 = vadd.f32 %v1624_v26, %v1519_v21  ;;  %v5389_v53 = vpop.f32.mrf.mxu0 }
 0x498   : > { %v5342_v22 = vpop.f32.mrf.mxu1 }
 0x499   : > { %v1640_v34 = vadd.f32 %v5386_v27, %v5342_v22  ;;  %v1644_v62 = vpop.f32.mrf.mxu0 }
 0x49a   : > { %v1529_v41 = vpop.f32.mrf.mxu1 }
 0x49b   : > { %v1635_v61 = vadd.f32 %v1634_v30, %v1529_v41 }
 0x49c   : > { %v5345_v25 = vpop.f32.mrf.mxu1 }
 0x49d   : > { %v1650_v20 = vadd.f32 %v5389_v53, %v5345_v25 }
 0x49e   : > { %v1539_v31 = vpop.f32.mrf.mxu1 }
 0x49f   : > { %v1645_v57 = vadd.f32 %v1644_v62, %v1539_v31 }
 0x4b0   : > { %v5424_v39 = vpop.f32.mrf.mxu1 }
 0x4b1   : > { %v1799_v29 = vadd.f32 %v5424_v39, %v1620_v36 }
 0x4b2   : > { %v1759_v33 = vpop.f32.mrf.mxu1 }
 0x4b3   : > { %v1798_v48 = vadd.f32 %v1759_v33, %v1615_v32  ;;  %v1816_v49 = vadd.f32 %v1813_v42, %v1799_v29 }
 0x4b4   : > { %v5427_v44 = vpop.f32.mrf.mxu1 }
 0x4b5   : > { %v1815_v54 = vadd.f32 %v1813_v42, %v1798_v48  ;;  %v1801_v45 = vadd.f32 %v5427_v44, %v1630_v47  ;;  %v1824_v52 = vmax.f32 %v1816_v49, 0.0 }
 0x4b6   : > { %v1769_v50 = vpop.f32.mrf.mxu1 }
 0x4b7   : > { %v1823_v55 = vmax.f32 %v1815_v54, 0.0  ;;  %v1818_v37 = vadd.f32 %v1813_v42, %v1801_v45  ;;  %v1800_v59 = vadd.f32 %v1769_v50, %v1625_v51  ;;  %v1840_v4 = vrot.slane %v1824_v52, 1 }
 0x4b8   : > { %v5430_v60 = vpop.f32.mrf.mxu1 }
 0x4b9   : > { %v1839_v63 = vrot.slane %v1823_v55, 1  ;;  %v1817_v0 = vadd.f32 %v1813_v42, %v1800_v59  ;;  %v1803_v1 = vadd.f32 %v5430_v60, %v1640_v34  ;;  %v1826_v2 = vmax.f32 %v1818_v37, 0.0  ;;  %v2058_v37 = vld [vmem:[#allocation14] sm:$0xff] }
 0x4ba   : > { %v1779_v3 = vpop.f32.mrf.mxu1  ;;  %5494 = vmatprep.mubr.msk.f32.mxu1 %vm2062_vm5, %v2058_v37  ;;  %v2383_v37 = vld [vmem:[#allocation16 + $0x240] sm:$0xff] (%p187_p8) }
 0x4bb   : > { %v1825_v38 = vmax.f32 %v1817_v0, 0.0  ;;  %v1820_v46 = vadd.f32 %v1813_v42, %v1803_v1  ;;  %v1802_v5 = vadd.f32 %v1779_v3, %v1635_v61  ;;  %v1841_v6 = vsel %vm259_vm0, %v1839_v63, %v1840_v4  ;;  %v2059_v3 = vld [vmem:[#allocation14 + $0x8] sm:$0xff] }
 0x4bc   : > { %v5433_v58 = vpop.f32.mrf.mxu1  ;;  %v1844_v10 = vrot.slane %v1826_v2, 1  ;;  %v1862_v11 = vmax.f32 %v1823_v55, %v1841_v6  ;;  %v2341_v6 = vld [vmem:[#allocation16 + $0xf0] sm:$0xff] (%p187_p8) }
 0x4bd   : > { %v1842_v7 = vrot.slane %v1825_v38, 1  ;;  %v1828_v9 = vmax.f32 %v1820_v46, 0.0  ;;  %v1819_v8 = vadd.f32 %v1813_v42, %v1802_v5  ;;  %v1805_v40 = vadd.f32 %v5433_v58, %v1650_v20  ;;  %v2061_v20 = vld [vmem:[#allocation14 + $0x18] sm:$0x3f] }
 0x4be   : > { %v1789_v12 = vpop.f32.mrf.mxu1  ;;  %1878 = vrot.lane.b32.xlu0 %v1862_v11, %s5815_s20  ;;  %v2342_v58 = vld [vmem:[#allocation16 + $0xf8] sm:$0xff] (%p187_p8) }
 0x4bf   : > { %v1827_v13 = vmax.f32 %v1819_v8, 0.0  ;;  %v1822_v14 = vadd.f32 %v1813_v42, %v1805_v40  ;;  %v1804_v15 = vadd.f32 %v1789_v12, %v1645_v57  ;;  %v1848_v16 = vrot.slane %v1828_v9, 1  ;;  %3283 = vmatprep.subr.mxu0 (%p187_p8), %v2342_v58  ;;  %v2339_v8 = vld [vmem:[#allocation16 + $0xe0] sm:$0xff] (%p187_p8)  ;;  %v2405_v40 = vld [vmem:[#allocation16 + $0x2f0] sm:$0xff] (%p187_p8) }
 0x4c0   : > { %v1845_v17 = vsel %vm259_vm0, %v1842_v7, %v1844_v10  ;;  %v1843_v18 = vsel %vm259_vm0, %v1840_v4, %v1842_v7  ;;  %v2060_v4 = vld [vmem:[#allocation14 + $0x10] sm:$0xff]  ;;  %v2340_v7 = vld [vmem:[#allocation16 + $0xe8] sm:$0xff] (%p187_p8)  ;;  %v2375_v58 = vld [vmem:[#allocation16 + $0x200] sm:$0xff] (%p187_p8) }
 0x4c1   : > { %v1846_v19 = vrot.slane %v1827_v13, 1  ;;  %v1830_v28 = vmax.f32 %v1822_v14, 0.0  ;;  %v1821_v21 = vadd.f32 %v1813_v42, %v1804_v15  ;;  %v1864_v22 = vmax.f32 %v1825_v38, %v1845_v17  ;;  %v2337_v12 = vld [vmem:[#allocation16 + $0xd0] sm:$0xff] (%p187_p8)  ;;  %v2402_v14 = vld [vmem:[#allocation16 + $0x2d8] sm:$0xff] (%p187_p8)  ;;  %v2336_v15 = vld [vmem:[#allocation16 + $0xc8] sm:$0xff] (%p187_p8) }
 0x4c2   : > { %v1863_v23 = vmax.f32 %v1824_v52, %v1843_v18  ;;  %v2335_v17 = vld [vmem:[#allocation16 + $0xc0] sm:$0xff] (%p187_p8)  ;;  %v2400_v18 = vld [vmem:[#allocation16 + $0x2c8] sm:$0xff] (%p187_p8) }
 0x4c3   : > { %v1829_v41 = vmax.f32 %v1821_v21, 0.0  ;;  %v1849_v24 = vsel %vm259_vm0, %v1846_v19, %v1848_v16  ;;  %v1847_v25 = vsel %vm259_vm0, %v1844_v10, %v1846_v19  ;;  %1882 = vrot.lane.b32.xlu0 %v1864_v22, %s5815_s20  ;;  %v1852_v31 = vrot.slane %v1830_v28, 1  ;;  %v2338_v10 = vld [vmem:[#allocation16 + $0xd8] sm:$0xff] (%p187_p8)  ;;  %v2333_v21 = vld [vmem:[#allocation16 + $0xb0] sm:$0xff] (%p187_p8) }
 0x4c4   : > { %1880 = vrot.lane.b32.xlu1 %v1863_v23, %s5815_s20  ;;  %v1866_v26 = vmax.f32 %v1827_v13, %v1849_v24  ;;  %v1865_v27 = vmax.f32 %v1826_v2, %v1847_v25  ;;  %v2403_v13 = vld [vmem:[#allocation16 + $0x2e0] sm:$0xff] (%p187_p8)  ;;  %v2334_v19 = vld [vmem:[#allocation16 + $0xb8] sm:$0xff] (%p187_p8)  ;;  %v2396_v25 = vld [vmem:[#allocation16 + $0x2a8] sm:$0xff] (%p187_p8) }
 0x4c5   : > { %v1850_v36 = vrot.slane %v1829_v41, 1  ;;  %v1869_v29 = vmax.f32 %v1830_v28, %v1852_v31  ;;  %v2399_v28 = vld [vmem:[#allocation16 + $0x2c0] sm:$0xff] (%p187_p8) }
 0x4c6   :  { %v2331_v24 = vld [vmem:[#allocation16 + $0xa0] sm:$0xff] (%p187_p8) }
 0x4c7   : > { %v1853_v39 = vsel %vm259_vm0, %v1850_v36, %v1852_v31  ;;  %v1851_v32 = vsel %vm259_vm0, %v1848_v16, %v1850_v36  ;;  %1886 = vrot.lane.b32.xlu0 %v1866_v26, %s5815_s20  ;;  %v2401_v16 = vld [vmem:[#allocation16 + $0x2d0] sm:$0xff] (%p187_p8)  ;;  %v2394_v36 = vld [vmem:[#allocation16 + $0x298] sm:$0xff] (%p187_p8) }
 0x4c8   : > { %1884 = vrot.lane.b32.xlu1 %v1865_v27, %s5815_s20  ;;  %v1868_v42 = vmax.f32 %v1829_v41, %v1853_v39  ;;  %v1867_v30 = vmax.f32 %v1828_v9, %v1851_v32  ;;  %v2406_v9 = vld [vmem:[#allocation16 + $0x2f8] sm:$0xff] (%p187_p8)  ;;  %v2397_v41 = vld [vmem:[#allocation16 + $0x2b0] sm:$0xff] (%p187_p8)  ;;  %v2328_v39 = vld [vmem:[#allocation16 + $0x88] sm:$0xff] (%p187_p8) }
 0x4c9   :  { %v2329_v31 = vld [vmem:[#allocation16 + $0x90] sm:$0xff] (%p187_p8) }
 0x4ca   :  { %v2393_v32 = vld [vmem:[#allocation16 + $0x290] sm:$0xff] (%p187_p8) }
 0x4cb   : > { %1890 = vrot.lane.b32.xlu0 %v1868_v42, %s5815_s20 }
 0x4cc   : > { %1888 = vrot.lane.b32.xlu1 %v1867_v30, %s5815_s20 }
 0x4d0   : > { %1892 = vrot.lane.b32.xlu1 %v1869_v29, %s5815_s20 }
 0x530   : > { %v1879_v33 = vpop.permute.xlu0 %1878 }
 0x531   : > { %v1902_v35 = vmax.f32 %v1862_v11, %v1879_v33  ;;  %v2404_v11 = vld [vmem:[#allocation16 + $0x2e8] sm:$0xff] (%p187_p8)  ;;  %v2391_v33 = vld [vmem:[#allocation16 + $0x280] sm:$0xff] (%p187_p8) }
 0x533   : > { %5466 = vmatprep.mubr.msk.f32.mxu0 %vm1039_vm2, %v1902_v35  ;;  %v2325_v35 = vld [vmem:[#allocation16 + $0x70] sm:$0xff] (%p187_p8) }
 0x535   : > { %v1883_v47 = vpop.permute.xlu0 %1882 }
 0x536   : > { %v1881_v48 = vpop.permute.xlu1 %1880  ;;  %v1904_v49 = vmax.f32 %v1864_v22, %v1883_v47  ;;  %v2398_v22 = vld [vmem:[#allocation16 + $0x2b8] sm:$0xff] (%p187_p8) }
 0x537   : > { %v1903_v43 = vmax.f32 %v1863_v23, %v1881_v48  ;;  %v2332_v23 = vld [vmem:[#allocation16 + $0xa8] sm:$0xff] (%p187_p8)  ;;  %v2390_v47 = vld [vmem:[#allocation16 + $0x278] sm:$0xff] (%p187_p8) }
 0x538   :  { %v2324_v48 = vld [vmem:[#allocation16 + $0x68] sm:$0xff] (%p187_p8) }
 0x539   : > { %5467 = vmatmul.mubr.msk.f32.vlgmr.msra.gmra.mxu0 %vm1039_vm2, %v1903_v43  ;;  %v1887_v44 = vpop.permute.xlu0 %1886  ;;  %v2323_v43 = vld [vmem:[#allocation16 + $0x60] sm:$0xff] (%p187_p8) }
 0x53a   : > { %5469 = vmatprep.mubr.msk.f32.mxu0 %vm1039_vm2, %v1904_v49  ;;  %v1885_v51 = vpop.permute.xlu1 %1884  ;;  %v1906_v53 = vmax.f32 %v1866_v26, %v1887_v44  ;;  %3284 = vmatpush1.msra.mxu0 (%p187_p8), %v2341_v6  ;;  %v2330_v26 = vld [vmem:[#allocation16 + $0x98] sm:$0xff] (%p187_p8)  ;;  %v2389_v49 = vld [vmem:[#allocation16 + $0x270] sm:$0xff] (%p187_p8)  ;;  %v2388_v44 = vld [vmem:[#allocation16 + $0x268] sm:$0xff] (%p187_p8) }
 0x53b   : > { %v1905_v54 = vmax.f32 %v1865_v27, %v1885_v51  ;;  %3285 = vmatprep.subr.mxu0 (%p187_p8), %v2340_v7  ;;  %v2395_v27 = vld [vmem:[#allocation16 + $0x2a0] sm:$0xff] (%p187_p8)  ;;  %v2322_v51 = vld [vmem:[#allocation16 + $0x58] sm:$0xff] (%p187_p8)  ;;  %v2373_v6 = vld [vmem:[#allocation16 + $0x1f0] sm:$0xff] (%p187_p8) }
 0x53c   :  { %3286 = vmatpush1.msra.mxu0 (%p187_p8), %v2339_v8  ;;  %v2438_v7 = vld [vmem:[#allocation16 + $0x3f8] sm:$0xff] (%p187_p8)  ;;  %v2437_v8 = vld [vmem:[#allocation16 + $0x3f0] sm:$0xff] (%p187_p8) }
 0x53d   : > { %5470 = vmatmul.mubr.msk.f32.gmra.mxu0 %vm1039_vm2, %v1905_v54  ;;  %v1891_v45 = vpop.permute.xlu0 %1890  ;;  %3287 = vmatprep.subr.mxu0 (%p187_p8), %v2338_v10  ;;  %v2321_v54 = vld [vmem:[#allocation16 + $0x50] sm:$0xff] (%p187_p8)  ;;  %v2436_v10 = vld [vmem:[#allocation16 + $0x3e8] sm:$0xff] (%p187_p8) }
 0x53e   : > { %5472 = vmatprep.mubr.msk.f32.mxu0 %vm1039_vm2, %v1906_v53  ;;  %v1889_v50 = vpop.permute.xlu1 %1888  ;;  %v1908_v52 = vmax.f32 %v1868_v42, %v1891_v45  ;;  %3288 = vmatpush1.msra.mxu0 (%p187_p8), %v2337_v12  ;;  %v2327_v42 = vld [vmem:[#allocation16 + $0x80] sm:$0xff] (%p187_p8)  ;;  %v2386_v45 = vld [vmem:[#allocation16 + $0x258] sm:$0xff] (%p187_p8) }
 0x53f   : > { %v1907_v56 = vmax.f32 %v1867_v30, %v1889_v50  ;;  %3289 = vmatprep.subr.mxu0 (%p187_p8), %v2336_v15  ;;  %v2392_v30 = vld [vmem:[#allocation16 + $0x288] sm:$0xff] (%p187_p8)  ;;  %v2387_v53 = vld [vmem:[#allocation16 + $0x260] sm:$0xff] (%p187_p8) }
 0x540   :  { %3290 = vmatpush1.msra.mxu0 (%p187_p8), %v2335_v17  ;;  %v2320_v50 = vld [vmem:[#allocation16 + $0x48] sm:$0xff] (%p187_p8)  ;;  %v2435_v12 = vld [vmem:[#allocation16 + $0x3e0] sm:$0xff] (%p187_p8) }
 0x541   : > { %5473 = vmatmul.mubr.msk.f32.gmra.mxu0 %vm1039_vm2, %v1907_v56  ;;  %3291 = vmatprep.subr.mxu0 (%p187_p8), %v2334_v19  ;;  %v2319_v56 = vld [vmem:[#allocation16 + $0x40] sm:$0xff] (%p187_p8)  ;;  %v2368_v15 = vld [vmem:[#allocation16 + $0x1c8] sm:$0xff] (%p187_p8)  ;;  %v2366_v19 = vld [vmem:[#allocation16 + $0x1b8] sm:$0xff] (%p187_p8) }
 0x542   : > { %5475 = vmatprep.mubr.msk.f32.mxu0 %vm1039_vm2, %v1908_v52  ;;  %v1893_v34 = vpop.permute.xlu1 %1892  ;;  %3292 = vmatpush1.msra.mxu0 (%p187_p8), %v2333_v21  ;;  %v2385_v52 = vld [vmem:[#allocation16 + $0x250] sm:$0xff] (%p187_p8)  ;;  %v2367_v17 = vld [vmem:[#allocation16 + $0x1c0] sm:$0xff] (%p187_p8) }
 0x543   : > { %v1909_v55 = vmax.f32 %v1869_v29, %v1893_v34  ;;  %3293 = vmatprep.subr.mxu0 (%p187_p8), %v2332_v23  ;;  %v2326_v29 = vld [vmem:[#allocation16 + $0x78] sm:$0xff] (%p187_p8)  ;;  %v2384_v34 = vld [vmem:[#allocation16 + $0x248] sm:$0xff] (%p187_p8)  ;;  %v2365_v21 = vld [vmem:[#allocation16 + $0x1b0] sm:$0xff] (%p187_p8) }
 0x544   :  { %3294 = vmatpush1.msra.mxu0 (%p187_p8), %v2331_v24  ;;  %v2364_v23 = vld [vmem:[#allocation16 + $0x1a8] sm:$0xff] (%p187_p8)  ;;  %v2363_v24 = vld [vmem:[#allocation16 + $0x1a0] sm:$0xff] (%p187_p8) }
 0x545   : > { %5476 = vmatmul.mubr.msk.f32.gmra.mxu0 %vm1039_vm2, %v1909_v55  ;;  %3295 = vmatprep.subr.mxu0 (%p187_p8), %v2330_v26  ;;  %v2318_v55 = vld [vmem:[#allocation16 + $0x38] sm:$0xff] (%p187_p8) }
 0x546   :  { %3296 = vmatpush1.msra.mxu0 (%p187_p8), %v2329_v31  ;;  %v2362_v26 = vld [vmem:[#allocation16 + $0x198] sm:$0xff] (%p187_p8)  ;;  %v2361_v31 = vld [vmem:[#allocation16 + $0x190] sm:$0xff] (%p187_p8) }
 0x547   :  { %3297 = vmatprep.subr.mxu0 (%p187_p8), %v2328_v39  ;;  %v2360_v39 = vld [vmem:[#allocation16 + $0x188] sm:$0xff] (%p187_p8) }
 0x548   :  { %3298 = vmatpush1.msra.mxu0 (%p187_p8), %v2327_v42  ;;  %v2359_v42 = vld [vmem:[#allocation16 + $0x180] sm:$0xff] (%p187_p8) }
 0x549   :  { %3299 = vmatprep.subr.mxu0 (%p187_p8), %v2326_v29  ;;  %v2358_v29 = vld [vmem:[#allocation16 + $0x178] sm:$0xff] (%p187_p8) }
 0x54a   :  { %3300 = vmatpush1.msra.mxu0 (%p187_p8), %v2325_v35  ;;  %v2357_v35 = vld [vmem:[#allocation16 + $0x170] sm:$0xff] (%p187_p8) }
 0x54b   :  { %3301 = vmatprep.subr.mxu0 (%p187_p8), %v2324_v48  ;;  %v2356_v48 = vld [vmem:[#allocation16 + $0x168] sm:$0xff] (%p187_p8) }
 0x54c   :  { %3302 = vmatpush1.msra.mxu0 (%p187_p8), %v2323_v43  ;;  %v2355_v43 = vld [vmem:[#allocation16 + $0x160] sm:$0xff] (%p187_p8) }
 0x54d   :  { %3303 = vmatprep.subr.mxu0 (%p187_p8), %v2322_v51  ;;  %v2354_v51 = vld [vmem:[#allocation16 + $0x158] sm:$0xff] (%p187_p8) }
 0x54e   :  { %3304 = vmatpush1.msra.mxu0 (%p187_p8), %v2321_v54  ;;  %v2353_v54 = vld [vmem:[#allocation16 + $0x150] sm:$0xff] (%p187_p8) }
 0x54f   :  { %3305 = vmatprep.subr.mxu0 (%p187_p8), %v2320_v50  ;;  %v2352_v50 = vld [vmem:[#allocation16 + $0x148] sm:$0xff] (%p187_p8) }
 0x550   :  { %3306 = vmatpush1.msra.mxu0 (%p187_p8), %v2319_v56  ;;  %v2351_v56 = vld [vmem:[#allocation16 + $0x140] sm:$0xff] (%p187_p8) }
 0x551   :  { %3307 = vmatprep.subr.mxu0 (%p187_p8), %v2318_v55  ;;  %v2350_v55 = vld [vmem:[#allocation16 + $0x138] sm:$0xff] (%p187_p8) }
 0x5f9   : > { %v5468_v59 = vpop.f32.mrf.mxu0 }
 0x5fb   : > { %v2019_v60 = vpop.f32.mrf.mxu0 }
 0x5fd   : > { %v5471_v61 = vpop.f32.mrf.mxu0 }
 0x5ff   : > { %v2029_v62 = vpop.f32.mrf.mxu0 }
 0x601   : > { %v5474_v63 = vpop.f32.mrf.mxu0 }
 0x603   : > { %v2039_v0 = vpop.f32.mrf.mxu0 }
 0x605   : > { %v5477_v1 = vpop.f32.mrf.mxu0 }
 0x606   : > { %5478 = vmatprep.subr.msk.mxu1 %vm1269_vm4, %v5477_v1 }
 0x607   : > { %v2049_v2 = vpop.f32.mrf.mxu0  ;;  %5479 = vmatpush3.msk.msra.mxu1 %vm1269_vm4, %v5477_v1  ;;  %v2314_v1 = vld [vmem:[#allocation16 + $0x18] sm:$0xff] (%p187_p8) }
 0x608   : > { %5480 = vmatprep.subr.mxu1 %v2049_v2 }
 0x609   : > { %5481 = vmatpush3.msra.mxu1 %v2049_v2  ;;  %v2379_v2 = vld [vmem:[#allocation16 + $0x220] sm:$0xff] (%p187_p8) }
 0x60a   : > { %5482 = vmatprep.subr.mxu1 %v5474_v63 }
 0x60b   : > { %5483 = vmatpush3.msra.mxu1 %v5474_v63  ;;  %v2315_v63 = vld [vmem:[#allocation16 + $0x20] sm:$0xff] (%p187_p8) }
 0x60c   : > { %5484 = vmatprep.subr.mxu1 %v2039_v0 }
 0x60d   : > { %5485 = vmatpush3.msra.mxu1 %v2039_v0  ;;  %v2380_v0 = vld [vmem:[#allocation16 + $0x228] sm:$0xff] (%p187_p8) }
 0x60e   : > { %5486 = vmatprep.subr.mxu1 %v5471_v61 }
 0x60f   : > { %5487 = vmatpush3.msra.mxu1 %v5471_v61  ;;  %v2316_v61 = vld [vmem:[#allocation16 + $0x28] sm:$0xff] (%p187_p8) }
 0x610   : > { %5488 = vmatprep.subr.mxu1 %v2029_v62 }
 0x611   : > { %5489 = vmatpush3.msra.mxu1 %v2029_v62  ;;  %v2381_v62 = vld [vmem:[#allocation16 + $0x230] sm:$0xff] (%p187_p8) }
 0x612   : > { %5490 = vmatprep.subr.mxu1 %v5468_v59 }
 0x613   : > { %5491 = vmatpush3.msra.mxu1 %v5468_v59  ;;  %v2317_v59 = vld [vmem:[#allocation16 + $0x30] sm:$0xff] (%p187_p8) }
 0x614   : > { %5492 = vmatprep.subr.mxu1 %v2019_v60  ;;  %3308 = vmatpush1.msra.mxu0 (%p187_p8), %v2317_v59  ;;  %v2349_v59 = vld [vmem:[#allocation16 + $0x130] sm:$0xff] (%p187_p8) }
 0x615   : > { %5493 = vmatpush3.msra.mxu1 %v2019_v60  ;;  %v2382_v60 = vld [vmem:[#allocation16 + $0x238] sm:$0xff] (%p187_p8)  ;;  %3309 = vmatprep.subr.mxu0 (%p187_p8), %v2316_v61  ;;  %v2348_v61 = vld [vmem:[#allocation16 + $0x128] sm:$0xff] (%p187_p8) }
 0x616   : > { %5495 = vmatmul.mubr.msk.f32.vlgmr.msra.gmra.mxu1 %vm2062_vm5, %v2059_v3  ;;  %3354 = vmatprep.subr.mxu1 (%p187_p8), %v2406_v9  ;;  %v2313_v3 = vld [vmem:[#allocation16 + $0x10] sm:$0xff] (%p187_p8)  ;;  %v2372_v9 = vld [vmem:[#allocation16 + $0x1e8] sm:$0xff] (%p187_p8) }
 0x617   : > { %5497 = vmatprep.mubr.msk.f32.mxu1 %vm2062_vm5, %v2060_v4  ;;  %3355 = vmatpush1.msra.mxu1 (%p187_p8), %v2405_v40  ;;  %v2378_v4 = vld [vmem:[#allocation16 + $0x218] sm:$0xff] (%p187_p8)  ;;  %v2371_v40 = vld [vmem:[#allocation16 + $0x1e0] sm:$0xff] (%p187_p8) }
 0x618   :  { %3356 = vmatprep.subr.mxu1 (%p187_p8), %v2404_v11  ;;  %3310 = vmatpush1.msra.mxu0 (%p187_p8), %v2315_v63  ;;  %v2370_v11 = vld [vmem:[#allocation16 + $0x1d8] sm:$0xff] (%p187_p8)  ;;  %v2347_v63 = vld [vmem:[#allocation16 + $0x120] sm:$0xff] (%p187_p8) }
 0x619   :  { %3357 = vmatpush1.msra.mxu1 (%p187_p8), %v2403_v13  ;;  %3311 = vmatprep.subr.mxu0 (%p187_p8), %v2314_v1  ;;  %v2369_v13 = vld [vmem:[#allocation16 + $0x1d0] sm:$0xff] (%p187_p8)  ;;  %v2346_v1 = vld [vmem:[#allocation16 + $0x118] sm:$0xff] (%p187_p8) }
 0x61a   : > { %5498 = vmatmul.mubr.msk.f32.gmra.mxu1 %vm2062_vm5, %v2061_v20  ;;  %3358 = vmatprep.subr.mxu1 (%p187_p8), %v2402_v14  ;;  %v2312_v20 = vld [vmem:[#allocation16 + $0x8] sm:$0xff] (%p187_p8)  ;;  %v2434_v14 = vld [vmem:[#allocation16 + $0x3d8] sm:$0xff] (%p187_p8) }
 0x61b   :  { %3359 = vmatpush1.msra.mxu1 (%p187_p8), %v2401_v16  ;;  %3312 = vmatpush1.msra.mxu0 (%p187_p8), %v2313_v3  ;;  %v2433_v16 = vld [vmem:[#allocation16 + $0x3d0] sm:$0xff] (%p187_p8) }
 0x61c   :  { %3360 = vmatprep.subr.mxu1 (%p187_p8), %v2400_v18  ;;  %3313 = vmatprep.subr.mxu0 (%p187_p8), %v2312_v20  ;;  %v2432_v18 = vld [vmem:[#allocation16 + $0x3c8] sm:$0xff] (%p187_p8)  ;;  %v2345_v3 = vld [vmem:[#allocation16 + $0x110] sm:$0xff] (%p187_p8) }
 0x61d   :  { %3361 = vmatpush1.msra.mxu1 (%p187_p8), %v2399_v28  ;;  %v2431_v28 = vld [vmem:[#allocation16 + $0x3c0] sm:$0xff] (%p187_p8)  ;;  %v2344_v20 = vld [vmem:[#allocation16 + $0x108] sm:$0xff] (%p187_p8) }
 0x61e   :  { %3362 = vmatprep.subr.mxu1 (%p187_p8), %v2398_v22  ;;  %v2430_v22 = vld [vmem:[#allocation16 + $0x3b8] sm:$0xff] (%p187_p8) }
 0x61f   :  { %3363 = vmatpush1.msra.mxu1 (%p187_p8), %v2397_v41  ;;  %v2429_v41 = vld [vmem:[#allocation16 + $0x3b0] sm:$0xff] (%p187_p8) }
 0x620   :  { %3364 = vmatprep.subr.mxu1 (%p187_p8), %v2396_v25  ;;  %v2428_v25 = vld [vmem:[#allocation16 + $0x3a8] sm:$0xff] (%p187_p8) }
 0x621   :  { %3365 = vmatpush1.msra.mxu1 (%p187_p8), %v2395_v27  ;;  %v2427_v27 = vld [vmem:[#allocation16 + $0x3a0] sm:$0xff] (%p187_p8) }
 0x622   :  { %3366 = vmatprep.subr.mxu1 (%p187_p8), %v2394_v36  ;;  %v2426_v36 = vld [vmem:[#allocation16 + $0x398] sm:$0xff] (%p187_p8) }
 0x623   :  { %3367 = vmatpush1.msra.mxu1 (%p187_p8), %v2393_v32  ;;  %v2425_v32 = vld [vmem:[#allocation16 + $0x390] sm:$0xff] (%p187_p8) }
 0x624   :  { %3368 = vmatprep.subr.mxu1 (%p187_p8), %v2392_v30  ;;  %v2424_v30 = vld [vmem:[#allocation16 + $0x388] sm:$0xff] (%p187_p8) }
 0x625   :  { %3369 = vmatpush1.msra.mxu1 (%p187_p8), %v2391_v33  ;;  %v2423_v33 = vld [vmem:[#allocation16 + $0x380] sm:$0xff] (%p187_p8) }
 0x626   :  { %3370 = vmatprep.subr.mxu1 (%p187_p8), %v2390_v47  ;;  %v2422_v47 = vld [vmem:[#allocation16 + $0x378] sm:$0xff] (%p187_p8) }
 0x627   :  { %3371 = vmatpush1.msra.mxu1 (%p187_p8), %v2389_v49  ;;  %v2421_v49 = vld [vmem:[#allocation16 + $0x370] sm:$0xff] (%p187_p8) }
 0x628   :  { %3372 = vmatprep.subr.mxu1 (%p187_p8), %v2388_v44  ;;  %v2420_v44 = vld [vmem:[#allocation16 + $0x368] sm:$0xff] (%p187_p8) }
 0x629   :  { %3373 = vmatpush1.msra.mxu1 (%p187_p8), %v2387_v53  ;;  %v2419_v53 = vld [vmem:[#allocation16 + $0x360] sm:$0xff] (%p187_p8) }
 0x62a   :  { %3374 = vmatprep.subr.mxu1 (%p187_p8), %v2386_v45  ;;  %v2418_v45 = vld [vmem:[#allocation16 + $0x358] sm:$0xff] (%p187_p8) }
 0x62b   :  { %3375 = vmatpush1.msra.mxu1 (%p187_p8), %v2385_v52  ;;  %v2417_v52 = vld [vmem:[#allocation16 + $0x350] sm:$0xff] (%p187_p8) }
 0x62c   :  { %3376 = vmatprep.subr.mxu1 (%p187_p8), %v2384_v34  ;;  %v2416_v34 = vld [vmem:[#allocation16 + $0x348] sm:$0xff] (%p187_p8) }
 0x62d   :  { %3377 = vmatpush1.msra.mxu1 (%p187_p8), %v2383_v37  ;;  %v2415_v37 = vld [vmem:[#allocation16 + $0x340] sm:$0xff] (%p187_p8) }
 0x62e   :  { %3378 = vmatprep.subr.mxu1 (%p187_p8), %v2382_v60  ;;  %v2414_v60 = vld [vmem:[#allocation16 + $0x338] sm:$0xff] (%p187_p8) }
 0x62f   :  { %3379 = vmatpush1.msra.mxu1 (%p187_p8), %v2381_v62  ;;  %v2413_v62 = vld [vmem:[#allocation16 + $0x330] sm:$0xff] (%p187_p8) }
 0x630   :  { %3380 = vmatprep.subr.mxu1 (%p187_p8), %v2380_v0  ;;  %v2412_v0 = vld [vmem:[#allocation16 + $0x328] sm:$0xff] (%p187_p8) }
 0x631   :  { %3381 = vmatpush1.msra.mxu1 (%p187_p8), %v2379_v2  ;;  %v2411_v2 = vld [vmem:[#allocation16 + $0x320] sm:$0xff] (%p187_p8) }
 0x632   :  { %3382 = vmatprep.subr.mxu1 (%p187_p8), %v2378_v4  ;;  %v2410_v4 = vld [vmem:[#allocation16 + $0x318] sm:$0xff] (%p187_p8) }
 0x6d6   : > { %v5496_v38 = vpop.f32.mrf.mxu1 }
 0x6d7   : > { %4700 = vst [vmem:[%s6312_s3 + $0x10] sm:$0x1] %v5496_v38  ;;  %4701 = vst [vmem:[%s6312_s3 + $0x11] sm:$0x2] %v5496_v38 }
 0x6d8   : > { %4702 = vst [vmem:[%s6312_s3 + $0x12] sm:$0x4] %v5496_v38  ;;  %4703 = vst [vmem:[%s6312_s3 + $0x13] sm:$0x8] %v5496_v38  ;;  %v2144_v46 = vpop.f32.mrf.mxu1 }
 0x6d9   : > { %4704 = vst [vmem:[%s6312_s3 + $0x14] sm:$0x10] %v5496_v38  ;;  %4705 = vst [vmem:[%s6312_s3 + $0x15] sm:$0x20] %v5496_v38 }
 0x6da   : > { %4706 = vst [vmem:[%s6312_s3 + $0x16] sm:$0x40] %v5496_v38  ;;  %4707 = vst [vmem:[%s6312_s3 + $0x17] sm:$0x80] %v5496_v38  ;;  %v5499_v5 = vpop.f32.mrf.mxu1  ;;  %v2377_v38 = vld [vmem:[#allocation16 + $0x210] sm:$0xff] (%p187_p8) }
 0x6db   : > { %2164 = vst [vmem:[%s6312_s3] sm:$0x1] %v2144_v46  ;;  %4693 = vst [vmem:[%s6312_s3 + $0x1] sm:$0x2] %v2144_v46  ;;  %3383 = vmatpush1.msra.mxu1 (%p187_p8), %v2377_v38 }
 0x6dc   : > { %4694 = vst [vmem:[%s6312_s3 + $0x2] sm:$0x4] %v2144_v46  ;;  %4695 = vst [vmem:[%s6312_s3 + $0x3] sm:$0x8] %v2144_v46  ;;  %v2154_v57 = vpop.f32.mrf.mxu1 }
 0x6dd   : > { %4696 = vst [vmem:[%s6312_s3 + $0x4] sm:$0x10] %v2144_v46  ;;  %4697 = vst [vmem:[%s6312_s3 + $0x5] sm:$0x20] %v2144_v46 }
 0x6de   : > { %4698 = vst [vmem:[%s6312_s3 + $0x6] sm:$0x40] %v2144_v46  ;;  %4699 = vst [vmem:[%s6312_s3 + $0x7] sm:$0x80] %v2144_v46  ;;  %v2311_v46 = vld [vmem:[#allocation16] sm:$0xff] (%p187_p8) }
 0x6df   : > { %4716 = vst [vmem:[%s6312_s3 + $0x30] sm:$0x1] %v5499_v5  ;;  %4717 = vst [vmem:[%s6312_s3 + $0x31] sm:$0x2] %v5499_v5  ;;  %3314 = vmatpush1.msra.mxu0 (%p187_p8), %v2311_v46  ;;  %v2343_v46 = vld [vmem:[#allocation16 + $0x100] sm:$0xff] (%p187_p8) }
 0x6e0   : > { %4718 = vst [vmem:[%s6312_s3 + $0x32] sm:$0x4] %v5499_v5  ;;  %4719 = vst [vmem:[%s6312_s3 + $0x33] sm:$0x8] %v5499_v5 }
 0x6e1   : > { %4720 = vst [vmem:[%s6312_s3 + $0x34] sm:$0x10] %v5499_v5  ;;  %4721 = vst [vmem:[%s6312_s3 + $0x35] sm:$0x20] %v5499_v5  ;;  %189 = sbr.rel (!%p187_p8) target bundleno = 125 (0x7d), region = 191  ;;  %v2376_v5 = vld [vmem:[#allocation16 + $0x208] sm:$0xff] (%p187_p8) }
 0x6e2   : > { %4708 = vst [vmem:[%s6312_s3 + $0x20] sm:$0x1] %v2154_v57  ;;  %4709 = vst [vmem:[%s6312_s3 + $0x21] sm:$0x2] %v2154_v57  ;;  %3384 = vmatprep.subr.mxu1 (%p187_p8), %v2376_v5  ;;  %v2409_v5 = vld [vmem:[#allocation16 + $0x310] sm:$0xff] (%p187_p8) }
 0x6e3   : > { %4710 = vst [vmem:[%s6312_s3 + $0x22] sm:$0x4] %v2154_v57  ;;  %4711 = vst [vmem:[%s6312_s3 + $0x23] sm:$0x8] %v2154_v57  ;;  %3385 = vmatpush1.msra.mxu1 (%p187_p8), %v2375_v58  ;;  %v2408_v58 = vld [vmem:[#allocation16 + $0x308] sm:$0xff] (%p187_p8) }
 0x6e4   : > { %4712 = vst [vmem:[%s6312_s3 + $0x24] sm:$0x10] %v2154_v57  ;;  %4713 = vst [vmem:[%s6312_s3 + $0x25] sm:$0x20] %v2154_v57  ;;  %3386 = vmatprep.subr.mxu1 (%p187_p8), %v2438_v7  ;;  %v2407_v7 = vld [vmem:[#allocation16 + $0x300] sm:$0xff] (%p187_p8) }
 0x6e5   : > { %4714 = vst [vmem:[%s6312_s3 + $0x26] sm:$0x40] %v2154_v57  ;;  %4715 = vst [vmem:[%s6312_s3 + $0x27] sm:$0x80] %v2154_v57  ;;  %v2374_v57 = vld [vmem:[#allocation16 + $0x1f8] sm:$0xff] (%p187_p8)  ;;  %3387 = vmatpush2.msra.mxu1 (%p187_p8), %v2437_v8  ;;  %v2469_v8 = vld [vmem:[#allocation16 + $0x4f0] sm:$0xff] (%p187_p8) }
 0x6e6   :  { %3315 = vmatprep.subr.mxu0 %v2374_v57  ;;  %3388 = vmatprep.subr.mxu1 %v2436_v10  ;;  %v2468_v10 = vld [vmem:[#allocation16 + $0x4e8] sm:$0xff] }
 0x6e7   :  { %3316 = vmatpush2.msra.mxu0 %v2373_v6  ;;  %3389 = vmatpush2.msra.mxu1 %v2435_v12  ;;  %v2470_v6 = vld [vmem:[#allocation16 + $0x4f8] sm:$0xff]  ;;  %v2467_v12 = vld [vmem:[#allocation16 + $0x4e0] sm:$0xff] }
 0x6e8   :  { %3317 = vmatprep.subr.mxu0 %v2372_v9  ;;  %3390 = vmatprep.subr.mxu1 %v2434_v14  ;;  %v2466_v14 = vld [vmem:[#allocation16 + $0x4d8] sm:$0xff] }
 0x6e9   :  { %3318 = vmatpush2.msra.mxu0 %v2371_v40  ;;  %3391 = vmatpush2.msra.mxu1 %v2433_v16  ;;  %v2465_v16 = vld [vmem:[#allocation16 + $0x4d0] sm:$0xff] }
 0x6ea   :  { %3319 = vmatprep.subr.mxu0 %v2370_v11  ;;  %3392 = vmatprep.subr.mxu1 %v2432_v18  ;;  %v2534_v11 = vld [vmem:[#allocation16 + $0x6f8] sm:$0xff]  ;;  %v2464_v18 = vld [vmem:[#allocation16 + $0x4c8] sm:$0xff] }
 0x6eb   :  { %3320 = vmatpush2.msra.mxu0 %v2369_v13  ;;  %3393 = vmatpush2.msra.mxu1 %v2431_v28  ;;  %v2533_v13 = vld [vmem:[#allocation16 + $0x6f0] sm:$0xff]  ;;  %v2463_v28 = vld [vmem:[#allocation16 + $0x4c0] sm:$0xff] }
 0x6ec   :  { %3321 = vmatprep.subr.mxu0 %v2368_v15  ;;  %3394 = vmatprep.subr.mxu1 %v2430_v22  ;;  %v2254_v38 = vld [vmem:[#allocation2 + $0x2] sm:$0x3]  ;;  %v2252_v57 = vld [vmem:[#allocation2] sm:$0x3]  ;;  %v2258_v9 = vld [vmem:[#allocation2 + $0x6] sm:$0x3] }
 0x6ed   :  { %3322 = vmatpush2.msra.mxu0 %v2367_v17  ;;  %3395 = vmatpush2.msra.mxu1 %v2429_v41  ;;  %v2256_v40 = vld [vmem:[#allocation2 + $0x4] sm:$0x3]  ;;  %v2532_v15 = vld [vmem:[#allocation16 + $0x6e8] sm:$0xff]  ;;  %v2462_v22 = vld [vmem:[#allocation16 + $0x4b8] sm:$0xff] }
 0x6ee   :  { %3323 = vmatprep.subr.mxu0 %v2366_v19  ;;  %3396 = vmatprep.subr.mxu1 %v2428_v25  ;;  %v2531_v17 = vld [vmem:[#allocation16 + $0x6e0] sm:$0xff]  ;;  %v2530_v19 = vld [vmem:[#allocation16 + $0x6d8] sm:$0xff]  ;;  %v2461_v41 = vld [vmem:[#allocation16 + $0x4b0] sm:$0xff] }
 0x6ef   :  { %3324 = vmatpush2.msra.mxu0 %v2365_v21  ;;  %3397 = vmatpush2.msra.mxu1 %v2427_v27  ;;  %v2529_v21 = vld [vmem:[#allocation16 + $0x6d0] sm:$0xff]  ;;  %v2460_v25 = vld [vmem:[#allocation16 + $0x4a8] sm:$0xff]  ;;  %v2459_v27 = vld [vmem:[#allocation16 + $0x4a0] sm:$0xff] }
 0x6f0   :  { %3325 = vmatprep.subr.mxu0 %v2364_v23  ;;  %3398 = vmatprep.subr.mxu1 %v2426_v36  ;;  %v2528_v23 = vld [vmem:[#allocation16 + $0x6c8] sm:$0xff]  ;;  %v2458_v36 = vld [vmem:[#allocation16 + $0x498] sm:$0xff] }
 0x6f1   :  { %3326 = vmatpush2.msra.mxu0 %v2363_v24  ;;  %3399 = vmatpush2.msra.mxu1 %v2425_v32  ;;  %v2527_v24 = vld [vmem:[#allocation16 + $0x6c0] sm:$0xff]  ;;  %v2457_v32 = vld [vmem:[#allocation16 + $0x490] sm:$0xff] }
 0x6f2   :  { %3327 = vmatprep.subr.mxu0 %v2362_v26  ;;  %3400 = vmatprep.subr.mxu1 %v2424_v30  ;;  %v2526_v26 = vld [vmem:[#allocation16 + $0x6b8] sm:$0xff]  ;;  %v2456_v30 = vld [vmem:[#allocation16 + $0x488] sm:$0xff] }
 0x6f3   :  { %3328 = vmatpush2.msra.mxu0 %v2361_v31  ;;  %3401 = vmatpush2.msra.mxu1 %v2423_v33  ;;  %v2525_v31 = vld [vmem:[#allocation16 + $0x6b0] sm:$0xff]  ;;  %v2455_v33 = vld [vmem:[#allocation16 + $0x480] sm:$0xff] }
 0x6f4   :  { %3329 = vmatprep.subr.mxu0 %v2360_v39  ;;  %3402 = vmatprep.subr.mxu1 %v2422_v47  ;;  %v2524_v39 = vld [vmem:[#allocation16 + $0x6a8] sm:$0xff]  ;;  %v2454_v47 = vld [vmem:[#allocation16 + $0x478] sm:$0xff] }
 0x6f5   :  { %3330 = vmatpush2.msra.mxu0 %v2359_v42  ;;  %3403 = vmatpush2.msra.mxu1 %v2421_v49  ;;  %v2523_v42 = vld [vmem:[#allocation16 + $0x6a0] sm:$0xff]  ;;  %v2453_v49 = vld [vmem:[#allocation16 + $0x470] sm:$0xff] }
 0x6f6   :  { %3331 = vmatprep.subr.mxu0 %v2358_v29  ;;  %3404 = vmatprep.subr.mxu1 %v2420_v44  ;;  %v2522_v29 = vld [vmem:[#allocation16 + $0x698] sm:$0xff]  ;;  %v2452_v44 = vld [vmem:[#allocation16 + $0x468] sm:$0xff] }
 0x6f7   :  { %3332 = vmatpush2.msra.mxu0 %v2357_v35  ;;  %3405 = vmatpush2.msra.mxu1 %v2419_v53  ;;  %v2521_v35 = vld [vmem:[#allocation16 + $0x690] sm:$0xff]  ;;  %v2451_v53 = vld [vmem:[#allocation16 + $0x460] sm:$0xff] }
 0x6f8   :  { %3333 = vmatprep.subr.mxu0 %v2356_v48  ;;  %3406 = vmatprep.subr.mxu1 %v2418_v45  ;;  %v2520_v48 = vld [vmem:[#allocation16 + $0x688] sm:$0xff]  ;;  %v2450_v45 = vld [vmem:[#allocation16 + $0x458] sm:$0xff] }
 0x6f9   :  { %3334 = vmatpush2.msra.mxu0 %v2355_v43  ;;  %3407 = vmatpush2.msra.mxu1 %v2417_v52  ;;  %v2519_v43 = vld [vmem:[#allocation16 + $0x680] sm:$0xff]  ;;  %v2449_v52 = vld [vmem:[#allocation16 + $0x450] sm:$0xff] }
 0x6fa   :  { %3335 = vmatprep.subr.mxu0 %v2354_v51  ;;  %3408 = vmatprep.subr.mxu1 %v2416_v34  ;;  %v2518_v51 = vld [vmem:[#allocation16 + $0x678] sm:$0xff]  ;;  %v2448_v34 = vld [vmem:[#allocation16 + $0x448] sm:$0xff] }
 0x6fb   :  { %3336 = vmatpush2.msra.mxu0 %v2353_v54  ;;  %3409 = vmatpush2.msra.mxu1 %v2415_v37  ;;  %v2517_v54 = vld [vmem:[#allocation16 + $0x670] sm:$0xff]  ;;  %v2447_v37 = vld [vmem:[#allocation16 + $0x440] sm:$0xff] }
 0x6fc   :  { %3337 = vmatprep.subr.mxu0 %v2352_v50  ;;  %3410 = vmatprep.subr.mxu1 %v2414_v60  ;;  %v2516_v50 = vld [vmem:[#allocation16 + $0x668] sm:$0xff]  ;;  %v2446_v60 = vld [vmem:[#allocation16 + $0x438] sm:$0xff] }
 0x6fd   :  { %3338 = vmatpush2.msra.mxu0 %v2351_v56  ;;  %3411 = vmatpush2.msra.mxu1 %v2413_v62  ;;  %v2515_v56 = vld [vmem:[#allocation16 + $0x660] sm:$0xff]  ;;  %v2445_v62 = vld [vmem:[#allocation16 + $0x430] sm:$0xff] }
 0x6fe   :  { %3339 = vmatprep.subr.mxu0 %v2350_v55  ;;  %3412 = vmatprep.subr.mxu1 %v2412_v0  ;;  %v2514_v55 = vld [vmem:[#allocation16 + $0x658] sm:$0xff]  ;;  %v2444_v0 = vld [vmem:[#allocation16 + $0x428] sm:$0xff] }
 0x6ff   :  { %3340 = vmatpush2.msra.mxu0 %v2349_v59  ;;  %3413 = vmatpush2.msra.mxu1 %v2411_v2  ;;  %v2513_v59 = vld [vmem:[#allocation16 + $0x650] sm:$0xff]  ;;  %v2443_v2 = vld [vmem:[#allocation16 + $0x420] sm:$0xff] }
 0x700   :  { %3341 = vmatprep.subr.mxu0 %v2348_v61  ;;  %3414 = vmatprep.subr.mxu1 %v2410_v4  ;;  %v2512_v61 = vld [vmem:[#allocation16 + $0x648] sm:$0xff]  ;;  %v2442_v4 = vld [vmem:[#allocation16 + $0x418] sm:$0xff] }
 0x701   :  { %3342 = vmatpush2.msra.mxu0 %v2347_v63  ;;  %3347 = vmatprep.mubr.f32.mxu0 %v2254_v38  ;;  %v2511_v63 = vld [vmem:[#allocation16 + $0x640] sm:$0xff]  ;;  %v2441_v38 = vld [vmem:[#allocation16 + $0x410] sm:$0xff] }
 0x702   :  { %3343 = vmatprep.subr.mxu0 %v2346_v1  ;;  %3415 = vmatpush2.msra.mxu1 %v2409_v5  ;;  %v2510_v1 = vld [vmem:[#allocation16 + $0x638] sm:$0xff]  ;;  %v2440_v5 = vld [vmem:[#allocation16 + $0x408] sm:$0xff] }
 0x703   :  { %3344 = vmatpush2.msra.mxu0 %v2345_v3  ;;  %3416 = vmatprep.subr.mxu1 %v2408_v58  ;;  %v2509_v3 = vld [vmem:[#allocation16 + $0x630] sm:$0xff]  ;;  %v2439_v58 = vld [vmem:[#allocation16 + $0x400] sm:$0xff] }
 0x704   :  { %3345 = vmatprep.subr.mxu0 %v2344_v20  ;;  %3417 = vmatpush2.msra.mxu1 %v2407_v7  ;;  %v2508_v20 = vld [vmem:[#allocation16 + $0x628] sm:$0xff]  ;;  %v2502_v7 = vld [vmem:[#allocation16 + $0x5f8] sm:$0xff] }
 0x705   :  { %3346 = vmatpush2.msra.mxu0 %v2343_v46  ;;  %3418 = vmatprep.mubr.f32.mxu1 %v2258_v9  ;;  %v2507_v46 = vld [vmem:[#allocation16 + $0x620] sm:$0xff]  ;;  %v2504_v9 = vld [vmem:[#allocation16 + $0x608] sm:$0xff] }
 0x706   :  { %3348 = vmatmul.mubr.f32.vlgmr.msra.gmra.mxu0 %v2252_v57  ;;  %3425 = vmatprep.subr.mxu0 %v2470_v6  ;;  %v2506_v57 = vld [vmem:[#allocation16 + $0x618] sm:$0xff]  ;;  %v2505_v6 = vld [vmem:[#allocation16 + $0x610] sm:$0xff] }
 0x707   :  { %3426 = vmatpush1.msra.mxu0 %v2469_v8  ;;  %3419 = vmatmul.mubr.f32.vlgmr.msra.gmra.mxu1 %v2256_v40  ;;  %v2501_v8 = vld [vmem:[#allocation16 + $0x5f0] sm:$0xff]  ;;  %v2503_v40 = vld [vmem:[#allocation16 + $0x600] sm:$0xff] }
 0x708   :  { %3427 = vmatprep.subr.mxu0 %v2468_v10  ;;  %3496 = vmatprep.subr.mxu1 %v2534_v11  ;;  %v2500_v10 = vld [vmem:[#allocation16 + $0x5e8] sm:$0xff]  ;;  %v2566_v11 = vld [vmem:[#allocation16 + $0x7f8] sm:$0xff] }
 0x709   :  { %3428 = vmatpush1.msra.mxu0 %v2467_v12  ;;  %3497 = vmatpush1.msra.mxu1 %v2533_v13  ;;  %v2499_v12 = vld [vmem:[#allocation16 + $0x5e0] sm:$0xff]  ;;  %v2565_v13 = vld [vmem:[#allocation16 + $0x7f0] sm:$0xff] }
 0x70a   :  { %3429 = vmatprep.subr.mxu0 %v2466_v14  ;;  %3498 = vmatprep.subr.mxu1 %v2532_v15  ;;  %v2498_v14 = vld [vmem:[#allocation16 + $0x5d8] sm:$0xff]  ;;  %v2564_v15 = vld [vmem:[#allocation16 + $0x7e8] sm:$0xff] }
 0x70b   :  { %3430 = vmatpush1.msra.mxu0 %v2465_v16  ;;  %3499 = vmatpush1.msra.mxu1 %v2531_v17  ;;  %v2497_v16 = vld [vmem:[#allocation16 + $0x5d0] sm:$0xff]  ;;  %v2563_v17 = vld [vmem:[#allocation16 + $0x7e0] sm:$0xff] }
 0x70c   :  { %3431 = vmatprep.subr.mxu0 %v2464_v18  ;;  %3500 = vmatprep.subr.mxu1 %v2530_v19  ;;  %v2496_v18 = vld [vmem:[#allocation16 + $0x5c8] sm:$0xff]  ;;  %v2562_v19 = vld [vmem:[#allocation16 + $0x7d8] sm:$0xff] }
 0x70d   :  { %3432 = vmatpush1.msra.mxu0 %v2463_v28  ;;  %3501 = vmatpush1.msra.mxu1 %v2529_v21  ;;  %v2495_v28 = vld [vmem:[#allocation16 + $0x5c0] sm:$0xff]  ;;  %v2561_v21 = vld [vmem:[#allocation16 + $0x7d0] sm:$0xff] }
 0x70e   :  { %3433 = vmatprep.subr.mxu0 %v2462_v22  ;;  %3502 = vmatprep.subr.mxu1 %v2528_v23  ;;  %v2494_v22 = vld [vmem:[#allocation16 + $0x5b8] sm:$0xff]  ;;  %v2560_v23 = vld [vmem:[#allocation16 + $0x7c8] sm:$0xff] }
 0x70f   :  { %3434 = vmatpush1.msra.mxu0 %v2461_v41  ;;  %3503 = vmatpush1.msra.mxu1 %v2527_v24  ;;  %v2493_v41 = vld [vmem:[#allocation16 + $0x5b0] sm:$0xff]  ;;  %v2559_v24 = vld [vmem:[#allocation16 + $0x7c0] sm:$0xff] }
 0x710   :  { %3435 = vmatprep.subr.mxu0 %v2460_v25  ;;  %3504 = vmatprep.subr.mxu1 %v2526_v26  ;;  %v2492_v25 = vld [vmem:[#allocation16 + $0x5a8] sm:$0xff]  ;;  %v2558_v26 = vld [vmem:[#allocation16 + $0x7b8] sm:$0xff] }
 0x711   :  { %3436 = vmatpush1.msra.mxu0 %v2459_v27  ;;  %3505 = vmatpush1.msra.mxu1 %v2525_v31  ;;  %v2491_v27 = vld [vmem:[#allocation16 + $0x5a0] sm:$0xff]  ;;  %v2557_v31 = vld [vmem:[#allocation16 + $0x7b0] sm:$0xff] }
 0x712   :  { %3437 = vmatprep.subr.mxu0 %v2458_v36  ;;  %3506 = vmatprep.subr.mxu1 %v2524_v39  ;;  %v2490_v36 = vld [vmem:[#allocation16 + $0x598] sm:$0xff]  ;;  %v2556_v39 = vld [vmem:[#allocation16 + $0x7a8] sm:$0xff] }
 0x713   :  { %3438 = vmatpush1.msra.mxu0 %v2457_v32  ;;  %3507 = vmatpush1.msra.mxu1 %v2523_v42  ;;  %v2489_v32 = vld [vmem:[#allocation16 + $0x590] sm:$0xff]  ;;  %v2555_v42 = vld [vmem:[#allocation16 + $0x7a0] sm:$0xff] }
 0x714   :  { %3439 = vmatprep.subr.mxu0 %v2456_v30  ;;  %3508 = vmatprep.subr.mxu1 %v2522_v29  ;;  %v2488_v30 = vld [vmem:[#allocation16 + $0x588] sm:$0xff]  ;;  %v2554_v29 = vld [vmem:[#allocation16 + $0x798] sm:$0xff] }
 0x715   :  { %3440 = vmatpush1.msra.mxu0 %v2455_v33  ;;  %3509 = vmatpush1.msra.mxu1 %v2521_v35  ;;  %v2487_v33 = vld [vmem:[#allocation16 + $0x580] sm:$0xff]  ;;  %v2553_v35 = vld [vmem:[#allocation16 + $0x790] sm:$0xff] }
 0x716   :  { %3441 = vmatprep.subr.mxu0 %v2454_v47  ;;  %3510 = vmatprep.subr.mxu1 %v2520_v48  ;;  %v2486_v47 = vld [vmem:[#allocation16 + $0x578] sm:$0xff]  ;;  %v2552_v48 = vld [vmem:[#allocation16 + $0x788] sm:$0xff] }
 0x717   :  { %3442 = vmatpush1.msra.mxu0 %v2453_v49  ;;  %3511 = vmatpush1.msra.mxu1 %v2519_v43  ;;  %v2485_v49 = vld [vmem:[#allocation16 + $0x570] sm:$0xff]  ;;  %v2551_v43 = vld [vmem:[#allocation16 + $0x780] sm:$0xff] }
 0x718   :  { %3443 = vmatprep.subr.mxu0 %v2452_v44  ;;  %3512 = vmatprep.subr.mxu1 %v2518_v51  ;;  %v2484_v44 = vld [vmem:[#allocation16 + $0x568] sm:$0xff]  ;;  %v2550_v51 = vld [vmem:[#allocation16 + $0x778] sm:$0xff] }
 0x719   :  { %3444 = vmatpush1.msra.mxu0 %v2451_v53  ;;  %3513 = vmatpush1.msra.mxu1 %v2517_v54  ;;  %v2483_v53 = vld [vmem:[#allocation16 + $0x560] sm:$0xff]  ;;  %v2549_v54 = vld [vmem:[#allocation16 + $0x770] sm:$0xff] }
 0x71a   :  { %3445 = vmatprep.subr.mxu0 %v2450_v45  ;;  %3514 = vmatprep.subr.mxu1 %v2516_v50  ;;  %v2482_v45 = vld [vmem:[#allocation16 + $0x558] sm:$0xff]  ;;  %v2548_v50 = vld [vmem:[#allocation16 + $0x768] sm:$0xff] }
 0x71b   :  { %3446 = vmatpush1.msra.mxu0 %v2449_v52  ;;  %3515 = vmatpush1.msra.mxu1 %v2515_v56  ;;  %v2481_v52 = vld [vmem:[#allocation16 + $0x550] sm:$0xff]  ;;  %v2547_v56 = vld [vmem:[#allocation16 + $0x760] sm:$0xff] }
 0x71c   :  { %3447 = vmatprep.subr.mxu0 %v2448_v34  ;;  %3516 = vmatprep.subr.mxu1 %v2514_v55  ;;  %v2480_v34 = vld [vmem:[#allocation16 + $0x548] sm:$0xff]  ;;  %v2546_v55 = vld [vmem:[#allocation16 + $0x758] sm:$0xff] }
 0x71d   :  { %3448 = vmatpush1.msra.mxu0 %v2447_v37  ;;  %3517 = vmatpush1.msra.mxu1 %v2513_v59  ;;  %v2479_v37 = vld [vmem:[#allocation16 + $0x540] sm:$0xff]  ;;  %v2545_v59 = vld [vmem:[#allocation16 + $0x750] sm:$0xff] }
 0x71e   :  { %3449 = vmatprep.subr.mxu0 %v2446_v60  ;;  %3518 = vmatprep.subr.mxu1 %v2512_v61  ;;  %v2478_v60 = vld [vmem:[#allocation16 + $0x538] sm:$0xff]  ;;  %v2544_v61 = vld [vmem:[#allocation16 + $0x748] sm:$0xff] }
 0x71f   :  { %3450 = vmatpush1.msra.mxu0 %v2445_v62  ;;  %3519 = vmatpush1.msra.mxu1 %v2511_v63  ;;  %v2477_v62 = vld [vmem:[#allocation16 + $0x530] sm:$0xff]  ;;  %v2543_v63 = vld [vmem:[#allocation16 + $0x740] sm:$0xff] }
 0x720   :  { %3451 = vmatprep.subr.mxu0 %v2444_v0  ;;  %3520 = vmatprep.subr.mxu1 %v2510_v1  ;;  %v2476_v0 = vld [vmem:[#allocation16 + $0x528] sm:$0xff]  ;;  %v2542_v1 = vld [vmem:[#allocation16 + $0x738] sm:$0xff] }
 0x721   :  { %3452 = vmatpush1.msra.mxu0 %v2443_v2  ;;  %3521 = vmatpush1.msra.mxu1 %v2509_v3  ;;  %v2475_v2 = vld [vmem:[#allocation16 + $0x520] sm:$0xff]  ;;  %v2541_v3 = vld [vmem:[#allocation16 + $0x730] sm:$0xff] }
 0x722   :  { %3453 = vmatprep.subr.mxu0 %v2442_v4  ;;  %3522 = vmatprep.subr.mxu1 %v2508_v20  ;;  %v2474_v4 = vld [vmem:[#allocation16 + $0x518] sm:$0xff]  ;;  %v2540_v20 = vld [vmem:[#allocation16 + $0x728] sm:$0xff] }
 0x723   :  { %3454 = vmatpush1.msra.mxu0 %v2441_v38  ;;  %3523 = vmatpush1.msra.mxu1 %v2507_v46  ;;  %v2473_v38 = vld [vmem:[#allocation16 + $0x510] sm:$0xff]  ;;  %v2539_v46 = vld [vmem:[#allocation16 + $0x720] sm:$0xff] }
 0x724   :  { %3455 = vmatprep.subr.mxu0 %v2440_v5  ;;  %3524 = vmatprep.subr.mxu1 %v2506_v57  ;;  %v2472_v5 = vld [vmem:[#allocation16 + $0x508] sm:$0xff]  ;;  %v2538_v57 = vld [vmem:[#allocation16 + $0x718] sm:$0xff] }
 0x725   :  { %3456 = vmatpush1.msra.mxu0 %v2439_v58  ;;  %3525 = vmatpush1.msra.mxu1 %v2505_v6  ;;  %v2471_v58 = vld [vmem:[#allocation16 + $0x500] sm:$0xff]  ;;  %v2262_v6 = vld [vmem:[#allocation2 + $0xa] sm:$0x3] }
 0x726   :  { %3457 = vmatprep.subr.mxu0 %v2502_v7  ;;  %3526 = vmatprep.subr.mxu1 %v2504_v9  ;;  %v2537_v7 = vld [vmem:[#allocation16 + $0x710] sm:$0xff]  ;;  %v2260_v9 = vld [vmem:[#allocation2 + $0x8] sm:$0x3] }
 0x727   :  { %3458 = vmatpush2.msra.mxu0 %v2501_v8  ;;  %3527 = vmatpush1.msra.mxu1 %v2503_v40  ;;  %v2536_v8 = vld [vmem:[#allocation16 + $0x708] sm:$0xff]  ;;  %v2598_v40 = vld [vmem:[#allocation16 + $0x8f8] sm:$0xff] }
 0x728   :  { %3459 = vmatprep.subr.mxu0 %v2500_v10  ;;  %3528 = vmatprep.subr.mxu1 %v2566_v11  ;;  %v2535_v10 = vld [vmem:[#allocation16 + $0x700] sm:$0xff]  ;;  %v2266_v11 = vld [vmem:[#allocation2 + $0xe] sm:$0x3] }
 0x729   :  { %3460 = vmatpush2.msra.mxu0 %v2499_v12  ;;  %3529 = vmatpush2.msra.mxu1 %v2565_v13  ;;  %v2597_v12 = vld [vmem:[#allocation16 + $0x8f0] sm:$0xff]  ;;  %v2264_v13 = vld [vmem:[#allocation2 + $0xc] sm:$0x3] }
 0x72a   :  { %3461 = vmatprep.subr.mxu0 %v2498_v14  ;;  %3530 = vmatprep.subr.mxu1 %v2564_v15  ;;  %v2596_v14 = vld [vmem:[#allocation16 + $0x8e8] sm:$0xff]  ;;  %v2662_v15 = vld [vmem:[#allocation16 + $0xaf8] sm:$0xff] }
 0x72b   :  { %3462 = vmatpush2.msra.mxu0 %v2497_v16  ;;  %3531 = vmatpush2.msra.mxu1 %v2563_v17  ;;  %v2595_v16 = vld [vmem:[#allocation16 + $0x8e0] sm:$0xff]  ;;  %v2661_v17 = vld [vmem:[#allocation16 + $0xaf0] sm:$0xff] }
 0x72c   :  { %3463 = vmatprep.subr.mxu0 %v2496_v18  ;;  %3532 = vmatprep.subr.mxu1 %v2562_v19  ;;  %v2594_v18 = vld [vmem:[#allocation16 + $0x8d8] sm:$0xff]  ;;  %v2660_v19 = vld [vmem:[#allocation16 + $0xae8] sm:$0xff] }
 0x72d   :  { %3464 = vmatpush2.msra.mxu0 %v2495_v28  ;;  %3533 = vmatpush2.msra.mxu1 %v2561_v21  ;;  %v2593_v28 = vld [vmem:[#allocation16 + $0x8d0] sm:$0xff]  ;;  %v2659_v21 = vld [vmem:[#allocation16 + $0xae0] sm:$0xff] }
 0x72e   :  { %3465 = vmatprep.subr.mxu0 %v2494_v22  ;;  %3534 = vmatprep.subr.mxu1 %v2560_v23  ;;  %v2592_v22 = vld [vmem:[#allocation16 + $0x8c8] sm:$0xff]  ;;  %v2658_v23 = vld [vmem:[#allocation16 + $0xad8] sm:$0xff] }
 0x72f   :  { %3466 = vmatpush2.msra.mxu0 %v2493_v41  ;;  %3535 = vmatpush2.msra.mxu1 %v2559_v24  ;;  %v2591_v41 = vld [vmem:[#allocation16 + $0x8c0] sm:$0xff]  ;;  %v2657_v24 = vld [vmem:[#allocation16 + $0xad0] sm:$0xff] }
 0x730   :  { %3467 = vmatprep.subr.mxu0 %v2492_v25  ;;  %3536 = vmatprep.subr.mxu1 %v2558_v26  ;;  %v2590_v25 = vld [vmem:[#allocation16 + $0x8b8] sm:$0xff]  ;;  %v2656_v26 = vld [vmem:[#allocation16 + $0xac8] sm:$0xff] }
 0x731   :  { %3468 = vmatpush2.msra.mxu0 %v2491_v27  ;;  %3537 = vmatpush2.msra.mxu1 %v2557_v31  ;;  %v2589_v27 = vld [vmem:[#allocation16 + $0x8b0] sm:$0xff]  ;;  %v2655_v31 = vld [vmem:[#allocation16 + $0xac0] sm:$0xff] }
 0x732   :  { %3469 = vmatprep.subr.mxu0 %v2490_v36  ;;  %3538 = vmatprep.subr.mxu1 %v2556_v39  ;;  %v2588_v36 = vld [vmem:[#allocation16 + $0x8a8] sm:$0xff]  ;;  %v2654_v39 = vld [vmem:[#allocation16 + $0xab8] sm:$0xff] }
 0x733   :  { %3470 = vmatpush2.msra.mxu0 %v2489_v32  ;;  %3539 = vmatpush2.msra.mxu1 %v2555_v42  ;;  %v2587_v32 = vld [vmem:[#allocation16 + $0x8a0] sm:$0xff]  ;;  %v2653_v42 = vld [vmem:[#allocation16 + $0xab0] sm:$0xff] }
 0x734   :  { %3471 = vmatprep.subr.mxu0 %v2488_v30  ;;  %3540 = vmatprep.subr.mxu1 %v2554_v29  ;;  %v2586_v30 = vld [vmem:[#allocation16 + $0x898] sm:$0xff]  ;;  %v2652_v29 = vld [vmem:[#allocation16 + $0xaa8] sm:$0xff] }
 0x735   :  { %3472 = vmatpush2.msra.mxu0 %v2487_v33  ;;  %3541 = vmatpush2.msra.mxu1 %v2553_v35  ;;  %v2585_v33 = vld [vmem:[#allocation16 + $0x890] sm:$0xff]  ;;  %v2651_v35 = vld [vmem:[#allocation16 + $0xaa0] sm:$0xff] }
 0x736   :  { %3473 = vmatprep.subr.mxu0 %v2486_v47  ;;  %3542 = vmatprep.subr.mxu1 %v2552_v48  ;;  %v2584_v47 = vld [vmem:[#allocation16 + $0x888] sm:$0xff]  ;;  %v2650_v48 = vld [vmem:[#allocation16 + $0xa98] sm:$0xff] }
 0x737   :  { %3474 = vmatpush2.msra.mxu0 %v2485_v49  ;;  %3543 = vmatpush2.msra.mxu1 %v2551_v43  ;;  %v2583_v49 = vld [vmem:[#allocation16 + $0x880] sm:$0xff]  ;;  %v2649_v43 = vld [vmem:[#allocation16 + $0xa90] sm:$0xff] }
 0x738   :  { %3475 = vmatprep.subr.mxu0 %v2484_v44  ;;  %3544 = vmatprep.subr.mxu1 %v2550_v51  ;;  %v2582_v44 = vld [vmem:[#allocation16 + $0x878] sm:$0xff]  ;;  %v2648_v51 = vld [vmem:[#allocation16 + $0xa88] sm:$0xff] }
 0x739   :  { %3476 = vmatpush2.msra.mxu0 %v2483_v53  ;;  %3545 = vmatpush2.msra.mxu1 %v2549_v54  ;;  %v2581_v53 = vld [vmem:[#allocation16 + $0x870] sm:$0xff]  ;;  %v2647_v54 = vld [vmem:[#allocation16 + $0xa80] sm:$0xff] }
 0x73a   :  { %3477 = vmatprep.subr.mxu0 %v2482_v45  ;;  %3546 = vmatprep.subr.mxu1 %v2548_v50  ;;  %v2580_v45 = vld [vmem:[#allocation16 + $0x868] sm:$0xff]  ;;  %v2646_v50 = vld [vmem:[#allocation16 + $0xa78] sm:$0xff] }
 0x73b   :  { %3478 = vmatpush2.msra.mxu0 %v2481_v52  ;;  %3547 = vmatpush2.msra.mxu1 %v2547_v56  ;;  %v2579_v52 = vld [vmem:[#allocation16 + $0x860] sm:$0xff]  ;;  %v2645_v56 = vld [vmem:[#allocation16 + $0xa70] sm:$0xff] }
 0x73c   :  { %3479 = vmatprep.subr.mxu0 %v2480_v34  ;;  %3548 = vmatprep.subr.mxu1 %v2546_v55  ;;  %v2578_v34 = vld [vmem:[#allocation16 + $0x858] sm:$0xff]  ;;  %v2644_v55 = vld [vmem:[#allocation16 + $0xa68] sm:$0xff] }
 0x73d   :  { %3480 = vmatpush2.msra.mxu0 %v2479_v37  ;;  %3549 = vmatpush2.msra.mxu1 %v2545_v59  ;;  %v2577_v37 = vld [vmem:[#allocation16 + $0x850] sm:$0xff]  ;;  %v2643_v59 = vld [vmem:[#allocation16 + $0xa60] sm:$0xff] }
 0x73e   :  { %3481 = vmatprep.subr.mxu0 %v2478_v60  ;;  %3550 = vmatprep.subr.mxu1 %v2544_v61  ;;  %v2576_v60 = vld [vmem:[#allocation16 + $0x848] sm:$0xff]  ;;  %v2642_v61 = vld [vmem:[#allocation16 + $0xa58] sm:$0xff] }
 0x73f   :  { %3482 = vmatpush2.msra.mxu0 %v2477_v62  ;;  %3551 = vmatpush2.msra.mxu1 %v2543_v63  ;;  %v2575_v62 = vld [vmem:[#allocation16 + $0x840] sm:$0xff]  ;;  %v2641_v63 = vld [vmem:[#allocation16 + $0xa50] sm:$0xff] }
 0x740   :  { %3483 = vmatprep.subr.mxu0 %v2476_v0  ;;  %3552 = vmatprep.subr.mxu1 %v2542_v1  ;;  %v2574_v0 = vld [vmem:[#allocation16 + $0x838] sm:$0xff]  ;;  %v2640_v1 = vld [vmem:[#allocation16 + $0xa48] sm:$0xff] }
 0x741   :  { %3484 = vmatpush2.msra.mxu0 %v2475_v2  ;;  %3553 = vmatpush2.msra.mxu1 %v2541_v3  ;;  %v2573_v2 = vld [vmem:[#allocation16 + $0x830] sm:$0xff]  ;;  %v2639_v3 = vld [vmem:[#allocation16 + $0xa40] sm:$0xff] }
 0x742   :  { %3485 = vmatprep.subr.mxu0 %v2474_v4  ;;  %3554 = vmatprep.subr.mxu1 %v2540_v20  ;;  %v2572_v4 = vld [vmem:[#allocation16 + $0x828] sm:$0xff]  ;;  %v2638_v20 = vld [vmem:[#allocation16 + $0xa38] sm:$0xff] }
 0x743   :  { %3486 = vmatpush2.msra.mxu0 %v2473_v38  ;;  %3555 = vmatpush2.msra.mxu1 %v2539_v46  ;;  %v2571_v38 = vld [vmem:[#allocation16 + $0x820] sm:$0xff]  ;;  %v2637_v46 = vld [vmem:[#allocation16 + $0xa30] sm:$0xff] }
 0x744   :  { %3487 = vmatprep.subr.mxu0 %v2472_v5  ;;  %3556 = vmatprep.subr.mxu1 %v2538_v57  ;;  %v2570_v5 = vld [vmem:[#allocation16 + $0x818] sm:$0xff]  ;;  %v2636_v57 = vld [vmem:[#allocation16 + $0xa28] sm:$0xff] }
 0x745   :  { %3488 = vmatpush2.msra.mxu0 %v2471_v58  ;;  %3489 = vmatprep.mubr.f32.mxu0 %v2262_v6  ;;  %v2569_v58 = vld [vmem:[#allocation16 + $0x810] sm:$0xff]  ;;  %v2635_v6 = vld [vmem:[#allocation16 + $0xa20] sm:$0xff] }
 0x746   :  { %3557 = vmatpush2.msra.mxu1 %v2537_v7  ;;  %3490 = vmatmul.mubr.f32.vlgmr.msra.gmra.mxu0 %v2260_v9  ;;  %v2568_v7 = vld [vmem:[#allocation16 + $0x808] sm:$0xff]  ;;  %v2634_v9 = vld [vmem:[#allocation16 + $0xa18] sm:$0xff] }
 0x747   :  { %3558 = vmatprep.subr.mxu1 %v2536_v8  ;;  %3567 = vmatprep.subr.mxu0 %v2598_v40  ;;  %v2567_v8 = vld [vmem:[#allocation16 + $0x800] sm:$0xff]  ;;  %v2633_v40 = vld [vmem:[#allocation16 + $0xa10] sm:$0xff] }
 0x748   :  { %3559 = vmatpush2.msra.mxu1 %v2535_v10  ;;  %3560 = vmatprep.mubr.f32.mxu1 %v2266_v11  ;;  %v2630_v10 = vld [vmem:[#allocation16 + $0x9f8] sm:$0xff]  ;;  %v2632_v11 = vld [vmem:[#allocation16 + $0xa08] sm:$0xff] }
 0x749   :  { %3568 = vmatpush1.msra.mxu0 %v2597_v12  ;;  %3561 = vmatmul.mubr.f32.vlgmr.msra.gmra.mxu1 %v2264_v13  ;;  %v2629_v12 = vld [vmem:[#allocation16 + $0x9f0] sm:$0xff]  ;;  %v2631_v13 = vld [vmem:[#allocation16 + $0xa00] sm:$0xff] }
 0x74a   :  { %3569 = vmatprep.subr.mxu0 %v2596_v14  ;;  %3638 = vmatprep.subr.mxu1 %v2662_v15  ;;  %v2628_v14 = vld [vmem:[#allocation16 + $0x9e8] sm:$0xff]  ;;  %v2694_v15 = vld [vmem:[#allocation16 + $0xbf8] sm:$0xff] }
 0x74b   :  { %3570 = vmatpush1.msra.mxu0 %v2595_v16  ;;  %3639 = vmatpush1.msra.mxu1 %v2661_v17  ;;  %v2627_v16 = vld [vmem:[#allocation16 + $0x9e0] sm:$0xff]  ;;  %v2693_v17 = vld [vmem:[#allocation16 + $0xbf0] sm:$0xff] }
 0x74c   :  { %3571 = vmatprep.subr.mxu0 %v2594_v18  ;;  %3640 = vmatprep.subr.mxu1 %v2660_v19  ;;  %v2626_v18 = vld [vmem:[#allocation16 + $0x9d8] sm:$0xff]  ;;  %v2692_v19 = vld [vmem:[#allocation16 + $0xbe8] sm:$0xff] }
 0x74d   :  { %3572 = vmatpush1.msra.mxu0 %v2593_v28  ;;  %3641 = vmatpush1.msra.mxu1 %v2659_v21  ;;  %v2625_v28 = vld [vmem:[#allocation16 + $0x9d0] sm:$0xff]  ;;  %v2691_v21 = vld [vmem:[#allocation16 + $0xbe0] sm:$0xff] }
 0x74e   :  { %3573 = vmatprep.subr.mxu0 %v2592_v22  ;;  %3642 = vmatprep.subr.mxu1 %v2658_v23  ;;  %v2624_v22 = vld [vmem:[#allocation16 + $0x9c8] sm:$0xff]  ;;  %v2690_v23 = vld [vmem:[#allocation16 + $0xbd8] sm:$0xff] }
 0x74f   :  { %3574 = vmatpush1.msra.mxu0 %v2591_v41  ;;  %3643 = vmatpush1.msra.mxu1 %v2657_v24  ;;  %v2623_v41 = vld [vmem:[#allocation16 + $0x9c0] sm:$0xff]  ;;  %v2689_v24 = vld [vmem:[#allocation16 + $0xbd0] sm:$0xff] }
 0x750   :  { %3575 = vmatprep.subr.mxu0 %v2590_v25  ;;  %3644 = vmatprep.subr.mxu1 %v2656_v26  ;;  %v2622_v25 = vld [vmem:[#allocation16 + $0x9b8] sm:$0xff]  ;;  %v2688_v26 = vld [vmem:[#allocation16 + $0xbc8] sm:$0xff] }
 0x751   :  { %3576 = vmatpush1.msra.mxu0 %v2589_v27  ;;  %3645 = vmatpush1.msra.mxu1 %v2655_v31  ;;  %v2621_v27 = vld [vmem:[#allocation16 + $0x9b0] sm:$0xff]  ;;  %v2687_v31 = vld [vmem:[#allocation16 + $0xbc0] sm:$0xff] }
 0x752   :  { %3577 = vmatprep.subr.mxu0 %v2588_v36  ;;  %3646 = vmatprep.subr.mxu1 %v2654_v39  ;;  %v2620_v36 = vld [vmem:[#allocation16 + $0x9a8] sm:$0xff]  ;;  %v2686_v39 = vld [vmem:[#allocation16 + $0xbb8] sm:$0xff] }
 0x753   :  { %3578 = vmatpush1.msra.mxu0 %v2587_v32  ;;  %3647 = vmatpush1.msra.mxu1 %v2653_v42  ;;  %v2619_v32 = vld [vmem:[#allocation16 + $0x9a0] sm:$0xff]  ;;  %v2685_v42 = vld [vmem:[#allocation16 + $0xbb0] sm:$0xff] }
 0x754   :  { %3579 = vmatprep.subr.mxu0 %v2586_v30  ;;  %3648 = vmatprep.subr.mxu1 %v2652_v29  ;;  %v2618_v30 = vld [vmem:[#allocation16 + $0x998] sm:$0xff]  ;;  %v2684_v29 = vld [vmem:[#allocation16 + $0xba8] sm:$0xff] }
 0x755   :  { %3580 = vmatpush1.msra.mxu0 %v2585_v33  ;;  %3649 = vmatpush1.msra.mxu1 %v2651_v35  ;;  %v2617_v33 = vld [vmem:[#allocation16 + $0x990] sm:$0xff]  ;;  %v2683_v35 = vld [vmem:[#allocation16 + $0xba0] sm:$0xff] }
 0x756   :  { %3581 = vmatprep.subr.mxu0 %v2584_v47  ;;  %3650 = vmatprep.subr.mxu1 %v2650_v48  ;;  %v2616_v47 = vld [vmem:[#allocation16 + $0x988] sm:$0xff]  ;;  %v2682_v48 = vld [vmem:[#allocation16 + $0xb98] sm:$0xff] }
 0x757   :  { %3582 = vmatpush1.msra.mxu0 %v2583_v49  ;;  %3651 = vmatpush1.msra.mxu1 %v2649_v43  ;;  %v2615_v49 = vld [vmem:[#allocation16 + $0x980] sm:$0xff]  ;;  %v2681_v43 = vld [vmem:[#allocation16 + $0xb90] sm:$0xff] }
 0x758   :  { %3583 = vmatprep.subr.mxu0 %v2582_v44  ;;  %3652 = vmatprep.subr.mxu1 %v2648_v51  ;;  %v2614_v44 = vld [vmem:[#allocation16 + $0x978] sm:$0xff]  ;;  %v2680_v51 = vld [vmem:[#allocation16 + $0xb88] sm:$0xff] }
 0x759   :  { %3584 = vmatpush1.msra.mxu0 %v2581_v53  ;;  %3653 = vmatpush1.msra.mxu1 %v2647_v54  ;;  %v2613_v53 = vld [vmem:[#allocation16 + $0x970] sm:$0xff]  ;;  %v2679_v54 = vld [vmem:[#allocation16 + $0xb80] sm:$0xff] }
 0x75a   :  { %3585 = vmatprep.subr.mxu0 %v2580_v45  ;;  %3654 = vmatprep.subr.mxu1 %v2646_v50  ;;  %v2612_v45 = vld [vmem:[#allocation16 + $0x968] sm:$0xff]  ;;  %v2678_v50 = vld [vmem:[#allocation16 + $0xb78] sm:$0xff] }
 0x75b   :  { %3586 = vmatpush1.msra.mxu0 %v2579_v52  ;;  %3655 = vmatpush1.msra.mxu1 %v2645_v56  ;;  %v2611_v52 = vld [vmem:[#allocation16 + $0x960] sm:$0xff]  ;;  %v2677_v56 = vld [vmem:[#allocation16 + $0xb70] sm:$0xff] }
 0x75c   :  { %3587 = vmatprep.subr.mxu0 %v2578_v34  ;;  %3656 = vmatprep.subr.mxu1 %v2644_v55  ;;  %v2610_v34 = vld [vmem:[#allocation16 + $0x958] sm:$0xff]  ;;  %v2676_v55 = vld [vmem:[#allocation16 + $0xb68] sm:$0xff] }
 0x75d   :  { %3588 = vmatpush1.msra.mxu0 %v2577_v37  ;;  %3657 = vmatpush1.msra.mxu1 %v2643_v59  ;;  %v2609_v37 = vld [vmem:[#allocation16 + $0x950] sm:$0xff]  ;;  %v2675_v59 = vld [vmem:[#allocation16 + $0xb60] sm:$0xff] }
 0x75e   :  { %3589 = vmatprep.subr.mxu0 %v2576_v60  ;;  %3658 = vmatprep.subr.mxu1 %v2642_v61  ;;  %v2608_v60 = vld [vmem:[#allocation16 + $0x948] sm:$0xff]  ;;  %v2674_v61 = vld [vmem:[#allocation16 + $0xb58] sm:$0xff] }
 0x75f   :  { %3590 = vmatpush1.msra.mxu0 %v2575_v62  ;;  %3659 = vmatpush1.msra.mxu1 %v2641_v63  ;;  %v2607_v62 = vld [vmem:[#allocation16 + $0x940] sm:$0xff]  ;;  %v2673_v63 = vld [vmem:[#allocation16 + $0xb50] sm:$0xff] }
 0x760   :  { %3591 = vmatprep.subr.mxu0 %v2574_v0  ;;  %3660 = vmatprep.subr.mxu1 %v2640_v1  ;;  %v2606_v0 = vld [vmem:[#allocation16 + $0x938] sm:$0xff]  ;;  %v2672_v1 = vld [vmem:[#allocation16 + $0xb48] sm:$0xff] }
 0x761   :  { %3592 = vmatpush1.msra.mxu0 %v2573_v2  ;;  %3661 = vmatpush1.msra.mxu1 %v2639_v3  ;;  %v2605_v2 = vld [vmem:[#allocation16 + $0x930] sm:$0xff]  ;;  %v2671_v3 = vld [vmem:[#allocation16 + $0xb40] sm:$0xff] }
 0x762   :  { %3593 = vmatprep.subr.mxu0 %v2572_v4  ;;  %3662 = vmatprep.subr.mxu1 %v2638_v20  ;;  %v2604_v4 = vld [vmem:[#allocation16 + $0x928] sm:$0xff]  ;;  %v2670_v20 = vld [vmem:[#allocation16 + $0xb38] sm:$0xff] }
 0x763   :  { %3594 = vmatpush1.msra.mxu0 %v2571_v38  ;;  %3663 = vmatpush1.msra.mxu1 %v2637_v46  ;;  %v2603_v38 = vld [vmem:[#allocation16 + $0x920] sm:$0xff]  ;;  %v2669_v46 = vld [vmem:[#allocation16 + $0xb30] sm:$0xff] }
 0x764   :  { %3595 = vmatprep.subr.mxu0 %v2570_v5  ;;  %3664 = vmatprep.subr.mxu1 %v2636_v57  ;;  %v2602_v5 = vld [vmem:[#allocation16 + $0x918] sm:$0xff]  ;;  %v2668_v57 = vld [vmem:[#allocation16 + $0xb28] sm:$0xff] }
 0x765   :  { %3596 = vmatpush1.msra.mxu0 %v2569_v58  ;;  %3665 = vmatpush1.msra.mxu1 %v2635_v6  ;;  %v2601_v58 = vld [vmem:[#allocation16 + $0x910] sm:$0xff]  ;;  %v2667_v6 = vld [vmem:[#allocation16 + $0xb20] sm:$0xff] }
 0x766   :  { %3597 = vmatprep.subr.mxu0 %v2568_v7  ;;  %3666 = vmatprep.subr.mxu1 %v2634_v9  ;;  %v2600_v7 = vld [vmem:[#allocation16 + $0x908] sm:$0xff]  ;;  %v2666_v9 = vld [vmem:[#allocation16 + $0xb18] sm:$0xff] }
 0x767   :  { %3598 = vmatpush1.msra.mxu0 %v2567_v8  ;;  %3667 = vmatpush1.msra.mxu1 %v2633_v40  ;;  %v2599_v8 = vld [vmem:[#allocation16 + $0x900] sm:$0xff]  ;;  %v2270_v40 = vld [vmem:[#allocation2 + $0x12] sm:$0x3] }
 0x768   :  { %3599 = vmatprep.subr.mxu0 %v2630_v10  ;;  %3668 = vmatprep.subr.mxu1 %v2632_v11  ;;  %v2665_v10 = vld [vmem:[#allocation16 + $0xb10] sm:$0xff] }
 0x769   :  { %3600 = vmatpush2.msra.mxu0 %v2629_v12  ;;  %3669 = vmatpush1.msra.mxu1 %v2631_v13  ;;  %v2268_v11 = vld [vmem:[#allocation2 + $0x10] sm:$0x3]  ;;  %v2664_v12 = vld [vmem:[#allocation16 + $0xb08] sm:$0xff]  ;;  %v2726_v13 = vld [vmem:[#allocation16 + $0xcf8] sm:$0xff] }
 0x76a   :  { %3601 = vmatprep.subr.mxu0 %v2628_v14  ;;  %3670 = vmatprep.subr.mxu1 %v2694_v15  ;;  %v2663_v14 = vld [vmem:[#allocation16 + $0xb00] sm:$0xff]  ;;  %v2274_v15 = vld [vmem:[#allocation2 + $0x16] sm:$0x3] }
 0x76b   :  { %3602 = vmatpush2.msra.mxu0 %v2627_v16  ;;  %3671 = vmatpush2.msra.mxu1 %v2693_v17  ;;  %v2725_v16 = vld [vmem:[#allocation16 + $0xcf0] sm:$0xff] }
 0x76c   :  { %3603 = vmatprep.subr.mxu0 %v2626_v18  ;;  %3672 = vmatprep.subr.mxu1 %v2692_v19  ;;  %v2272_v17 = vld [vmem:[#allocation2 + $0x14] sm:$0x3]  ;;  %v2724_v18 = vld [vmem:[#allocation16 + $0xce8] sm:$0xff]  ;;  %v2790_v19 = vld [vmem:[#allocation16 + $0xef8] sm:$0xff] }
 0x76d   :  { %3604 = vmatpush2.msra.mxu0 %v2625_v28  ;;  %3673 = vmatpush2.msra.mxu1 %v2691_v21  ;;  %v2723_v28 = vld [vmem:[#allocation16 + $0xce0] sm:$0xff]  ;;  %v2789_v21 = vld [vmem:[#allocation16 + $0xef0] sm:$0xff] }
 0x76e   :  { %3605 = vmatprep.subr.mxu0 %v2624_v22  ;;  %3674 = vmatprep.subr.mxu1 %v2690_v23  ;;  %v2722_v22 = vld [vmem:[#allocation16 + $0xcd8] sm:$0xff]  ;;  %v2788_v23 = vld [vmem:[#allocation16 + $0xee8] sm:$0xff] }
 0x76f   :  { %3606 = vmatpush2.msra.mxu0 %v2623_v41  ;;  %3675 = vmatpush2.msra.mxu1 %v2689_v24  ;;  %v2721_v41 = vld [vmem:[#allocation16 + $0xcd0] sm:$0xff]  ;;  %v2787_v24 = vld [vmem:[#allocation16 + $0xee0] sm:$0xff] }
 0x770   :  { %3607 = vmatprep.subr.mxu0 %v2622_v25  ;;  %3676 = vmatprep.subr.mxu1 %v2688_v26  ;;  %v2720_v25 = vld [vmem:[#allocation16 + $0xcc8] sm:$0xff]  ;;  %v2786_v26 = vld [vmem:[#allocation16 + $0xed8] sm:$0xff] }
 0x771   :  { %3608 = vmatpush2.msra.mxu0 %v2621_v27  ;;  %3677 = vmatpush2.msra.mxu1 %v2687_v31  ;;  %v2719_v27 = vld [vmem:[#allocation16 + $0xcc0] sm:$0xff]  ;;  %v2785_v31 = vld [vmem:[#allocation16 + $0xed0] sm:$0xff] }
 0x772   :  { %3609 = vmatprep.subr.mxu0 %v2620_v36  ;;  %3678 = vmatprep.subr.mxu1 %v2686_v39  ;;  %v2718_v36 = vld [vmem:[#allocation16 + $0xcb8] sm:$0xff]  ;;  %v2784_v39 = vld [vmem:[#allocation16 + $0xec8] sm:$0xff] }
 0x773   :  { %3610 = vmatpush2.msra.mxu0 %v2619_v32  ;;  %3679 = vmatpush2.msra.mxu1 %v2685_v42  ;;  %v2717_v32 = vld [vmem:[#allocation16 + $0xcb0] sm:$0xff]  ;;  %v2783_v42 = vld [vmem:[#allocation16 + $0xec0] sm:$0xff] }
 0x774   :  { %3611 = vmatprep.subr.mxu0 %v2618_v30  ;;  %3680 = vmatprep.subr.mxu1 %v2684_v29  ;;  %v2716_v30 = vld [vmem:[#allocation16 + $0xca8] sm:$0xff]  ;;  %v2782_v29 = vld [vmem:[#allocation16 + $0xeb8] sm:$0xff] }
 0x775   :  { %3612 = vmatpush2.msra.mxu0 %v2617_v33  ;;  %3681 = vmatpush2.msra.mxu1 %v2683_v35  ;;  %v2715_v33 = vld [vmem:[#allocation16 + $0xca0] sm:$0xff]  ;;  %v2781_v35 = vld [vmem:[#allocation16 + $0xeb0] sm:$0xff] }
 0x776   :  { %3613 = vmatprep.subr.mxu0 %v2616_v47  ;;  %3682 = vmatprep.subr.mxu1 %v2682_v48  ;;  %v2714_v47 = vld [vmem:[#allocation16 + $0xc98] sm:$0xff]  ;;  %v2780_v48 = vld [vmem:[#allocation16 + $0xea8] sm:$0xff] }
 0x777   :  { %3614 = vmatpush2.msra.mxu0 %v2615_v49  ;;  %3683 = vmatpush2.msra.mxu1 %v2681_v43  ;;  %v2713_v49 = vld [vmem:[#allocation16 + $0xc90] sm:$0xff]  ;;  %v2779_v43 = vld [vmem:[#allocation16 + $0xea0] sm:$0xff] }
 0x778   :  { %3615 = vmatprep.subr.mxu0 %v2614_v44  ;;  %3684 = vmatprep.subr.mxu1 %v2680_v51  ;;  %v2712_v44 = vld [vmem:[#allocation16 + $0xc88] sm:$0xff]  ;;  %v2778_v51 = vld [vmem:[#allocation16 + $0xe98] sm:$0xff] }
 0x779   :  { %3616 = vmatpush2.msra.mxu0 %v2613_v53  ;;  %3685 = vmatpush2.msra.mxu1 %v2679_v54  ;;  %v2711_v53 = vld [vmem:[#allocation16 + $0xc80] sm:$0xff]  ;;  %v2777_v54 = vld [vmem:[#allocation16 + $0xe90] sm:$0xff] }
 0x77a   :  { %3617 = vmatprep.subr.mxu0 %v2612_v45  ;;  %3686 = vmatprep.subr.mxu1 %v2678_v50  ;;  %v2710_v45 = vld [vmem:[#allocation16 + $0xc78] sm:$0xff]  ;;  %v2776_v50 = vld [vmem:[#allocation16 + $0xe88] sm:$0xff] }
 0x77b   :  { %3618 = vmatpush2.msra.mxu0 %v2611_v52  ;;  %3687 = vmatpush2.msra.mxu1 %v2677_v56  ;;  %v2709_v52 = vld [vmem:[#allocation16 + $0xc70] sm:$0xff]  ;;  %v2775_v56 = vld [vmem:[#allocation16 + $0xe80] sm:$0xff] }
 0x77c   :  { %3619 = vmatprep.subr.mxu0 %v2610_v34  ;;  %3688 = vmatprep.subr.mxu1 %v2676_v55  ;;  %v2708_v34 = vld [vmem:[#allocation16 + $0xc68] sm:$0xff]  ;;  %v2774_v55 = vld [vmem:[#allocation16 + $0xe78] sm:$0xff] }
 0x77d   :  { %3620 = vmatpush2.msra.mxu0 %v2609_v37  ;;  %3689 = vmatpush2.msra.mxu1 %v2675_v59  ;;  %v2707_v37 = vld [vmem:[#allocation16 + $0xc60] sm:$0xff]  ;;  %v2773_v59 = vld [vmem:[#allocation16 + $0xe70] sm:$0xff] }
 0x77e   :  { %3621 = vmatprep.subr.mxu0 %v2608_v60  ;;  %3690 = vmatprep.subr.mxu1 %v2674_v61  ;;  %v2706_v60 = vld [vmem:[#allocation16 + $0xc58] sm:$0xff]  ;;  %v2772_v61 = vld [vmem:[#allocation16 + $0xe68] sm:$0xff] }
 0x77f   :  { %3622 = vmatpush2.msra.mxu0 %v2607_v62  ;;  %3691 = vmatpush2.msra.mxu1 %v2673_v63  ;;  %v2705_v62 = vld [vmem:[#allocation16 + $0xc50] sm:$0xff]  ;;  %v2771_v63 = vld [vmem:[#allocation16 + $0xe60] sm:$0xff] }
 0x780   :  { %3623 = vmatprep.subr.mxu0 %v2606_v0  ;;  %3692 = vmatprep.subr.mxu1 %v2672_v1  ;;  %v2704_v0 = vld [vmem:[#allocation16 + $0xc48] sm:$0xff]  ;;  %v2770_v1 = vld [vmem:[#allocation16 + $0xe58] sm:$0xff] }
 0x781   :  { %3624 = vmatpush2.msra.mxu0 %v2605_v2  ;;  %3693 = vmatpush2.msra.mxu1 %v2671_v3  ;;  %v2703_v2 = vld [vmem:[#allocation16 + $0xc40] sm:$0xff]  ;;  %v2769_v3 = vld [vmem:[#allocation16 + $0xe50] sm:$0xff] }
 0x782   :  { %3625 = vmatprep.subr.mxu0 %v2604_v4  ;;  %3694 = vmatprep.subr.mxu1 %v2670_v20  ;;  %v2702_v4 = vld [vmem:[#allocation16 + $0xc38] sm:$0xff]  ;;  %v2768_v20 = vld [vmem:[#allocation16 + $0xe48] sm:$0xff] }
 0x783   :  { %3626 = vmatpush2.msra.mxu0 %v2603_v38  ;;  %3695 = vmatpush2.msra.mxu1 %v2669_v46  ;;  %v2701_v38 = vld [vmem:[#allocation16 + $0xc30] sm:$0xff]  ;;  %v2767_v46 = vld [vmem:[#allocation16 + $0xe40] sm:$0xff] }
 0x784   :  { %3627 = vmatprep.subr.mxu0 %v2602_v5  ;;  %3696 = vmatprep.subr.mxu1 %v2668_v57  ;;  %v2700_v5 = vld [vmem:[#allocation16 + $0xc28] sm:$0xff]  ;;  %v2766_v57 = vld [vmem:[#allocation16 + $0xe38] sm:$0xff] }
 0x785   :  { %3628 = vmatpush2.msra.mxu0 %v2601_v58  ;;  %3697 = vmatpush2.msra.mxu1 %v2667_v6  ;;  %v2699_v58 = vld [vmem:[#allocation16 + $0xc20] sm:$0xff]  ;;  %v2765_v6 = vld [vmem:[#allocation16 + $0xe30] sm:$0xff] }
 0x786   :  { %3629 = vmatprep.subr.mxu0 %v2600_v7  ;;  %3698 = vmatprep.subr.mxu1 %v2666_v9  ;;  %v2698_v7 = vld [vmem:[#allocation16 + $0xc18] sm:$0xff]  ;;  %v2764_v9 = vld [vmem:[#allocation16 + $0xe28] sm:$0xff] }
 0x787   :  { %3630 = vmatpush2.msra.mxu0 %v2599_v8  ;;  %3631 = vmatprep.mubr.f32.mxu0 %v2270_v40  ;;  %v2697_v8 = vld [vmem:[#allocation16 + $0xc10] sm:$0xff]  ;;  %v2763_v40 = vld [vmem:[#allocation16 + $0xe20] sm:$0xff] }
 0x788   :  { %3699 = vmatpush2.msra.mxu1 %v2665_v10  ;;  %3632 = vmatmul.mubr.f32.vlgmr.msra.gmra.mxu0 %v2268_v11  ;;  %v2696_v10 = vld [vmem:[#allocation16 + $0xc08] sm:$0xff]  ;;  %v2762_v11 = vld [vmem:[#allocation16 + $0xe18] sm:$0xff] }
 0x789   :  { %3700 = vmatprep.subr.mxu1 %v2664_v12  ;;  %3709 = vmatprep.subr.mxu0 %v2726_v13  ;;  %v2695_v12 = vld [vmem:[#allocation16 + $0xc00] sm:$0xff]  ;;  %v2761_v13 = vld [vmem:[#allocation16 + $0xe10] sm:$0xff] }
 0x78a   :  { %3701 = vmatpush2.msra.mxu1 %v2663_v14  ;;  %3702 = vmatprep.mubr.f32.mxu1 %v2274_v15  ;;  %v2758_v14 = vld [vmem:[#allocation16 + $0xdf8] sm:$0xff]  ;;  %v2760_v15 = vld [vmem:[#allocation16 + $0xe08] sm:$0xff] }
 0x78b   :  { %3710 = vmatpush1.msra.mxu0 %v2725_v16  ;;  %3703 = vmatmul.mubr.f32.vlgmr.msra.gmra.mxu1 %v2272_v17  ;;  %v2757_v16 = vld [vmem:[#allocation16 + $0xdf0] sm:$0xff]  ;;  %v2759_v17 = vld [vmem:[#allocation16 + $0xe00] sm:$0xff] }
 0x78c   :  { %3711 = vmatprep.subr.mxu0 %v2724_v18  ;;  %3780 = vmatprep.subr.mxu1 %v2790_v19  ;;  %v2756_v18 = vld [vmem:[#allocation16 + $0xde8] sm:$0xff]  ;;  %v2822_v19 = vld [vmem:[#allocation16 + $0xff8] sm:$0xff] }
 0x78d   :  { %3712 = vmatpush1.msra.mxu0 %v2723_v28  ;;  %3781 = vmatpush1.msra.mxu1 %v2789_v21  ;;  %v2755_v28 = vld [vmem:[#allocation16 + $0xde0] sm:$0xff]  ;;  %v2821_v21 = vld [vmem:[#allocation16 + $0xff0] sm:$0xff] }
 0x78e   :  { %3713 = vmatprep.subr.mxu0 %v2722_v22  ;;  %3782 = vmatprep.subr.mxu1 %v2788_v23  ;;  %v2754_v22 = vld [vmem:[#allocation16 + $0xdd8] sm:$0xff]  ;;  %v2820_v23 = vld [vmem:[#allocation16 + $0xfe8] sm:$0xff] }
 0x78f   :  { %3714 = vmatpush1.msra.mxu0 %v2721_v41  ;;  %3783 = vmatpush1.msra.mxu1 %v2787_v24  ;;  %v2753_v41 = vld [vmem:[#allocation16 + $0xdd0] sm:$0xff]  ;;  %v2819_v24 = vld [vmem:[#allocation16 + $0xfe0] sm:$0xff] }
 0x790   :  { %3715 = vmatprep.subr.mxu0 %v2720_v25  ;;  %3784 = vmatprep.subr.mxu1 %v2786_v26  ;;  %v2752_v25 = vld [vmem:[#allocation16 + $0xdc8] sm:$0xff]  ;;  %v2818_v26 = vld [vmem:[#allocation16 + $0xfd8] sm:$0xff] }
 0x791   :  { %3716 = vmatpush1.msra.mxu0 %v2719_v27  ;;  %3785 = vmatpush1.msra.mxu1 %v2785_v31  ;;  %v2751_v27 = vld [vmem:[#allocation16 + $0xdc0] sm:$0xff]  ;;  %v2817_v31 = vld [vmem:[#allocation16 + $0xfd0] sm:$0xff] }
 0x792   :  { %3717 = vmatprep.subr.mxu0 %v2718_v36  ;;  %3786 = vmatprep.subr.mxu1 %v2784_v39  ;;  %v2750_v36 = vld [vmem:[#allocation16 + $0xdb8] sm:$0xff]  ;;  %v2816_v39 = vld [vmem:[#allocation16 + $0xfc8] sm:$0xff] }
 0x793   :  { %3718 = vmatpush1.msra.mxu0 %v2717_v32  ;;  %3787 = vmatpush1.msra.mxu1 %v2783_v42  ;;  %v2749_v32 = vld [vmem:[#allocation16 + $0xdb0] sm:$0xff]  ;;  %v2815_v42 = vld [vmem:[#allocation16 + $0xfc0] sm:$0xff] }
 0x794   :  { %3719 = vmatprep.subr.mxu0 %v2716_v30  ;;  %3788 = vmatprep.subr.mxu1 %v2782_v29  ;;  %v2748_v30 = vld [vmem:[#allocation16 + $0xda8] sm:$0xff]  ;;  %v2814_v29 = vld [vmem:[#allocation16 + $0xfb8] sm:$0xff] }
 0x795   :  { %3720 = vmatpush1.msra.mxu0 %v2715_v33  ;;  %3789 = vmatpush1.msra.mxu1 %v2781_v35  ;;  %v2747_v33 = vld [vmem:[#allocation16 + $0xda0] sm:$0xff]  ;;  %v2813_v35 = vld [vmem:[#allocation16 + $0xfb0] sm:$0xff] }
 0x796   :  { %3721 = vmatprep.subr.mxu0 %v2714_v47  ;;  %3790 = vmatprep.subr.mxu1 %v2780_v48  ;;  %v2746_v47 = vld [vmem:[#allocation16 + $0xd98] sm:$0xff]  ;;  %v2812_v48 = vld [vmem:[#allocation16 + $0xfa8] sm:$0xff] }
 0x797   :  { %3722 = vmatpush1.msra.mxu0 %v2713_v49  ;;  %3791 = vmatpush1.msra.mxu1 %v2779_v43  ;;  %v2745_v49 = vld [vmem:[#allocation16 + $0xd90] sm:$0xff]  ;;  %v2811_v43 = vld [vmem:[#allocation16 + $0xfa0] sm:$0xff] }
 0x798   :  { %3723 = vmatprep.subr.mxu0 %v2712_v44  ;;  %3792 = vmatprep.subr.mxu1 %v2778_v51  ;;  %v2744_v44 = vld [vmem:[#allocation16 + $0xd88] sm:$0xff]  ;;  %v2810_v51 = vld [vmem:[#allocation16 + $0xf98] sm:$0xff] }
 0x799   :  { %3724 = vmatpush1.msra.mxu0 %v2711_v53  ;;  %3793 = vmatpush1.msra.mxu1 %v2777_v54  ;;  %v2743_v53 = vld [vmem:[#allocation16 + $0xd80] sm:$0xff]  ;;  %v2809_v54 = vld [vmem:[#allocation16 + $0xf90] sm:$0xff] }
 0x79a   :  { %3725 = vmatprep.subr.mxu0 %v2710_v45  ;;  %3794 = vmatprep.subr.mxu1 %v2776_v50  ;;  %v2742_v45 = vld [vmem:[#allocation16 + $0xd78] sm:$0xff]  ;;  %v2808_v50 = vld [vmem:[#allocation16 + $0xf88] sm:$0xff] }
 0x79b   :  { %3726 = vmatpush1.msra.mxu0 %v2709_v52  ;;  %3795 = vmatpush1.msra.mxu1 %v2775_v56  ;;  %v2741_v52 = vld [vmem:[#allocation16 + $0xd70] sm:$0xff]  ;;  %v2807_v56 = vld [vmem:[#allocation16 + $0xf80] sm:$0xff] }
 0x79c   :  { %3727 = vmatprep.subr.mxu0 %v2708_v34  ;;  %3796 = vmatprep.subr.mxu1 %v2774_v55  ;;  %v2740_v34 = vld [vmem:[#allocation16 + $0xd68] sm:$0xff]  ;;  %v2806_v55 = vld [vmem:[#allocation16 + $0xf78] sm:$0xff] }
 0x79d   :  { %3728 = vmatpush1.msra.mxu0 %v2707_v37  ;;  %3797 = vmatpush1.msra.mxu1 %v2773_v59  ;;  %v2739_v37 = vld [vmem:[#allocation16 + $0xd60] sm:$0xff]  ;;  %v2805_v59 = vld [vmem:[#allocation16 + $0xf70] sm:$0xff] }
 0x79e   :  { %3729 = vmatprep.subr.mxu0 %v2706_v60  ;;  %3798 = vmatprep.subr.mxu1 %v2772_v61  ;;  %v2738_v60 = vld [vmem:[#allocation16 + $0xd58] sm:$0xff]  ;;  %v2804_v61 = vld [vmem:[#allocation16 + $0xf68] sm:$0xff] }
 0x79f   :  { %3730 = vmatpush1.msra.mxu0 %v2705_v62  ;;  %3799 = vmatpush1.msra.mxu1 %v2771_v63  ;;  %v2737_v62 = vld [vmem:[#allocation16 + $0xd50] sm:$0xff]  ;;  %v2803_v63 = vld [vmem:[#allocation16 + $0xf60] sm:$0xff] }
 0x7a0   :  { %3731 = vmatprep.subr.mxu0 %v2704_v0  ;;  %3800 = vmatprep.subr.mxu1 %v2770_v1  ;;  %v2736_v0 = vld [vmem:[#allocation16 + $0xd48] sm:$0xff]  ;;  %v2802_v1 = vld [vmem:[#allocation16 + $0xf58] sm:$0xff] }
 0x7a1   :  { %3732 = vmatpush1.msra.mxu0 %v2703_v2  ;;  %3801 = vmatpush1.msra.mxu1 %v2769_v3  ;;  %v2735_v2 = vld [vmem:[#allocation16 + $0xd40] sm:$0xff]  ;;  %v2801_v3 = vld [vmem:[#allocation16 + $0xf50] sm:$0xff] }
 0x7a2   :  { %3733 = vmatprep.subr.mxu0 %v2702_v4  ;;  %3802 = vmatprep.subr.mxu1 %v2768_v20  ;;  %v2734_v4 = vld [vmem:[#allocation16 + $0xd38] sm:$0xff]  ;;  %v2800_v20 = vld [vmem:[#allocation16 + $0xf48] sm:$0xff] }
 0x7a3   :  { %3734 = vmatpush1.msra.mxu0 %v2701_v38  ;;  %3803 = vmatpush1.msra.mxu1 %v2767_v46  ;;  %v2733_v38 = vld [vmem:[#allocation16 + $0xd30] sm:$0xff]  ;;  %v2799_v46 = vld [vmem:[#allocation16 + $0xf40] sm:$0xff] }
 0x7a4   :  { %3735 = vmatprep.subr.mxu0 %v2700_v5  ;;  %3804 = vmatprep.subr.mxu1 %v2766_v57  ;;  %v2732_v5 = vld [vmem:[#allocation16 + $0xd28] sm:$0xff]  ;;  %v2798_v57 = vld [vmem:[#allocation16 + $0xf38] sm:$0xff] }
 0x7a5   :  { %3736 = vmatpush1.msra.mxu0 %v2699_v58  ;;  %3805 = vmatpush1.msra.mxu1 %v2765_v6  ;;  %v2731_v58 = vld [vmem:[#allocation16 + $0xd20] sm:$0xff]  ;;  %v2797_v6 = vld [vmem:[#allocation16 + $0xf30] sm:$0xff] }
 0x7a6   :  { %3737 = vmatprep.subr.mxu0 %v2698_v7  ;;  %3806 = vmatprep.subr.mxu1 %v2764_v9  ;;  %v2730_v7 = vld [vmem:[#allocation16 + $0xd18] sm:$0xff]  ;;  %v2796_v9 = vld [vmem:[#allocation16 + $0xf28] sm:$0xff] }
 0x7a7   :  { %3738 = vmatpush1.msra.mxu0 %v2697_v8  ;;  %3807 = vmatpush1.msra.mxu1 %v2763_v40  ;;  %v2729_v8 = vld [vmem:[#allocation16 + $0xd10] sm:$0xff]  ;;  %v2795_v40 = vld [vmem:[#allocation16 + $0xf20] sm:$0xff] }
 0x7a8   :  { %3739 = vmatprep.subr.mxu0 %v2696_v10  ;;  %3808 = vmatprep.subr.mxu1 %v2762_v11  ;;  %v2728_v10 = vld [vmem:[#allocation16 + $0xd08] sm:$0xff]  ;;  %v2794_v11 = vld [vmem:[#allocation16 + $0xf18] sm:$0xff] }
 0x7a9   :  { %3740 = vmatpush1.msra.mxu0 %v2695_v12  ;;  %3809 = vmatpush1.msra.mxu1 %v2761_v13  ;;  %v2727_v12 = vld [vmem:[#allocation16 + $0xd00] sm:$0xff]  ;;  %v2278_v13 = vld [vmem:[#allocation2 + $0x1a] sm:$0x3] }
 0x7aa   :  { %3741 = vmatprep.subr.mxu0 %v2758_v14  ;;  %3810 = vmatprep.subr.mxu1 %v2760_v15  ;;  %v2793_v14 = vld [vmem:[#allocation16 + $0xf10] sm:$0xff]  ;;  %v2276_v15 = vld [vmem:[#allocation2 + $0x18] sm:$0x3] }
 0x7ab   :  { %3742 = vmatpush2.msra.mxu0 %v2757_v16  ;;  %3811 = vmatpush1.msra.mxu1 %v2759_v17  ;;  %v2792_v16 = vld [vmem:[#allocation16 + $0xf08] sm:$0xff]  ;;  %v2854_v17 = vld [vmem:[#allocation16 + $0x10f8] sm:$0xff] }
 0x7ac   :  { %3743 = vmatprep.subr.mxu0 %v2756_v18  ;;  %3812 = vmatprep.subr.mxu1 %v2822_v19  ;;  %v2791_v18 = vld [vmem:[#allocation16 + $0xf00] sm:$0xff] }
 0x7ad   :  { %3744 = vmatpush2.msra.mxu0 %v2755_v28  ;;  %3813 = vmatpush2.msra.mxu1 %v2821_v21  ;;  %v2282_v19 = vld [vmem:[#allocation2 + $0x1e] sm:$0x3]  ;;  %v2853_v28 = vld [vmem:[#allocation16 + $0x10f0] sm:$0xff]  ;;  %v2280_v21 = vld [vmem:[#allocation2 + $0x1c] sm:$0x3] }
 0x7ae   :  { %3745 = vmatprep.subr.mxu0 %v2754_v22  ;;  %3814 = vmatprep.subr.mxu1 %v2820_v23  ;;  %v2852_v22 = vld [vmem:[#allocation16 + $0x10e8] sm:$0xff]  ;;  %v2918_v23 = vld [vmem:[#allocation16 + $0x12f8] sm:$0xff] }
 0x7af   :  { %3746 = vmatpush2.msra.mxu0 %v2753_v41  ;;  %3815 = vmatpush2.msra.mxu1 %v2819_v24  ;;  %v2851_v41 = vld [vmem:[#allocation16 + $0x10e0] sm:$0xff]  ;;  %v2917_v24 = vld [vmem:[#allocation16 + $0x12f0] sm:$0xff] }
 0x7b0   :  { %3747 = vmatprep.subr.mxu0 %v2752_v25  ;;  %3816 = vmatprep.subr.mxu1 %v2818_v26  ;;  %v2850_v25 = vld [vmem:[#allocation16 + $0x10d8] sm:$0xff]  ;;  %v2916_v26 = vld [vmem:[#allocation16 + $0x12e8] sm:$0xff] }
 0x7b1   :  { %3748 = vmatpush2.msra.mxu0 %v2751_v27  ;;  %3817 = vmatpush2.msra.mxu1 %v2817_v31  ;;  %v2849_v27 = vld [vmem:[#allocation16 + $0x10d0] sm:$0xff]  ;;  %v2915_v31 = vld [vmem:[#allocation16 + $0x12e0] sm:$0xff] }
 0x7b2   :  { %3749 = vmatprep.subr.mxu0 %v2750_v36  ;;  %3818 = vmatprep.subr.mxu1 %v2816_v39  ;;  %v2848_v36 = vld [vmem:[#allocation16 + $0x10c8] sm:$0xff]  ;;  %v2914_v39 = vld [vmem:[#allocation16 + $0x12d8] sm:$0xff] }
 0x7b3   :  { %3750 = vmatpush2.msra.mxu0 %v2749_v32  ;;  %3819 = vmatpush2.msra.mxu1 %v2815_v42  ;;  %v2847_v32 = vld [vmem:[#allocation16 + $0x10c0] sm:$0xff]  ;;  %v2913_v42 = vld [vmem:[#allocation16 + $0x12d0] sm:$0xff] }
 0x7b4   :  { %3751 = vmatprep.subr.mxu0 %v2748_v30  ;;  %3820 = vmatprep.subr.mxu1 %v2814_v29  ;;  %v2846_v30 = vld [vmem:[#allocation16 + $0x10b8] sm:$0xff]  ;;  %v2912_v29 = vld [vmem:[#allocation16 + $0x12c8] sm:$0xff] }
 0x7b5   :  { %3752 = vmatpush2.msra.mxu0 %v2747_v33  ;;  %3821 = vmatpush2.msra.mxu1 %v2813_v35  ;;  %v2845_v33 = vld [vmem:[#allocation16 + $0x10b0] sm:$0xff]  ;;  %v2911_v35 = vld [vmem:[#allocation16 + $0x12c0] sm:$0xff] }
 0x7b6   :  { %3753 = vmatprep.subr.mxu0 %v2746_v47  ;;  %3822 = vmatprep.subr.mxu1 %v2812_v48  ;;  %v2844_v47 = vld [vmem:[#allocation16 + $0x10a8] sm:$0xff]  ;;  %v2910_v48 = vld [vmem:[#allocation16 + $0x12b8] sm:$0xff] }
 0x7b7   :  { %3754 = vmatpush2.msra.mxu0 %v2745_v49  ;;  %3823 = vmatpush2.msra.mxu1 %v2811_v43  ;;  %v2843_v49 = vld [vmem:[#allocation16 + $0x10a0] sm:$0xff]  ;;  %v2909_v43 = vld [vmem:[#allocation16 + $0x12b0] sm:$0xff] }
 0x7b8   :  { %3755 = vmatprep.subr.mxu0 %v2744_v44  ;;  %3824 = vmatprep.subr.mxu1 %v2810_v51  ;;  %v2842_v44 = vld [vmem:[#allocation16 + $0x1098] sm:$0xff]  ;;  %v2908_v51 = vld [vmem:[#allocation16 + $0x12a8] sm:$0xff] }
 0x7b9   :  { %3756 = vmatpush2.msra.mxu0 %v2743_v53  ;;  %3825 = vmatpush2.msra.mxu1 %v2809_v54  ;;  %v2841_v53 = vld [vmem:[#allocation16 + $0x1090] sm:$0xff]  ;;  %v2907_v54 = vld [vmem:[#allocation16 + $0x12a0] sm:$0xff] }
 0x7ba   :  { %3757 = vmatprep.subr.mxu0 %v2742_v45  ;;  %3826 = vmatprep.subr.mxu1 %v2808_v50  ;;  %v2840_v45 = vld [vmem:[#allocation16 + $0x1088] sm:$0xff]  ;;  %v2906_v50 = vld [vmem:[#allocation16 + $0x1298] sm:$0xff] }
 0x7bb   :  { %3758 = vmatpush2.msra.mxu0 %v2741_v52  ;;  %3827 = vmatpush2.msra.mxu1 %v2807_v56  ;;  %v2839_v52 = vld [vmem:[#allocation16 + $0x1080] sm:$0xff]  ;;  %v2905_v56 = vld [vmem:[#allocation16 + $0x1290] sm:$0xff] }
 0x7bc   :  { %3759 = vmatprep.subr.mxu0 %v2740_v34  ;;  %3828 = vmatprep.subr.mxu1 %v2806_v55  ;;  %v2838_v34 = vld [vmem:[#allocation16 + $0x1078] sm:$0xff]  ;;  %v2904_v55 = vld [vmem:[#allocation16 + $0x1288] sm:$0xff] }
 0x7bd   :  { %3760 = vmatpush2.msra.mxu0 %v2739_v37  ;;  %3829 = vmatpush2.msra.mxu1 %v2805_v59  ;;  %v2837_v37 = vld [vmem:[#allocation16 + $0x1070] sm:$0xff]  ;;  %v2903_v59 = vld [vmem:[#allocation16 + $0x1280] sm:$0xff] }
 0x7be   :  { %3761 = vmatprep.subr.mxu0 %v2738_v60  ;;  %3830 = vmatprep.subr.mxu1 %v2804_v61  ;;  %v2836_v60 = vld [vmem:[#allocation16 + $0x1068] sm:$0xff]  ;;  %v2902_v61 = vld [vmem:[#allocation16 + $0x1278] sm:$0xff] }
 0x7bf   :  { %3762 = vmatpush2.msra.mxu0 %v2737_v62  ;;  %3831 = vmatpush2.msra.mxu1 %v2803_v63  ;;  %v2835_v62 = vld [vmem:[#allocation16 + $0x1060] sm:$0xff]  ;;  %v2901_v63 = vld [vmem:[#allocation16 + $0x1270] sm:$0xff] }
 0x7c0   :  { %3763 = vmatprep.subr.mxu0 %v2736_v0  ;;  %3832 = vmatprep.subr.mxu1 %v2802_v1  ;;  %v2834_v0 = vld [vmem:[#allocation16 + $0x1058] sm:$0xff]  ;;  %v2900_v1 = vld [vmem:[#allocation16 + $0x1268] sm:$0xff] }
 0x7c1   :  { %3764 = vmatpush2.msra.mxu0 %v2735_v2  ;;  %3833 = vmatpush2.msra.mxu1 %v2801_v3  ;;  %v2833_v2 = vld [vmem:[#allocation16 + $0x1050] sm:$0xff]  ;;  %v2899_v3 = vld [vmem:[#allocation16 + $0x1260] sm:$0xff] }
 0x7c2   :  { %3765 = vmatprep.subr.mxu0 %v2734_v4  ;;  %3834 = vmatprep.subr.mxu1 %v2800_v20  ;;  %v2832_v4 = vld [vmem:[#allocation16 + $0x1048] sm:$0xff]  ;;  %v2898_v20 = vld [vmem:[#allocation16 + $0x1258] sm:$0xff] }
 0x7c3   :  { %3766 = vmatpush2.msra.mxu0 %v2733_v38  ;;  %3835 = vmatpush2.msra.mxu1 %v2799_v46  ;;  %v2831_v38 = vld [vmem:[#allocation16 + $0x1040] sm:$0xff]  ;;  %v2897_v46 = vld [vmem:[#allocation16 + $0x1250] sm:$0xff] }
 0x7c4   :  { %3767 = vmatprep.subr.mxu0 %v2732_v5  ;;  %3836 = vmatprep.subr.mxu1 %v2798_v57  ;;  %v2830_v5 = vld [vmem:[#allocation16 + $0x1038] sm:$0xff]  ;;  %v2896_v57 = vld [vmem:[#allocation16 + $0x1248] sm:$0xff] }
 0x7c5   :  { %3768 = vmatpush2.msra.mxu0 %v2731_v58  ;;  %3837 = vmatpush2.msra.mxu1 %v2797_v6  ;;  %v2829_v58 = vld [vmem:[#allocation16 + $0x1030] sm:$0xff]  ;;  %v2895_v6 = vld [vmem:[#allocation16 + $0x1240] sm:$0xff] }
 0x7c6   :  { %3769 = vmatprep.subr.mxu0 %v2730_v7  ;;  %3838 = vmatprep.subr.mxu1 %v2796_v9  ;;  %v2828_v7 = vld [vmem:[#allocation16 + $0x1028] sm:$0xff]  ;;  %v2894_v9 = vld [vmem:[#allocation16 + $0x1238] sm:$0xff] }
 0x7c7   :  { %3770 = vmatpush2.msra.mxu0 %v2729_v8  ;;  %3839 = vmatpush2.msra.mxu1 %v2795_v40  ;;  %v2827_v8 = vld [vmem:[#allocation16 + $0x1020] sm:$0xff]  ;;  %v2893_v40 = vld [vmem:[#allocation16 + $0x1230] sm:$0xff] }
 0x7c8   :  { %3771 = vmatprep.subr.mxu0 %v2728_v10  ;;  %3840 = vmatprep.subr.mxu1 %v2794_v11  ;;  %v2826_v10 = vld [vmem:[#allocation16 + $0x1018] sm:$0xff]  ;;  %v2892_v11 = vld [vmem:[#allocation16 + $0x1228] sm:$0xff] }
 0x7c9   :  { %3772 = vmatpush2.msra.mxu0 %v2727_v12  ;;  %3773 = vmatprep.mubr.f32.mxu0 %v2278_v13  ;;  %v2825_v12 = vld [vmem:[#allocation16 + $0x1010] sm:$0xff]  ;;  %v2891_v13 = vld [vmem:[#allocation16 + $0x1220] sm:$0xff] }
 0x7ca   :  { %3841 = vmatpush2.msra.mxu1 %v2793_v14  ;;  %3774 = vmatmul.mubr.f32.vlgmr.msra.gmra.mxu0 %v2276_v15  ;;  %v2824_v14 = vld [vmem:[#allocation16 + $0x1008] sm:$0xff]  ;;  %v2890_v15 = vld [vmem:[#allocation16 + $0x1218] sm:$0xff] }
 0x7cb   :  { %3842 = vmatprep.subr.mxu1 %v2792_v16  ;;  %3851 = vmatprep.subr.mxu0 %v2854_v17  ;;  %v2823_v16 = vld [vmem:[#allocation16 + $0x1000] sm:$0xff]  ;;  %v2889_v17 = vld [vmem:[#allocation16 + $0x1210] sm:$0xff] }
 0x7cc   :  { %3843 = vmatpush2.msra.mxu1 %v2791_v18  ;;  %3844 = vmatprep.mubr.f32.mxu1 %v2282_v19  ;;  %v2886_v18 = vld [vmem:[#allocation16 + $0x11f8] sm:$0xff]  ;;  %v2888_v19 = vld [vmem:[#allocation16 + $0x1208] sm:$0xff] }
 0x7cd   :  { %3852 = vmatpush1.msra.mxu0 %v2853_v28  ;;  %3845 = vmatmul.mubr.f32.vlgmr.msra.gmra.mxu1 %v2280_v21  ;;  %v2885_v28 = vld [vmem:[#allocation16 + $0x11f0] sm:$0xff]  ;;  %v2887_v21 = vld [vmem:[#allocation16 + $0x1200] sm:$0xff] }
 0x7ce   :  { %3853 = vmatprep.subr.mxu0 %v2852_v22  ;;  %3922 = vmatprep.subr.mxu1 %v2918_v23  ;;  %v2884_v22 = vld [vmem:[#allocation16 + $0x11e8] sm:$0xff]  ;;  %v2950_v23 = vld [vmem:[#allocation16 + $0x13f8] sm:$0xff] }
 0x7cf   :  { %3854 = vmatpush1.msra.mxu0 %v2851_v41  ;;  %3923 = vmatpush1.msra.mxu1 %v2917_v24  ;;  %v2883_v41 = vld [vmem:[#allocation16 + $0x11e0] sm:$0xff]  ;;  %v2949_v24 = vld [vmem:[#allocation16 + $0x13f0] sm:$0xff] }
 0x7d0   :  { %3855 = vmatprep.subr.mxu0 %v2850_v25  ;;  %3924 = vmatprep.subr.mxu1 %v2916_v26  ;;  %v2882_v25 = vld [vmem:[#allocation16 + $0x11d8] sm:$0xff]  ;;  %v2948_v26 = vld [vmem:[#allocation16 + $0x13e8] sm:$0xff] }
 0x7d1   :  { %3856 = vmatpush1.msra.mxu0 %v2849_v27  ;;  %3925 = vmatpush1.msra.mxu1 %v2915_v31  ;;  %v2881_v27 = vld [vmem:[#allocation16 + $0x11d0] sm:$0xff]  ;;  %v2947_v31 = vld [vmem:[#allocation16 + $0x13e0] sm:$0xff] }
 0x7d2   :  { %3857 = vmatprep.subr.mxu0 %v2848_v36  ;;  %3926 = vmatprep.subr.mxu1 %v2914_v39  ;;  %v2880_v36 = vld [vmem:[#allocation16 + $0x11c8] sm:$0xff]  ;;  %v2946_v39 = vld [vmem:[#allocation16 + $0x13d8] sm:$0xff] }
 0x7d3   :  { %3858 = vmatpush1.msra.mxu0 %v2847_v32  ;;  %3927 = vmatpush1.msra.mxu1 %v2913_v42  ;;  %v2879_v32 = vld [vmem:[#allocation16 + $0x11c0] sm:$0xff]  ;;  %v2945_v42 = vld [vmem:[#allocation16 + $0x13d0] sm:$0xff] }
 0x7d4   :  { %3859 = vmatprep.subr.mxu0 %v2846_v30  ;;  %3928 = vmatprep.subr.mxu1 %v2912_v29  ;;  %v2878_v30 = vld [vmem:[#allocation16 + $0x11b8] sm:$0xff]  ;;  %v2944_v29 = vld [vmem:[#allocation16 + $0x13c8] sm:$0xff] }
 0x7d5   :  { %3860 = vmatpush1.msra.mxu0 %v2845_v33  ;;  %3929 = vmatpush1.msra.mxu1 %v2911_v35  ;;  %v2877_v33 = vld [vmem:[#allocation16 + $0x11b0] sm:$0xff]  ;;  %v2943_v35 = vld [vmem:[#allocation16 + $0x13c0] sm:$0xff] }
 0x7d6   :  { %3861 = vmatprep.subr.mxu0 %v2844_v47  ;;  %3930 = vmatprep.subr.mxu1 %v2910_v48  ;;  %v2876_v47 = vld [vmem:[#allocation16 + $0x11a8] sm:$0xff]  ;;  %v2942_v48 = vld [vmem:[#allocation16 + $0x13b8] sm:$0xff] }
 0x7d7   :  { %3862 = vmatpush1.msra.mxu0 %v2843_v49  ;;  %3931 = vmatpush1.msra.mxu1 %v2909_v43  ;;  %v2875_v49 = vld [vmem:[#allocation16 + $0x11a0] sm:$0xff]  ;;  %v2941_v43 = vld [vmem:[#allocation16 + $0x13b0] sm:$0xff] }
 0x7d8   :  { %3863 = vmatprep.subr.mxu0 %v2842_v44  ;;  %3932 = vmatprep.subr.mxu1 %v2908_v51  ;;  %v2874_v44 = vld [vmem:[#allocation16 + $0x1198] sm:$0xff]  ;;  %v2940_v51 = vld [vmem:[#allocation16 + $0x13a8] sm:$0xff] }
 0x7d9   :  { %3864 = vmatpush1.msra.mxu0 %v2841_v53  ;;  %3933 = vmatpush1.msra.mxu1 %v2907_v54  ;;  %v2873_v53 = vld [vmem:[#allocation16 + $0x1190] sm:$0xff]  ;;  %v2939_v54 = vld [vmem:[#allocation16 + $0x13a0] sm:$0xff] }
 0x7da   :  { %3865 = vmatprep.subr.mxu0 %v2840_v45  ;;  %3934 = vmatprep.subr.mxu1 %v2906_v50  ;;  %v2872_v45 = vld [vmem:[#allocation16 + $0x1188] sm:$0xff]  ;;  %v2938_v50 = vld [vmem:[#allocation16 + $0x1398] sm:$0xff] }
 0x7db   :  { %3866 = vmatpush1.msra.mxu0 %v2839_v52  ;;  %3935 = vmatpush1.msra.mxu1 %v2905_v56  ;;  %v2871_v52 = vld [vmem:[#allocation16 + $0x1180] sm:$0xff]  ;;  %v2937_v56 = vld [vmem:[#allocation16 + $0x1390] sm:$0xff] }
 0x7dc   :  { %3867 = vmatprep.subr.mxu0 %v2838_v34  ;;  %3936 = vmatprep.subr.mxu1 %v2904_v55  ;;  %v2870_v34 = vld [vmem:[#allocation16 + $0x1178] sm:$0xff]  ;;  %v2936_v55 = vld [vmem:[#allocation16 + $0x1388] sm:$0xff] }
 0x7dd   :  { %3868 = vmatpush1.msra.mxu0 %v2837_v37  ;;  %3937 = vmatpush1.msra.mxu1 %v2903_v59  ;;  %v2869_v37 = vld [vmem:[#allocation16 + $0x1170] sm:$0xff]  ;;  %v2935_v59 = vld [vmem:[#allocation16 + $0x1380] sm:$0xff] }
 0x7de   :  { %3869 = vmatprep.subr.mxu0 %v2836_v60  ;;  %3938 = vmatprep.subr.mxu1 %v2902_v61  ;;  %v2868_v60 = vld [vmem:[#allocation16 + $0x1168] sm:$0xff]  ;;  %v2934_v61 = vld [vmem:[#allocation16 + $0x1378] sm:$0xff] }
 0x7df   :  { %3870 = vmatpush1.msra.mxu0 %v2835_v62  ;;  %3939 = vmatpush1.msra.mxu1 %v2901_v63  ;;  %v2867_v62 = vld [vmem:[#allocation16 + $0x1160] sm:$0xff]  ;;  %v2933_v63 = vld [vmem:[#allocation16 + $0x1370] sm:$0xff] }
 0x7e0   :  { %3871 = vmatprep.subr.mxu0 %v2834_v0  ;;  %3940 = vmatprep.subr.mxu1 %v2900_v1  ;;  %v2866_v0 = vld [vmem:[#allocation16 + $0x1158] sm:$0xff]  ;;  %v2932_v1 = vld [vmem:[#allocation16 + $0x1368] sm:$0xff] }
 0x7e1   :  { %3872 = vmatpush1.msra.mxu0 %v2833_v2  ;;  %3941 = vmatpush1.msra.mxu1 %v2899_v3  ;;  %v2865_v2 = vld [vmem:[#allocation16 + $0x1150] sm:$0xff]  ;;  %v2931_v3 = vld [vmem:[#allocation16 + $0x1360] sm:$0xff] }
 0x7e2   :  { %3873 = vmatprep.subr.mxu0 %v2832_v4  ;;  %3942 = vmatprep.subr.mxu1 %v2898_v20  ;;  %v2864_v4 = vld [vmem:[#allocation16 + $0x1148] sm:$0xff]  ;;  %v2930_v20 = vld [vmem:[#allocation16 + $0x1358] sm:$0xff] }
 0x7e3   :  { %3874 = vmatpush1.msra.mxu0 %v2831_v38  ;;  %3943 = vmatpush1.msra.mxu1 %v2897_v46  ;;  %v2863_v38 = vld [vmem:[#allocation16 + $0x1140] sm:$0xff]  ;;  %v2929_v46 = vld [vmem:[#allocation16 + $0x1350] sm:$0xff] }
 0x7e4   :  { %3875 = vmatprep.subr.mxu0 %v2830_v5  ;;  %3944 = vmatprep.subr.mxu1 %v2896_v57  ;;  %v2862_v5 = vld [vmem:[#allocation16 + $0x1138] sm:$0xff]  ;;  %v2928_v57 = vld [vmem:[#allocation16 + $0x1348] sm:$0xff] }
 0x7e5   :  { %3876 = vmatpush1.msra.mxu0 %v2829_v58  ;;  %3945 = vmatpush1.msra.mxu1 %v2895_v6  ;;  %v2861_v58 = vld [vmem:[#allocation16 + $0x1130] sm:$0xff]  ;;  %v2927_v6 = vld [vmem:[#allocation16 + $0x1340] sm:$0xff] }
 0x7e6   :  { %3877 = vmatprep.subr.mxu0 %v2828_v7  ;;  %3946 = vmatprep.subr.mxu1 %v2894_v9  ;;  %v2860_v7 = vld [vmem:[#allocation16 + $0x1128] sm:$0xff]  ;;  %v2926_v9 = vld [vmem:[#allocation16 + $0x1338] sm:$0xff] }
 0x7e7   :  { %3878 = vmatpush1.msra.mxu0 %v2827_v8  ;;  %3947 = vmatpush1.msra.mxu1 %v2893_v40  ;;  %v2859_v8 = vld [vmem:[#allocation16 + $0x1120] sm:$0xff]  ;;  %v2925_v40 = vld [vmem:[#allocation16 + $0x1330] sm:$0xff] }
 0x7e8   :  { %3879 = vmatprep.subr.mxu0 %v2826_v10  ;;  %3948 = vmatprep.subr.mxu1 %v2892_v11  ;;  %v2858_v10 = vld [vmem:[#allocation16 + $0x1118] sm:$0xff]  ;;  %v2924_v11 = vld [vmem:[#allocation16 + $0x1328] sm:$0xff] }
 0x7e9   :  { %3880 = vmatpush1.msra.mxu0 %v2825_v12  ;;  %3949 = vmatpush1.msra.mxu1 %v2891_v13  ;;  %v2857_v12 = vld [vmem:[#allocation16 + $0x1110] sm:$0xff]  ;;  %v2923_v13 = vld [vmem:[#allocation16 + $0x1320] sm:$0xff] }
 0x7ea   :  { %3881 = vmatprep.subr.mxu0 %v2824_v14  ;;  %3950 = vmatprep.subr.mxu1 %v2890_v15  ;;  %v2856_v14 = vld [vmem:[#allocation16 + $0x1108] sm:$0xff]  ;;  %v2922_v15 = vld [vmem:[#allocation16 + $0x1318] sm:$0xff] }
 0x7eb   :  { %3882 = vmatpush1.msra.mxu0 %v2823_v16  ;;  %3951 = vmatpush1.msra.mxu1 %v2889_v17  ;;  %v2855_v16 = vld [vmem:[#allocation16 + $0x1100] sm:$0xff] }
 0x7ec   :  { %3883 = vmatprep.subr.mxu0 %v2886_v18  ;;  %3952 = vmatprep.subr.mxu1 %v2888_v19  ;;  %v2286_v17 = vld [vmem:[#allocation2 + $0x22] sm:$0x3]  ;;  %v2921_v18 = vld [vmem:[#allocation16 + $0x1310] sm:$0xff]  ;;  %v2284_v19 = vld [vmem:[#allocation2 + $0x20] sm:$0x3] }
 0x7ed   :  { %3884 = vmatpush2.msra.mxu0 %v2885_v28  ;;  %3953 = vmatpush1.msra.mxu1 %v2887_v21  ;;  %v2920_v28 = vld [vmem:[#allocation16 + $0x1308] sm:$0xff]  ;;  %v2982_v21 = vld [vmem:[#allocation16 + $0x14f8] sm:$0xff] }
 0x7ee   :  { %3885 = vmatprep.subr.mxu0 %v2884_v22  ;;  %3954 = vmatprep.subr.mxu1 %v2950_v23  ;;  %v2919_v22 = vld [vmem:[#allocation16 + $0x1300] sm:$0xff]  ;;  %v2290_v23 = vld [vmem:[#allocation2 + $0x26] sm:$0x3] }
 0x7ef   :  { %3886 = vmatpush2.msra.mxu0 %v2883_v41  ;;  %3955 = vmatpush2.msra.mxu1 %v2949_v24  ;;  %v2981_v41 = vld [vmem:[#allocation16 + $0x14f0] sm:$0xff]  ;;  %v2288_v24 = vld [vmem:[#allocation2 + $0x24] sm:$0x3] }
 0x7f0   :  { %3887 = vmatprep.subr.mxu0 %v2882_v25  ;;  %3956 = vmatprep.subr.mxu1 %v2948_v26  ;;  %v2980_v25 = vld [vmem:[#allocation16 + $0x14e8] sm:$0xff]  ;;  %v3046_v26 = vld [vmem:[#allocation16 + $0x16f8] sm:$0xff] }
 0x7f1   :  { %3888 = vmatpush2.msra.mxu0 %v2881_v27  ;;  %3957 = vmatpush2.msra.mxu1 %v2947_v31  ;;  %v2979_v27 = vld [vmem:[#allocation16 + $0x14e0] sm:$0xff]  ;;  %v3045_v31 = vld [vmem:[#allocation16 + $0x16f0] sm:$0xff] }
 0x7f2   :  { %3889 = vmatprep.subr.mxu0 %v2880_v36  ;;  %3958 = vmatprep.subr.mxu1 %v2946_v39  ;;  %v2978_v36 = vld [vmem:[#allocation16 + $0x14d8] sm:$0xff]  ;;  %v3044_v39 = vld [vmem:[#allocation16 + $0x16e8] sm:$0xff] }
 0x7f3   :  { %3890 = vmatpush2.msra.mxu0 %v2879_v32  ;;  %3959 = vmatpush2.msra.mxu1 %v2945_v42  ;;  %v2977_v32 = vld [vmem:[#allocation16 + $0x14d0] sm:$0xff]  ;;  %v3043_v42 = vld [vmem:[#allocation16 + $0x16e0] sm:$0xff] }
 0x7f4   :  { %3891 = vmatprep.subr.mxu0 %v2878_v30  ;;  %3960 = vmatprep.subr.mxu1 %v2944_v29  ;;  %v2976_v30 = vld [vmem:[#allocation16 + $0x14c8] sm:$0xff]  ;;  %v3042_v29 = vld [vmem:[#allocation16 + $0x16d8] sm:$0xff] }
 0x7f5   :  { %3892 = vmatpush2.msra.mxu0 %v2877_v33  ;;  %3961 = vmatpush2.msra.mxu1 %v2943_v35  ;;  %v2975_v33 = vld [vmem:[#allocation16 + $0x14c0] sm:$0xff]  ;;  %v3041_v35 = vld [vmem:[#allocation16 + $0x16d0] sm:$0xff] }
 0x7f6   :  { %3893 = vmatprep.subr.mxu0 %v2876_v47  ;;  %3962 = vmatprep.subr.mxu1 %v2942_v48  ;;  %v2974_v47 = vld [vmem:[#allocation16 + $0x14b8] sm:$0xff]  ;;  %v3040_v48 = vld [vmem:[#allocation16 + $0x16c8] sm:$0xff] }
 0x7f7   :  { %3894 = vmatpush2.msra.mxu0 %v2875_v49  ;;  %3963 = vmatpush2.msra.mxu1 %v2941_v43  ;;  %v2973_v49 = vld [vmem:[#allocation16 + $0x14b0] sm:$0xff]  ;;  %v3039_v43 = vld [vmem:[#allocation16 + $0x16c0] sm:$0xff] }
 0x7f8   :  { %3895 = vmatprep.subr.mxu0 %v2874_v44  ;;  %3964 = vmatprep.subr.mxu1 %v2940_v51  ;;  %v2972_v44 = vld [vmem:[#allocation16 + $0x14a8] sm:$0xff]  ;;  %v3038_v51 = vld [vmem:[#allocation16 + $0x16b8] sm:$0xff] }
 0x7f9   :  { %3896 = vmatpush2.msra.mxu0 %v2873_v53  ;;  %3965 = vmatpush2.msra.mxu1 %v2939_v54  ;;  %v2971_v53 = vld [vmem:[#allocation16 + $0x14a0] sm:$0xff]  ;;  %v3037_v54 = vld [vmem:[#allocation16 + $0x16b0] sm:$0xff] }
 0x7fa   :  { %3897 = vmatprep.subr.mxu0 %v2872_v45  ;;  %3966 = vmatprep.subr.mxu1 %v2938_v50  ;;  %v2970_v45 = vld [vmem:[#allocation16 + $0x1498] sm:$0xff]  ;;  %v3036_v50 = vld [vmem:[#allocation16 + $0x16a8] sm:$0xff] }
 0x7fb   :  { %3898 = vmatpush2.msra.mxu0 %v2871_v52  ;;  %3967 = vmatpush2.msra.mxu1 %v2937_v56  ;;  %v2969_v52 = vld [vmem:[#allocation16 + $0x1490] sm:$0xff]  ;;  %v3035_v56 = vld [vmem:[#allocation16 + $0x16a0] sm:$0xff] }
 0x7fc   :  { %3899 = vmatprep.subr.mxu0 %v2870_v34  ;;  %3968 = vmatprep.subr.mxu1 %v2936_v55  ;;  %v2968_v34 = vld [vmem:[#allocation16 + $0x1488] sm:$0xff]  ;;  %v3034_v55 = vld [vmem:[#allocation16 + $0x1698] sm:$0xff] }
 0x7fd   :  { %3900 = vmatpush2.msra.mxu0 %v2869_v37  ;;  %3969 = vmatpush2.msra.mxu1 %v2935_v59  ;;  %v2967_v37 = vld [vmem:[#allocation16 + $0x1480] sm:$0xff]  ;;  %v3033_v59 = vld [vmem:[#allocation16 + $0x1690] sm:$0xff] }
 0x7fe   :  { %3901 = vmatprep.subr.mxu0 %v2868_v60  ;;  %3970 = vmatprep.subr.mxu1 %v2934_v61  ;;  %v2966_v60 = vld [vmem:[#allocation16 + $0x1478] sm:$0xff]  ;;  %v3032_v61 = vld [vmem:[#allocation16 + $0x1688] sm:$0xff] }
 0x7ff   :  { %3902 = vmatpush2.msra.mxu0 %v2867_v62  ;;  %3971 = vmatpush2.msra.mxu1 %v2933_v63  ;;  %v2965_v62 = vld [vmem:[#allocation16 + $0x1470] sm:$0xff]  ;;  %v3031_v63 = vld [vmem:[#allocation16 + $0x1680] sm:$0xff] }
 0x800   :  { %3903 = vmatprep.subr.mxu0 %v2866_v0  ;;  %3972 = vmatprep.subr.mxu1 %v2932_v1  ;;  %v2964_v0 = vld [vmem:[#allocation16 + $0x1468] sm:$0xff]  ;;  %v3030_v1 = vld [vmem:[#allocation16 + $0x1678] sm:$0xff] }
 0x801   :  { %3904 = vmatpush2.msra.mxu0 %v2865_v2  ;;  %3973 = vmatpush2.msra.mxu1 %v2931_v3  ;;  %v2963_v2 = vld [vmem:[#allocation16 + $0x1460] sm:$0xff]  ;;  %v3029_v3 = vld [vmem:[#allocation16 + $0x1670] sm:$0xff] }
 0x802   :  { %3905 = vmatprep.subr.mxu0 %v2864_v4  ;;  %3974 = vmatprep.subr.mxu1 %v2930_v20  ;;  %v2962_v4 = vld [vmem:[#allocation16 + $0x1458] sm:$0xff]  ;;  %v3028_v20 = vld [vmem:[#allocation16 + $0x1668] sm:$0xff] }
 0x803   :  { %3906 = vmatpush2.msra.mxu0 %v2863_v38  ;;  %3975 = vmatpush2.msra.mxu1 %v2929_v46  ;;  %v2961_v38 = vld [vmem:[#allocation16 + $0x1450] sm:$0xff]  ;;  %v3027_v46 = vld [vmem:[#allocation16 + $0x1660] sm:$0xff] }
 0x804   :  { %3907 = vmatprep.subr.mxu0 %v2862_v5  ;;  %3976 = vmatprep.subr.mxu1 %v2928_v57  ;;  %v2960_v5 = vld [vmem:[#allocation16 + $0x1448] sm:$0xff]  ;;  %v3026_v57 = vld [vmem:[#allocation16 + $0x1658] sm:$0xff] }
 0x805   :  { %3908 = vmatpush2.msra.mxu0 %v2861_v58  ;;  %3977 = vmatpush2.msra.mxu1 %v2927_v6  ;;  %v2959_v58 = vld [vmem:[#allocation16 + $0x1440] sm:$0xff]  ;;  %v3025_v6 = vld [vmem:[#allocation16 + $0x1650] sm:$0xff] }
 0x806   :  { %3909 = vmatprep.subr.mxu0 %v2860_v7  ;;  %3978 = vmatprep.subr.mxu1 %v2926_v9  ;;  %v2958_v7 = vld [vmem:[#allocation16 + $0x1438] sm:$0xff]  ;;  %v3024_v9 = vld [vmem:[#allocation16 + $0x1648] sm:$0xff] }
 0x807   :  { %3910 = vmatpush2.msra.mxu0 %v2859_v8  ;;  %3979 = vmatpush2.msra.mxu1 %v2925_v40  ;;  %v2957_v8 = vld [vmem:[#allocation16 + $0x1430] sm:$0xff]  ;;  %v3023_v40 = vld [vmem:[#allocation16 + $0x1640] sm:$0xff] }
 0x808   :  { %3911 = vmatprep.subr.mxu0 %v2858_v10  ;;  %3980 = vmatprep.subr.mxu1 %v2924_v11  ;;  %v2956_v10 = vld [vmem:[#allocation16 + $0x1428] sm:$0xff]  ;;  %v3022_v11 = vld [vmem:[#allocation16 + $0x1638] sm:$0xff] }
 0x809   :  { %3912 = vmatpush2.msra.mxu0 %v2857_v12  ;;  %3981 = vmatpush2.msra.mxu1 %v2923_v13  ;;  %v2955_v12 = vld [vmem:[#allocation16 + $0x1420] sm:$0xff]  ;;  %v3021_v13 = vld [vmem:[#allocation16 + $0x1630] sm:$0xff] }
 0x80a   :  { %3913 = vmatprep.subr.mxu0 %v2856_v14  ;;  %3982 = vmatprep.subr.mxu1 %v2922_v15  ;;  %v2954_v14 = vld [vmem:[#allocation16 + $0x1418] sm:$0xff]  ;;  %v3020_v15 = vld [vmem:[#allocation16 + $0x1628] sm:$0xff] }
 0x80b   :  { %3914 = vmatpush2.msra.mxu0 %v2855_v16  ;;  %3915 = vmatprep.mubr.f32.mxu0 %v2286_v17  ;;  %v2953_v16 = vld [vmem:[#allocation16 + $0x1410] sm:$0xff]  ;;  %v3019_v17 = vld [vmem:[#allocation16 + $0x1620] sm:$0xff] }
 0x80c   :  { %3983 = vmatpush2.msra.mxu1 %v2921_v18  ;;  %3916 = vmatmul.mubr.f32.vlgmr.msra.gmra.mxu0 %v2284_v19  ;;  %v2952_v18 = vld [vmem:[#allocation16 + $0x1408] sm:$0xff]  ;;  %v3018_v19 = vld [vmem:[#allocation16 + $0x1618] sm:$0xff] }
 0x80d   :  { %3984 = vmatprep.subr.mxu1 %v2920_v28  ;;  %3993 = vmatprep.subr.mxu0 %v2982_v21  ;;  %v2951_v28 = vld [vmem:[#allocation16 + $0x1400] sm:$0xff]  ;;  %v3017_v21 = vld [vmem:[#allocation16 + $0x1610] sm:$0xff] }
 0x80e   :  { %3985 = vmatpush2.msra.mxu1 %v2919_v22  ;;  %3986 = vmatprep.mubr.f32.mxu1 %v2290_v23  ;;  %v3014_v22 = vld [vmem:[#allocation16 + $0x15f8] sm:$0xff]  ;;  %v3016_v23 = vld [vmem:[#allocation16 + $0x1608] sm:$0xff] }
 0x80f   :  { %3994 = vmatpush1.msra.mxu0 %v2981_v41  ;;  %3987 = vmatmul.mubr.f32.vlgmr.msra.gmra.mxu1 %v2288_v24  ;;  %v3013_v41 = vld [vmem:[#allocation16 + $0x15f0] sm:$0xff]  ;;  %v3015_v24 = vld [vmem:[#allocation16 + $0x1600] sm:$0xff] }
 0x810   :  { %3995 = vmatprep.subr.mxu0 %v2980_v25  ;;  %4064 = vmatprep.subr.mxu1 %v3046_v26  ;;  %v3012_v25 = vld [vmem:[#allocation16 + $0x15e8] sm:$0xff]  ;;  %v3078_v26 = vld [vmem:[#allocation16 + $0x17f8] sm:$0xff] }
 0x811   :  { %3996 = vmatpush1.msra.mxu0 %v2979_v27  ;;  %4065 = vmatpush1.msra.mxu1 %v3045_v31  ;;  %v3011_v27 = vld [vmem:[#allocation16 + $0x15e0] sm:$0xff]  ;;  %v3077_v31 = vld [vmem:[#allocation16 + $0x17f0] sm:$0xff] }
 0x812   :  { %3997 = vmatprep.subr.mxu0 %v2978_v36  ;;  %4066 = vmatprep.subr.mxu1 %v3044_v39  ;;  %v3010_v36 = vld [vmem:[#allocation16 + $0x15d8] sm:$0xff]  ;;  %v3076_v39 = vld [vmem:[#allocation16 + $0x17e8] sm:$0xff] }
 0x813   :  { %3998 = vmatpush1.msra.mxu0 %v2977_v32  ;;  %4067 = vmatpush1.msra.mxu1 %v3043_v42  ;;  %v3009_v32 = vld [vmem:[#allocation16 + $0x15d0] sm:$0xff]  ;;  %v3075_v42 = vld [vmem:[#allocation16 + $0x17e0] sm:$0xff] }
 0x814   :  { %3999 = vmatprep.subr.mxu0 %v2976_v30  ;;  %4068 = vmatprep.subr.mxu1 %v3042_v29  ;;  %v3008_v30 = vld [vmem:[#allocation16 + $0x15c8] sm:$0xff]  ;;  %v3074_v29 = vld [vmem:[#allocation16 + $0x17d8] sm:$0xff] }
 0x815   :  { %4000 = vmatpush1.msra.mxu0 %v2975_v33  ;;  %4069 = vmatpush1.msra.mxu1 %v3041_v35  ;;  %v3007_v33 = vld [vmem:[#allocation16 + $0x15c0] sm:$0xff]  ;;  %v3073_v35 = vld [vmem:[#allocation16 + $0x17d0] sm:$0xff] }
 0x816   :  { %4001 = vmatprep.subr.mxu0 %v2974_v47  ;;  %4070 = vmatprep.subr.mxu1 %v3040_v48  ;;  %v3006_v47 = vld [vmem:[#allocation16 + $0x15b8] sm:$0xff]  ;;  %v3072_v48 = vld [vmem:[#allocation16 + $0x17c8] sm:$0xff] }
 0x817   :  { %4002 = vmatpush1.msra.mxu0 %v2973_v49  ;;  %4071 = vmatpush1.msra.mxu1 %v3039_v43  ;;  %v3005_v49 = vld [vmem:[#allocation16 + $0x15b0] sm:$0xff]  ;;  %v3071_v43 = vld [vmem:[#allocation16 + $0x17c0] sm:$0xff] }
 0x818   :  { %4003 = vmatprep.subr.mxu0 %v2972_v44  ;;  %4072 = vmatprep.subr.mxu1 %v3038_v51  ;;  %v3004_v44 = vld [vmem:[#allocation16 + $0x15a8] sm:$0xff]  ;;  %v3070_v51 = vld [vmem:[#allocation16 + $0x17b8] sm:$0xff] }
 0x819   :  { %4004 = vmatpush1.msra.mxu0 %v2971_v53  ;;  %4073 = vmatpush1.msra.mxu1 %v3037_v54  ;;  %v3003_v53 = vld [vmem:[#allocation16 + $0x15a0] sm:$0xff]  ;;  %v3069_v54 = vld [vmem:[#allocation16 + $0x17b0] sm:$0xff] }
 0x81a   :  { %4005 = vmatprep.subr.mxu0 %v2970_v45  ;;  %4074 = vmatprep.subr.mxu1 %v3036_v50  ;;  %v3002_v45 = vld [vmem:[#allocation16 + $0x1598] sm:$0xff]  ;;  %v3068_v50 = vld [vmem:[#allocation16 + $0x17a8] sm:$0xff] }
 0x81b   :  { %4006 = vmatpush1.msra.mxu0 %v2969_v52  ;;  %4075 = vmatpush1.msra.mxu1 %v3035_v56  ;;  %v3001_v52 = vld [vmem:[#allocation16 + $0x1590] sm:$0xff]  ;;  %v3067_v56 = vld [vmem:[#allocation16 + $0x17a0] sm:$0xff] }
 0x81c   :  { %4007 = vmatprep.subr.mxu0 %v2968_v34  ;;  %4076 = vmatprep.subr.mxu1 %v3034_v55  ;;  %v3000_v34 = vld [vmem:[#allocation16 + $0x1588] sm:$0xff]  ;;  %v3066_v55 = vld [vmem:[#allocation16 + $0x1798] sm:$0xff] }
 0x81d   :  { %4008 = vmatpush1.msra.mxu0 %v2967_v37  ;;  %4077 = vmatpush1.msra.mxu1 %v3033_v59  ;;  %v2999_v37 = vld [vmem:[#allocation16 + $0x1580] sm:$0xff]  ;;  %v3065_v59 = vld [vmem:[#allocation16 + $0x1790] sm:$0xff] }
 0x81e   :  { %4009 = vmatprep.subr.mxu0 %v2966_v60  ;;  %4078 = vmatprep.subr.mxu1 %v3032_v61  ;;  %v2998_v60 = vld [vmem:[#allocation16 + $0x1578] sm:$0xff]  ;;  %v3064_v61 = vld [vmem:[#allocation16 + $0x1788] sm:$0xff] }
 0x81f   :  { %4010 = vmatpush1.msra.mxu0 %v2965_v62  ;;  %4079 = vmatpush1.msra.mxu1 %v3031_v63  ;;  %v2997_v62 = vld [vmem:[#allocation16 + $0x1570] sm:$0xff]  ;;  %v3063_v63 = vld [vmem:[#allocation16 + $0x1780] sm:$0xff] }
 0x820   :  { %4011 = vmatprep.subr.mxu0 %v2964_v0  ;;  %4080 = vmatprep.subr.mxu1 %v3030_v1  ;;  %v2996_v0 = vld [vmem:[#allocation16 + $0x1568] sm:$0xff]  ;;  %v3062_v1 = vld [vmem:[#allocation16 + $0x1778] sm:$0xff] }
 0x821   :  { %4012 = vmatpush1.msra.mxu0 %v2963_v2  ;;  %4081 = vmatpush1.msra.mxu1 %v3029_v3  ;;  %v2995_v2 = vld [vmem:[#allocation16 + $0x1560] sm:$0xff]  ;;  %v3061_v3 = vld [vmem:[#allocation16 + $0x1770] sm:$0xff] }
 0x822   :  { %4013 = vmatprep.subr.mxu0 %v2962_v4  ;;  %4082 = vmatprep.subr.mxu1 %v3028_v20  ;;  %v2994_v4 = vld [vmem:[#allocation16 + $0x1558] sm:$0xff]  ;;  %v3060_v20 = vld [vmem:[#allocation16 + $0x1768] sm:$0xff] }
 0x823   :  { %4014 = vmatpush1.msra.mxu0 %v2961_v38  ;;  %4083 = vmatpush1.msra.mxu1 %v3027_v46  ;;  %v2993_v38 = vld [vmem:[#allocation16 + $0x1550] sm:$0xff]  ;;  %v3059_v46 = vld [vmem:[#allocation16 + $0x1760] sm:$0xff] }
 0x824   :  { %4015 = vmatprep.subr.mxu0 %v2960_v5  ;;  %4084 = vmatprep.subr.mxu1 %v3026_v57  ;;  %v2992_v5 = vld [vmem:[#allocation16 + $0x1548] sm:$0xff]  ;;  %v3058_v57 = vld [vmem:[#allocation16 + $0x1758] sm:$0xff] }
 0x825   :  { %4016 = vmatpush1.msra.mxu0 %v2959_v58  ;;  %4085 = vmatpush1.msra.mxu1 %v3025_v6  ;;  %v2991_v58 = vld [vmem:[#allocation16 + $0x1540] sm:$0xff]  ;;  %v3057_v6 = vld [vmem:[#allocation16 + $0x1750] sm:$0xff] }
 0x826   :  { %4017 = vmatprep.subr.mxu0 %v2958_v7  ;;  %4086 = vmatprep.subr.mxu1 %v3024_v9  ;;  %v2990_v7 = vld [vmem:[#allocation16 + $0x1538] sm:$0xff]  ;;  %v3056_v9 = vld [vmem:[#allocation16 + $0x1748] sm:$0xff] }
 0x827   :  { %4018 = vmatpush1.msra.mxu0 %v2957_v8  ;;  %4087 = vmatpush1.msra.mxu1 %v3023_v40  ;;  %v2989_v8 = vld [vmem:[#allocation16 + $0x1530] sm:$0xff]  ;;  %v3055_v40 = vld [vmem:[#allocation16 + $0x1740] sm:$0xff] }
 0x828   :  { %4019 = vmatprep.subr.mxu0 %v2956_v10  ;;  %4088 = vmatprep.subr.mxu1 %v3022_v11  ;;  %v2988_v10 = vld [vmem:[#allocation16 + $0x1528] sm:$0xff]  ;;  %v3054_v11 = vld [vmem:[#allocation16 + $0x1738] sm:$0xff] }
 0x829   :  { %4020 = vmatpush1.msra.mxu0 %v2955_v12  ;;  %4089 = vmatpush1.msra.mxu1 %v3021_v13  ;;  %v2987_v12 = vld [vmem:[#allocation16 + $0x1520] sm:$0xff]  ;;  %v3053_v13 = vld [vmem:[#allocation16 + $0x1730] sm:$0xff] }
 0x82a   :  { %4021 = vmatprep.subr.mxu0 %v2954_v14  ;;  %4090 = vmatprep.subr.mxu1 %v3020_v15  ;;  %v2986_v14 = vld [vmem:[#allocation16 + $0x1518] sm:$0xff]  ;;  %v3052_v15 = vld [vmem:[#allocation16 + $0x1728] sm:$0xff] }
 0x82b   :  { %4022 = vmatpush1.msra.mxu0 %v2953_v16  ;;  %4091 = vmatpush1.msra.mxu1 %v3019_v17  ;;  %v2985_v16 = vld [vmem:[#allocation16 + $0x1510] sm:$0xff]  ;;  %v3051_v17 = vld [vmem:[#allocation16 + $0x1720] sm:$0xff] }
 0x82c   :  { %4023 = vmatprep.subr.mxu0 %v2952_v18  ;;  %4092 = vmatprep.subr.mxu1 %v3018_v19  ;;  %v2984_v18 = vld [vmem:[#allocation16 + $0x1508] sm:$0xff]  ;;  %v3050_v19 = vld [vmem:[#allocation16 + $0x1718] sm:$0xff] }
 0x82d   :  { %4024 = vmatpush1.msra.mxu0 %v2951_v28  ;;  %4093 = vmatpush1.msra.mxu1 %v3017_v21  ;;  %v2983_v28 = vld [vmem:[#allocation16 + $0x1500] sm:$0xff]  ;;  %v2294_v21 = vld [vmem:[#allocation2 + $0x2a] sm:$0x3] }
 0x82e   :  { %4025 = vmatprep.subr.mxu0 %v3014_v22  ;;  %4094 = vmatprep.subr.mxu1 %v3016_v23  ;;  %v3049_v22 = vld [vmem:[#allocation16 + $0x1710] sm:$0xff]  ;;  %v2292_v23 = vld [vmem:[#allocation2 + $0x28] sm:$0x3] }
 0x82f   :  { %4026 = vmatpush2.msra.mxu0 %v3013_v41  ;;  %4095 = vmatpush1.msra.mxu1 %v3015_v24  ;;  %v3048_v41 = vld [vmem:[#allocation16 + $0x1708] sm:$0xff]  ;;  %v3110_v24 = vld [vmem:[#allocation16 + $0x18f8] sm:$0xff] }
 0x830   :  { %4027 = vmatprep.subr.mxu0 %v3012_v25  ;;  %4096 = vmatprep.subr.mxu1 %v3078_v26  ;;  %v3047_v25 = vld [vmem:[#allocation16 + $0x1700] sm:$0xff]  ;;  %v2298_v26 = vld [vmem:[#allocation2 + $0x2e] sm:$0x3] }
 0x831   :  { %4028 = vmatpush2.msra.mxu0 %v3011_v27  ;;  %4097 = vmatpush2.msra.mxu1 %v3077_v31  ;;  %v3109_v27 = vld [vmem:[#allocation16 + $0x18f0] sm:$0xff]  ;;  %v2296_v31 = vld [vmem:[#allocation2 + $0x2c] sm:$0x3] }
 0x832   :  { %4029 = vmatprep.subr.mxu0 %v3010_v36  ;;  %4098 = vmatprep.subr.mxu1 %v3076_v39  ;;  %v3108_v36 = vld [vmem:[#allocation16 + $0x18e8] sm:$0xff]  ;;  %v3174_v39 = vld [vmem:[#allocation16 + $0x1af8] sm:$0xff] }
 0x833   :  { %4030 = vmatpush2.msra.mxu0 %v3009_v32  ;;  %4099 = vmatpush2.msra.mxu1 %v3075_v42  ;;  %v3107_v32 = vld [vmem:[#allocation16 + $0x18e0] sm:$0xff]  ;;  %v3173_v42 = vld [vmem:[#allocation16 + $0x1af0] sm:$0xff] }
 0x834   :  { %4031 = vmatprep.subr.mxu0 %v3008_v30  ;;  %4100 = vmatprep.subr.mxu1 %v3074_v29  ;;  %v3106_v30 = vld [vmem:[#allocation16 + $0x18d8] sm:$0xff]  ;;  %v3172_v29 = vld [vmem:[#allocation16 + $0x1ae8] sm:$0xff] }
 0x835   :  { %4032 = vmatpush2.msra.mxu0 %v3007_v33  ;;  %4101 = vmatpush2.msra.mxu1 %v3073_v35  ;;  %v3105_v33 = vld [vmem:[#allocation16 + $0x18d0] sm:$0xff]  ;;  %v3171_v35 = vld [vmem:[#allocation16 + $0x1ae0] sm:$0xff] }
 0x836   :  { %4033 = vmatprep.subr.mxu0 %v3006_v47  ;;  %4102 = vmatprep.subr.mxu1 %v3072_v48  ;;  %v3104_v47 = vld [vmem:[#allocation16 + $0x18c8] sm:$0xff]  ;;  %v3170_v48 = vld [vmem:[#allocation16 + $0x1ad8] sm:$0xff] }
 0x837   :  { %4034 = vmatpush2.msra.mxu0 %v3005_v49  ;;  %4103 = vmatpush2.msra.mxu1 %v3071_v43  ;;  %v3103_v49 = vld [vmem:[#allocation16 + $0x18c0] sm:$0xff]  ;;  %v3169_v43 = vld [vmem:[#allocation16 + $0x1ad0] sm:$0xff] }
 0x838   :  { %4035 = vmatprep.subr.mxu0 %v3004_v44  ;;  %4104 = vmatprep.subr.mxu1 %v3070_v51  ;;  %v3102_v44 = vld [vmem:[#allocation16 + $0x18b8] sm:$0xff]  ;;  %v3168_v51 = vld [vmem:[#allocation16 + $0x1ac8] sm:$0xff] }
 0x839   :  { %4036 = vmatpush2.msra.mxu0 %v3003_v53  ;;  %4105 = vmatpush2.msra.mxu1 %v3069_v54  ;;  %v3101_v53 = vld [vmem:[#allocation16 + $0x18b0] sm:$0xff]  ;;  %v3167_v54 = vld [vmem:[#allocation16 + $0x1ac0] sm:$0xff] }
 0x83a   :  { %4037 = vmatprep.subr.mxu0 %v3002_v45  ;;  %4106 = vmatprep.subr.mxu1 %v3068_v50  ;;  %v3100_v45 = vld [vmem:[#allocation16 + $0x18a8] sm:$0xff]  ;;  %v3166_v50 = vld [vmem:[#allocation16 + $0x1ab8] sm:$0xff] }
 0x83b   :  { %4038 = vmatpush2.msra.mxu0 %v3001_v52  ;;  %4107 = vmatpush2.msra.mxu1 %v3067_v56  ;;  %v3099_v52 = vld [vmem:[#allocation16 + $0x18a0] sm:$0xff]  ;;  %v3165_v56 = vld [vmem:[#allocation16 + $0x1ab0] sm:$0xff] }
 0x83c   :  { %4039 = vmatprep.subr.mxu0 %v3000_v34  ;;  %4108 = vmatprep.subr.mxu1 %v3066_v55  ;;  %v3098_v34 = vld [vmem:[#allocation16 + $0x1898] sm:$0xff]  ;;  %v3164_v55 = vld [vmem:[#allocation16 + $0x1aa8] sm:$0xff] }
 0x83d   :  { %4040 = vmatpush2.msra.mxu0 %v2999_v37  ;;  %4109 = vmatpush2.msra.mxu1 %v3065_v59  ;;  %v3097_v37 = vld [vmem:[#allocation16 + $0x1890] sm:$0xff]  ;;  %v3163_v59 = vld [vmem:[#allocation16 + $0x1aa0] sm:$0xff] }
 0x83e   :  { %4041 = vmatprep.subr.mxu0 %v2998_v60  ;;  %4110 = vmatprep.subr.mxu1 %v3064_v61  ;;  %v3096_v60 = vld [vmem:[#allocation16 + $0x1888] sm:$0xff]  ;;  %v3162_v61 = vld [vmem:[#allocation16 + $0x1a98] sm:$0xff] }
 0x83f   :  { %4042 = vmatpush2.msra.mxu0 %v2997_v62  ;;  %4111 = vmatpush2.msra.mxu1 %v3063_v63  ;;  %v3095_v62 = vld [vmem:[#allocation16 + $0x1880] sm:$0xff]  ;;  %v3161_v63 = vld [vmem:[#allocation16 + $0x1a90] sm:$0xff] }
 0x840   :  { %4043 = vmatprep.subr.mxu0 %v2996_v0  ;;  %4112 = vmatprep.subr.mxu1 %v3062_v1  ;;  %v3094_v0 = vld [vmem:[#allocation16 + $0x1878] sm:$0xff]  ;;  %v3160_v1 = vld [vmem:[#allocation16 + $0x1a88] sm:$0xff] }
 0x841   :  { %4044 = vmatpush2.msra.mxu0 %v2995_v2  ;;  %4113 = vmatpush2.msra.mxu1 %v3061_v3  ;;  %v3093_v2 = vld [vmem:[#allocation16 + $0x1870] sm:$0xff]  ;;  %v3159_v3 = vld [vmem:[#allocation16 + $0x1a80] sm:$0xff] }
 0x842   :  { %4045 = vmatprep.subr.mxu0 %v2994_v4  ;;  %4114 = vmatprep.subr.mxu1 %v3060_v20  ;;  %v3092_v4 = vld [vmem:[#allocation16 + $0x1868] sm:$0xff]  ;;  %v3158_v20 = vld [vmem:[#allocation16 + $0x1a78] sm:$0xff] }
 0x843   :  { %4046 = vmatpush2.msra.mxu0 %v2993_v38  ;;  %4115 = vmatpush2.msra.mxu1 %v3059_v46  ;;  %v3091_v38 = vld [vmem:[#allocation16 + $0x1860] sm:$0xff]  ;;  %v3157_v46 = vld [vmem:[#allocation16 + $0x1a70] sm:$0xff] }
 0x844   :  { %4047 = vmatprep.subr.mxu0 %v2992_v5  ;;  %4116 = vmatprep.subr.mxu1 %v3058_v57  ;;  %v3090_v5 = vld [vmem:[#allocation16 + $0x1858] sm:$0xff]  ;;  %v3156_v57 = vld [vmem:[#allocation16 + $0x1a68] sm:$0xff] }
 0x845   :  { %4048 = vmatpush2.msra.mxu0 %v2991_v58  ;;  %4117 = vmatpush2.msra.mxu1 %v3057_v6  ;;  %v3089_v58 = vld [vmem:[#allocation16 + $0x1850] sm:$0xff]  ;;  %v3155_v6 = vld [vmem:[#allocation16 + $0x1a60] sm:$0xff] }
 0x846   :  { %4049 = vmatprep.subr.mxu0 %v2990_v7  ;;  %4118 = vmatprep.subr.mxu1 %v3056_v9  ;;  %v3088_v7 = vld [vmem:[#allocation16 + $0x1848] sm:$0xff]  ;;  %v3154_v9 = vld [vmem:[#allocation16 + $0x1a58] sm:$0xff] }
 0x847   :  { %4050 = vmatpush2.msra.mxu0 %v2989_v8  ;;  %4119 = vmatpush2.msra.mxu1 %v3055_v40  ;;  %v3087_v8 = vld [vmem:[#allocation16 + $0x1840] sm:$0xff]  ;;  %v3153_v40 = vld [vmem:[#allocation16 + $0x1a50] sm:$0xff] }
 0x848   :  { %4051 = vmatprep.subr.mxu0 %v2988_v10  ;;  %4120 = vmatprep.subr.mxu1 %v3054_v11  ;;  %v3086_v10 = vld [vmem:[#allocation16 + $0x1838] sm:$0xff]  ;;  %v3152_v11 = vld [vmem:[#allocation16 + $0x1a48] sm:$0xff] }
 0x849   :  { %4052 = vmatpush2.msra.mxu0 %v2987_v12  ;;  %4121 = vmatpush2.msra.mxu1 %v3053_v13  ;;  %v3085_v12 = vld [vmem:[#allocation16 + $0x1830] sm:$0xff]  ;;  %v3151_v13 = vld [vmem:[#allocation16 + $0x1a40] sm:$0xff] }
 0x84a   :  { %4053 = vmatprep.subr.mxu0 %v2986_v14  ;;  %4122 = vmatprep.subr.mxu1 %v3052_v15  ;;  %v3084_v14 = vld [vmem:[#allocation16 + $0x1828] sm:$0xff]  ;;  %v3150_v15 = vld [vmem:[#allocation16 + $0x1a38] sm:$0xff] }
 0x84b   :  { %4054 = vmatpush2.msra.mxu0 %v2985_v16  ;;  %4123 = vmatpush2.msra.mxu1 %v3051_v17  ;;  %v3083_v16 = vld [vmem:[#allocation16 + $0x1820] sm:$0xff]  ;;  %v3149_v17 = vld [vmem:[#allocation16 + $0x1a30] sm:$0xff] }
 0x84c   :  { %4055 = vmatprep.subr.mxu0 %v2984_v18  ;;  %4124 = vmatprep.subr.mxu1 %v3050_v19  ;;  %v3082_v18 = vld [vmem:[#allocation16 + $0x1818] sm:$0xff]  ;;  %v3148_v19 = vld [vmem:[#allocation16 + $0x1a28] sm:$0xff] }
 0x84d   :  { %4056 = vmatpush2.msra.mxu0 %v2983_v28  ;;  %4057 = vmatprep.mubr.f32.mxu0 %v2294_v21  ;;  %v3081_v28 = vld [vmem:[#allocation16 + $0x1810] sm:$0xff]  ;;  %v3147_v21 = vld [vmem:[#allocation16 + $0x1a20] sm:$0xff] }
 0x84e   :  { %4125 = vmatpush2.msra.mxu1 %v3049_v22  ;;  %4058 = vmatmul.mubr.f32.vlgmr.msra.gmra.mxu0 %v2292_v23  ;;  %v3080_v22 = vld [vmem:[#allocation16 + $0x1808] sm:$0xff]  ;;  %v3146_v23 = vld [vmem:[#allocation16 + $0x1a18] sm:$0xff] }
 0x84f   :  { %4126 = vmatprep.subr.mxu1 %v3048_v41  ;;  %4135 = vmatprep.subr.mxu0 %v3110_v24  ;;  %v3079_v41 = vld [vmem:[#allocation16 + $0x1800] sm:$0xff]  ;;  %v3145_v24 = vld [vmem:[#allocation16 + $0x1a10] sm:$0xff] }
 0x850   :  { %4127 = vmatpush2.msra.mxu1 %v3047_v25  ;;  %4128 = vmatprep.mubr.f32.mxu1 %v2298_v26  ;;  %v3142_v25 = vld [vmem:[#allocation16 + $0x19f8] sm:$0xff]  ;;  %v3144_v26 = vld [vmem:[#allocation16 + $0x1a08] sm:$0xff] }
 0x851   :  { %4136 = vmatpush1.msra.mxu0 %v3109_v27  ;;  %4129 = vmatmul.mubr.f32.vlgmr.msra.gmra.mxu1 %v2296_v31  ;;  %v3141_v27 = vld [vmem:[#allocation16 + $0x19f0] sm:$0xff]  ;;  %v3143_v31 = vld [vmem:[#allocation16 + $0x1a00] sm:$0xff] }
 0x852   :  { %4137 = vmatprep.subr.mxu0 %v3108_v36  ;;  %4206 = vmatprep.subr.mxu1 %v3174_v39  ;;  %v3140_v36 = vld [vmem:[#allocation16 + $0x19e8] sm:$0xff]  ;;  %v3206_v39 = vld [vmem:[#allocation16 + $0x1bf8] sm:$0xff] }
 0x853   :  { %4138 = vmatpush1.msra.mxu0 %v3107_v32  ;;  %4207 = vmatpush1.msra.mxu1 %v3173_v42  ;;  %v3139_v32 = vld [vmem:[#allocation16 + $0x19e0] sm:$0xff]  ;;  %v3205_v42 = vld [vmem:[#allocation16 + $0x1bf0] sm:$0xff] }
 0x854   :  { %4139 = vmatprep.subr.mxu0 %v3106_v30  ;;  %4208 = vmatprep.subr.mxu1 %v3172_v29  ;;  %v3138_v30 = vld [vmem:[#allocation16 + $0x19d8] sm:$0xff]  ;;  %v3204_v29 = vld [vmem:[#allocation16 + $0x1be8] sm:$0xff] }
 0x855   :  { %4140 = vmatpush1.msra.mxu0 %v3105_v33  ;;  %4209 = vmatpush1.msra.mxu1 %v3171_v35  ;;  %v3137_v33 = vld [vmem:[#allocation16 + $0x19d0] sm:$0xff]  ;;  %v3203_v35 = vld [vmem:[#allocation16 + $0x1be0] sm:$0xff] }
 0x856   :  { %4141 = vmatprep.subr.mxu0 %v3104_v47  ;;  %4210 = vmatprep.subr.mxu1 %v3170_v48  ;;  %v3136_v47 = vld [vmem:[#allocation16 + $0x19c8] sm:$0xff]  ;;  %v3202_v48 = vld [vmem:[#allocation16 + $0x1bd8] sm:$0xff] }
 0x857   :  { %4142 = vmatpush1.msra.mxu0 %v3103_v49  ;;  %4211 = vmatpush1.msra.mxu1 %v3169_v43  ;;  %v3135_v49 = vld [vmem:[#allocation16 + $0x19c0] sm:$0xff]  ;;  %v3201_v43 = vld [vmem:[#allocation16 + $0x1bd0] sm:$0xff] }
 0x858   :  { %4143 = vmatprep.subr.mxu0 %v3102_v44  ;;  %4212 = vmatprep.subr.mxu1 %v3168_v51  ;;  %v3134_v44 = vld [vmem:[#allocation16 + $0x19b8] sm:$0xff]  ;;  %v3200_v51 = vld [vmem:[#allocation16 + $0x1bc8] sm:$0xff] }
 0x859   :  { %4144 = vmatpush1.msra.mxu0 %v3101_v53  ;;  %4213 = vmatpush1.msra.mxu1 %v3167_v54  ;;  %v3133_v53 = vld [vmem:[#allocation16 + $0x19b0] sm:$0xff]  ;;  %v3199_v54 = vld [vmem:[#allocation16 + $0x1bc0] sm:$0xff] }
 0x85a   :  { %4145 = vmatprep.subr.mxu0 %v3100_v45  ;;  %4214 = vmatprep.subr.mxu1 %v3166_v50  ;;  %v3132_v45 = vld [vmem:[#allocation16 + $0x19a8] sm:$0xff]  ;;  %v3198_v50 = vld [vmem:[#allocation16 + $0x1bb8] sm:$0xff] }
 0x85b   :  { %4146 = vmatpush1.msra.mxu0 %v3099_v52  ;;  %4215 = vmatpush1.msra.mxu1 %v3165_v56  ;;  %v3131_v52 = vld [vmem:[#allocation16 + $0x19a0] sm:$0xff]  ;;  %v3197_v56 = vld [vmem:[#allocation16 + $0x1bb0] sm:$0xff] }
 0x85c   :  { %4147 = vmatprep.subr.mxu0 %v3098_v34  ;;  %4216 = vmatprep.subr.mxu1 %v3164_v55  ;;  %v3130_v34 = vld [vmem:[#allocation16 + $0x1998] sm:$0xff]  ;;  %v3196_v55 = vld [vmem:[#allocation16 + $0x1ba8] sm:$0xff] }
 0x85d   :  { %4148 = vmatpush1.msra.mxu0 %v3097_v37  ;;  %4217 = vmatpush1.msra.mxu1 %v3163_v59  ;;  %v3129_v37 = vld [vmem:[#allocation16 + $0x1990] sm:$0xff]  ;;  %v3195_v59 = vld [vmem:[#allocation16 + $0x1ba0] sm:$0xff] }
 0x85e   :  { %4149 = vmatprep.subr.mxu0 %v3096_v60  ;;  %4218 = vmatprep.subr.mxu1 %v3162_v61  ;;  %v3128_v60 = vld [vmem:[#allocation16 + $0x1988] sm:$0xff]  ;;  %v3194_v61 = vld [vmem:[#allocation16 + $0x1b98] sm:$0xff] }
 0x85f   :  { %4150 = vmatpush1.msra.mxu0 %v3095_v62  ;;  %4219 = vmatpush1.msra.mxu1 %v3161_v63  ;;  %v3127_v62 = vld [vmem:[#allocation16 + $0x1980] sm:$0xff]  ;;  %v3193_v63 = vld [vmem:[#allocation16 + $0x1b90] sm:$0xff] }
 0x860   :  { %4151 = vmatprep.subr.mxu0 %v3094_v0  ;;  %4220 = vmatprep.subr.mxu1 %v3160_v1  ;;  %v3126_v0 = vld [vmem:[#allocation16 + $0x1978] sm:$0xff]  ;;  %v3192_v1 = vld [vmem:[#allocation16 + $0x1b88] sm:$0xff] }
 0x861   :  { %4152 = vmatpush1.msra.mxu0 %v3093_v2  ;;  %4221 = vmatpush1.msra.mxu1 %v3159_v3  ;;  %v3125_v2 = vld [vmem:[#allocation16 + $0x1970] sm:$0xff]  ;;  %v3191_v3 = vld [vmem:[#allocation16 + $0x1b80] sm:$0xff] }
 0x862   :  { %4153 = vmatprep.subr.mxu0 %v3092_v4  ;;  %4222 = vmatprep.subr.mxu1 %v3158_v20  ;;  %v3124_v4 = vld [vmem:[#allocation16 + $0x1968] sm:$0xff]  ;;  %v3190_v20 = vld [vmem:[#allocation16 + $0x1b78] sm:$0xff] }
 0x863   :  { %4154 = vmatpush1.msra.mxu0 %v3091_v38  ;;  %4223 = vmatpush1.msra.mxu1 %v3157_v46  ;;  %v3123_v38 = vld [vmem:[#allocation16 + $0x1960] sm:$0xff]  ;;  %v3189_v46 = vld [vmem:[#allocation16 + $0x1b70] sm:$0xff] }
 0x864   :  { %4155 = vmatprep.subr.mxu0 %v3090_v5  ;;  %4224 = vmatprep.subr.mxu1 %v3156_v57  ;;  %v3122_v5 = vld [vmem:[#allocation16 + $0x1958] sm:$0xff]  ;;  %v3188_v57 = vld [vmem:[#allocation16 + $0x1b68] sm:$0xff] }
 0x865   :  { %4156 = vmatpush1.msra.mxu0 %v3089_v58  ;;  %4225 = vmatpush1.msra.mxu1 %v3155_v6  ;;  %v3121_v58 = vld [vmem:[#allocation16 + $0x1950] sm:$0xff]  ;;  %v3187_v6 = vld [vmem:[#allocation16 + $0x1b60] sm:$0xff] }
 0x866   :  { %4157 = vmatprep.subr.mxu0 %v3088_v7  ;;  %4226 = vmatprep.subr.mxu1 %v3154_v9  ;;  %v3120_v7 = vld [vmem:[#allocation16 + $0x1948] sm:$0xff]  ;;  %v3186_v9 = vld [vmem:[#allocation16 + $0x1b58] sm:$0xff] }
 0x867   :  { %4158 = vmatpush1.msra.mxu0 %v3087_v8  ;;  %4227 = vmatpush1.msra.mxu1 %v3153_v40  ;;  %v3119_v8 = vld [vmem:[#allocation16 + $0x1940] sm:$0xff]  ;;  %v3185_v40 = vld [vmem:[#allocation16 + $0x1b50] sm:$0xff] }
 0x868   :  { %4159 = vmatprep.subr.mxu0 %v3086_v10  ;;  %4228 = vmatprep.subr.mxu1 %v3152_v11  ;;  %v3118_v10 = vld [vmem:[#allocation16 + $0x1938] sm:$0xff]  ;;  %v3184_v11 = vld [vmem:[#allocation16 + $0x1b48] sm:$0xff] }
 0x869   :  { %4160 = vmatpush1.msra.mxu0 %v3085_v12  ;;  %4229 = vmatpush1.msra.mxu1 %v3151_v13  ;;  %v3117_v12 = vld [vmem:[#allocation16 + $0x1930] sm:$0xff]  ;;  %v3183_v13 = vld [vmem:[#allocation16 + $0x1b40] sm:$0xff] }
 0x86a   :  { %4161 = vmatprep.subr.mxu0 %v3084_v14  ;;  %4230 = vmatprep.subr.mxu1 %v3150_v15  ;;  %v3116_v14 = vld [vmem:[#allocation16 + $0x1928] sm:$0xff]  ;;  %v3182_v15 = vld [vmem:[#allocation16 + $0x1b38] sm:$0xff] }
 0x86b   :  { %4162 = vmatpush1.msra.mxu0 %v3083_v16  ;;  %4231 = vmatpush1.msra.mxu1 %v3149_v17  ;;  %v3115_v16 = vld [vmem:[#allocation16 + $0x1920] sm:$0xff]  ;;  %v3181_v17 = vld [vmem:[#allocation16 + $0x1b30] sm:$0xff] }
 0x86c   :  { %4163 = vmatprep.subr.mxu0 %v3082_v18  ;;  %4232 = vmatprep.subr.mxu1 %v3148_v19  ;;  %v3114_v18 = vld [vmem:[#allocation16 + $0x1918] sm:$0xff]  ;;  %v3180_v19 = vld [vmem:[#allocation16 + $0x1b28] sm:$0xff] }
 0x86d   :  { %4164 = vmatpush1.msra.mxu0 %v3081_v28  ;;  %4233 = vmatpush1.msra.mxu1 %v3147_v21  ;;  %v3113_v28 = vld [vmem:[#allocation16 + $0x1910] sm:$0xff]  ;;  %v3179_v21 = vld [vmem:[#allocation16 + $0x1b20] sm:$0xff] }
 0x86e   :  { %4165 = vmatprep.subr.mxu0 %v3080_v22  ;;  %4234 = vmatprep.subr.mxu1 %v3146_v23  ;;  %v3112_v22 = vld [vmem:[#allocation16 + $0x1908] sm:$0xff]  ;;  %v3178_v23 = vld [vmem:[#allocation16 + $0x1b18] sm:$0xff] }
 0x86f   :  { %4166 = vmatpush1.msra.mxu0 %v3079_v41  ;;  %4235 = vmatpush1.msra.mxu1 %v3145_v24  ;;  %v3111_v41 = vld [vmem:[#allocation16 + $0x1900] sm:$0xff]  ;;  %v2302_v24 = vld [vmem:[#allocation2 + $0x32] sm:$0x3] }
 0x870   :  { %4167 = vmatprep.subr.mxu0 %v3142_v25  ;;  %4236 = vmatprep.subr.mxu1 %v3144_v26  ;;  %v3177_v25 = vld [vmem:[#allocation16 + $0x1b10] sm:$0xff] }
 0x871   :  { %4168 = vmatpush2.msra.mxu0 %v3141_v27  ;;  %4237 = vmatpush1.msra.mxu1 %v3143_v31  ;;  %v2300_v26 = vld [vmem:[#allocation2 + $0x30] sm:$0x3]  ;;  %v3176_v27 = vld [vmem:[#allocation16 + $0x1b08] sm:$0xff]  ;;  %v3238_v31 = vld [vmem:[#allocation16 + $0x1cf8] sm:$0xff] }
 0x872   :  { %4169 = vmatprep.subr.mxu0 %v3140_v36  ;;  %4238 = vmatprep.subr.mxu1 %v3206_v39  ;;  %v3175_v36 = vld [vmem:[#allocation16 + $0x1b00] sm:$0xff]  ;;  %v2306_v39 = vld [vmem:[#allocation2 + $0x36] sm:$0x3] }
 0x873   :  { %4170 = vmatpush2.msra.mxu0 %v3139_v32  ;;  %4239 = vmatpush2.msra.mxu1 %v3205_v42  ;;  %v3237_v32 = vld [vmem:[#allocation16 + $0x1cf0] sm:$0xff] }
 0x874   :  { %4171 = vmatprep.subr.mxu0 %v3138_v30  ;;  %4240 = vmatprep.subr.mxu1 %v3204_v29  ;;  %v2304_v42 = vld [vmem:[#allocation2 + $0x34] sm:$0x3]  ;;  %v3236_v30 = vld [vmem:[#allocation16 + $0x1ce8] sm:$0xff]  ;;  %v3235_v29 = vld [vmem:[#allocation16 + $0x1ce0] sm:$0xff] }
 0x875   :  { %4172 = vmatpush2.msra.mxu0 %v3137_v33  ;;  %4241 = vmatpush2.msra.mxu1 %v3203_v35  ;;  %v2310_v33 = vld [vmem:[#allocation2 + $0x3a] sm:$0x3] }
 0x876   :  { %4173 = vmatprep.subr.mxu0 %v3136_v47  ;;  %4242 = vmatprep.subr.mxu1 %v3202_v48  ;;  %v3234_v35 = vld [vmem:[#allocation16 + $0x1cd8] sm:$0xff]  ;;  %v3233_v47 = vld [vmem:[#allocation16 + $0x1cd0] sm:$0xff]  ;;  %v3232_v48 = vld [vmem:[#allocation16 + $0x1cc8] sm:$0xff] }
 0x877   :  { %4174 = vmatpush2.msra.mxu0 %v3135_v49  ;;  %4243 = vmatpush2.msra.mxu1 %v3201_v43  ;;  %v3231_v49 = vld [vmem:[#allocation16 + $0x1cc0] sm:$0xff]  ;;  %v3230_v43 = vld [vmem:[#allocation16 + $0x1cb8] sm:$0xff] }
 0x878   :  { %4175 = vmatprep.subr.mxu0 %v3134_v44  ;;  %4244 = vmatprep.subr.mxu1 %v3200_v51  ;;  %v3229_v44 = vld [vmem:[#allocation16 + $0x1cb0] sm:$0xff]  ;;  %v3228_v51 = vld [vmem:[#allocation16 + $0x1ca8] sm:$0xff] }
 0x879   :  { %4176 = vmatpush2.msra.mxu0 %v3133_v53  ;;  %4245 = vmatpush2.msra.mxu1 %v3199_v54  ;;  %v3227_v53 = vld [vmem:[#allocation16 + $0x1ca0] sm:$0xff]  ;;  %v3226_v54 = vld [vmem:[#allocation16 + $0x1c98] sm:$0xff] }
 0x87a   :  { %4177 = vmatprep.subr.mxu0 %v3132_v45  ;;  %4246 = vmatprep.subr.mxu1 %v3198_v50  ;;  %v3225_v45 = vld [vmem:[#allocation16 + $0x1c90] sm:$0xff]  ;;  %v3224_v50 = vld [vmem:[#allocation16 + $0x1c88] sm:$0xff] }
 0x87b   :  { %4178 = vmatpush2.msra.mxu0 %v3131_v52  ;;  %4247 = vmatpush2.msra.mxu1 %v3197_v56  ;;  %v3223_v52 = vld [vmem:[#allocation16 + $0x1c80] sm:$0xff]  ;;  %v3222_v56 = vld [vmem:[#allocation16 + $0x1c78] sm:$0xff] }
 0x87c   :  { %4179 = vmatprep.subr.mxu0 %v3130_v34  ;;  %4248 = vmatprep.subr.mxu1 %v3196_v55  ;;  %v3221_v34 = vld [vmem:[#allocation16 + $0x1c70] sm:$0xff]  ;;  %v3220_v55 = vld [vmem:[#allocation16 + $0x1c68] sm:$0xff] }
 0x87d   :  { %4180 = vmatpush2.msra.mxu0 %v3129_v37  ;;  %4249 = vmatpush2.msra.mxu1 %v3195_v59  ;;  %v3219_v37 = vld [vmem:[#allocation16 + $0x1c60] sm:$0xff]  ;;  %v3218_v59 = vld [vmem:[#allocation16 + $0x1c58] sm:$0xff] }
 0x87e   :  { %4181 = vmatprep.subr.mxu0 %v3128_v60  ;;  %4250 = vmatprep.subr.mxu1 %v3194_v61  ;;  %v3217_v60 = vld [vmem:[#allocation16 + $0x1c50] sm:$0xff]  ;;  %v3216_v61 = vld [vmem:[#allocation16 + $0x1c48] sm:$0xff] }
 0x87f   :  { %4182 = vmatpush2.msra.mxu0 %v3127_v62  ;;  %4251 = vmatpush2.msra.mxu1 %v3193_v63  ;;  %v3215_v62 = vld [vmem:[#allocation16 + $0x1c40] sm:$0xff]  ;;  %v3214_v63 = vld [vmem:[#allocation16 + $0x1c38] sm:$0xff] }
 0x880   :  { %4183 = vmatprep.subr.mxu0 %v3126_v0  ;;  %4252 = vmatprep.subr.mxu1 %v3192_v1  ;;  %v3213_v0 = vld [vmem:[#allocation16 + $0x1c30] sm:$0xff]  ;;  %v3212_v1 = vld [vmem:[#allocation16 + $0x1c28] sm:$0xff] }
 0x881   :  { %4184 = vmatpush2.msra.mxu0 %v3125_v2  ;;  %4253 = vmatpush2.msra.mxu1 %v3191_v3  ;;  %v3211_v2 = vld [vmem:[#allocation16 + $0x1c20] sm:$0xff]  ;;  %v3210_v3 = vld [vmem:[#allocation16 + $0x1c18] sm:$0xff] }
 0x882   :  { %4185 = vmatprep.subr.mxu0 %v3124_v4  ;;  %4254 = vmatprep.subr.mxu1 %v3190_v20  ;;  %v3209_v4 = vld [vmem:[#allocation16 + $0x1c10] sm:$0xff]  ;;  %v3208_v20 = vld [vmem:[#allocation16 + $0x1c08] sm:$0xff] }
 0x883   :  { %4186 = vmatpush2.msra.mxu0 %v3123_v38  ;;  %4255 = vmatpush2.msra.mxu1 %v3189_v46  ;;  %v3207_v38 = vld [vmem:[#allocation16 + $0x1c00] sm:$0xff]  ;;  %v3270_v46 = vld [vmem:[#allocation16 + $0x1df8] sm:$0xff] }
 0x884   :  { %4187 = vmatprep.subr.mxu0 %v3122_v5  ;;  %4256 = vmatprep.subr.mxu1 %v3188_v57  ;;  %v3269_v5 = vld [vmem:[#allocation16 + $0x1df0] sm:$0xff]  ;;  %v3268_v57 = vld [vmem:[#allocation16 + $0x1de8] sm:$0xff] }
 0x885   :  { %4188 = vmatpush2.msra.mxu0 %v3121_v58  ;;  %4257 = vmatpush2.msra.mxu1 %v3187_v6  ;;  %v3267_v58 = vld [vmem:[#allocation16 + $0x1de0] sm:$0xff]  ;;  %v3266_v6 = vld [vmem:[#allocation16 + $0x1dd8] sm:$0xff] }
 0x886   :  { %4189 = vmatprep.subr.mxu0 %v3120_v7  ;;  %4258 = vmatprep.subr.mxu1 %v3186_v9  ;;  %v3265_v7 = vld [vmem:[#allocation16 + $0x1dd0] sm:$0xff]  ;;  %v3264_v9 = vld [vmem:[#allocation16 + $0x1dc8] sm:$0xff] }
 0x887   :  { %4190 = vmatpush2.msra.mxu0 %v3119_v8  ;;  %4259 = vmatpush2.msra.mxu1 %v3185_v40  ;;  %v3263_v8 = vld [vmem:[#allocation16 + $0x1dc0] sm:$0xff]  ;;  %v3262_v40 = vld [vmem:[#allocation16 + $0x1db8] sm:$0xff] }
 0x888   :  { %4191 = vmatprep.subr.mxu0 %v3118_v10  ;;  %4260 = vmatprep.subr.mxu1 %v3184_v11  ;;  %v3261_v10 = vld [vmem:[#allocation16 + $0x1db0] sm:$0xff]  ;;  %v3260_v11 = vld [vmem:[#allocation16 + $0x1da8] sm:$0xff] }
 0x889   :  { %4192 = vmatpush2.msra.mxu0 %v3117_v12  ;;  %4261 = vmatpush2.msra.mxu1 %v3183_v13  ;;  %v3259_v12 = vld [vmem:[#allocation16 + $0x1da0] sm:$0xff]  ;;  %v3258_v13 = vld [vmem:[#allocation16 + $0x1d98] sm:$0xff] }
 0x88a   :  { %4193 = vmatprep.subr.mxu0 %v3116_v14  ;;  %4262 = vmatprep.subr.mxu1 %v3182_v15  ;;  %v3257_v14 = vld [vmem:[#allocation16 + $0x1d90] sm:$0xff]  ;;  %v3256_v15 = vld [vmem:[#allocation16 + $0x1d88] sm:$0xff] }
 0x88b   :  { %4194 = vmatpush2.msra.mxu0 %v3115_v16  ;;  %4263 = vmatpush2.msra.mxu1 %v3181_v17  ;;  %v3255_v16 = vld [vmem:[#allocation16 + $0x1d80] sm:$0xff]  ;;  %v3254_v17 = vld [vmem:[#allocation16 + $0x1d78] sm:$0xff] }
 0x88c   :  { %4195 = vmatprep.subr.mxu0 %v3114_v18  ;;  %4264 = vmatprep.subr.mxu1 %v3180_v19  ;;  %v3253_v18 = vld [vmem:[#allocation16 + $0x1d70] sm:$0xff]  ;;  %v3252_v19 = vld [vmem:[#allocation16 + $0x1d68] sm:$0xff] }
 0x88d   :  { %4196 = vmatpush2.msra.mxu0 %v3113_v28  ;;  %4265 = vmatpush2.msra.mxu1 %v3179_v21  ;;  %v3251_v28 = vld [vmem:[#allocation16 + $0x1d60] sm:$0xff]  ;;  %v3250_v21 = vld [vmem:[#allocation16 + $0x1d58] sm:$0xff] }
 0x88e   :  { %4197 = vmatprep.subr.mxu0 %v3112_v22  ;;  %4266 = vmatprep.subr.mxu1 %v3178_v23  ;;  %v3249_v22 = vld [vmem:[#allocation16 + $0x1d50] sm:$0xff]  ;;  %v3248_v23 = vld [vmem:[#allocation16 + $0x1d48] sm:$0xff] }
 0x88f   :  { %4198 = vmatpush2.msra.mxu0 %v3111_v41  ;;  %4199 = vmatprep.mubr.f32.mxu0 %v2302_v24  ;;  %v3247_v41 = vld [vmem:[#allocation16 + $0x1d40] sm:$0xff]  ;;  %v3246_v24 = vld [vmem:[#allocation16 + $0x1d38] sm:$0xff] }
 0x890   :  { %4267 = vmatpush2.msra.mxu1 %v3177_v25  ;;  %4200 = vmatmul.mubr.f32.vlgmr.msra.gmra.mxu0 %v2300_v26  ;;  %v3245_v25 = vld [vmem:[#allocation16 + $0x1d30] sm:$0xff]  ;;  %v3244_v26 = vld [vmem:[#allocation16 + $0x1d28] sm:$0xff] }
 0x891   :  { %4268 = vmatprep.subr.mxu1 %v3176_v27  ;;  %4277 = vmatprep.subr.mxu0 %v3238_v31  ;;  %v3243_v27 = vld [vmem:[#allocation16 + $0x1d20] sm:$0xff]  ;;  %v3242_v31 = vld [vmem:[#allocation16 + $0x1d18] sm:$0xff] }
 0x892   :  { %4269 = vmatpush2.msra.mxu1 %v3175_v36  ;;  %4270 = vmatprep.mubr.f32.mxu1 %v2306_v39  ;;  %v3241_v36 = vld [vmem:[#allocation16 + $0x1d10] sm:$0xff]  ;;  %v3240_v39 = vld [vmem:[#allocation16 + $0x1d08] sm:$0xff] }
 0x893   :  { %4278 = vmatpush1.msra.mxu0 %v3237_v32  ;;  %4271 = vmatmul.mubr.f32.vlgmr.msra.gmra.mxu1 %v2304_v42  ;;  %v3239_v32 = vld [vmem:[#allocation16 + $0x1d00] sm:$0xff]  ;;  %v2308_v42 = vld [vmem:[#allocation2 + $0x38] sm:$0x3] }
 0x894   :  { %4279 = vmatprep.subr.mxu0 %v3236_v30  ;;  %4341 = vmatprep.mubr.f32.mxu0 %v2310_v33  ;;  %v4381_v30 = vld [vmem:[%s6501_s11 + $0xf8] sm:$0xff]  ;;  %v4380_v33 = vld [vmem:[%s6501_s11 + $0xf0] sm:$0xff] }
 0x895   :  { %4280 = vmatpush1.msra.mxu0 %v3235_v29  ;;  %v4365_v29 = vld [vmem:[%s6501_s11 + $0x78] sm:$0xff]  ;;  %4987 = vmatprep.subr.mxu1 %v4381_v30 }
 0x896   :  { %4281 = vmatprep.subr.mxu0 %v3234_v35  ;;  %v4364_v35 = vld [vmem:[%s6501_s11 + $0x70] sm:$0xff]  ;;  %4988 = vmatpush3.msra.mxu1 %v4365_v29 }
 0x897   :  { %4282 = vmatpush1.msra.mxu0 %v3233_v47  ;;  %v4379_v47 = vld [vmem:[%s6501_s11 + $0xe8] sm:$0xff]  ;;  %4989 = vmatprep.subr.mxu1 %v4380_v33 }
 0x898   :  { %4283 = vmatprep.subr.mxu0 %v3232_v48  ;;  %v4363_v48 = vld [vmem:[%s6501_s11 + $0x68] sm:$0xff]  ;;  %4990 = vmatpush3.msra.mxu1 %v4364_v35 }
 0x899   :  { %4284 = vmatpush1.msra.mxu0 %v3231_v49  ;;  %v4378_v49 = vld [vmem:[%s6501_s11 + $0xe0] sm:$0xff]  ;;  %4991 = vmatprep.subr.mxu1 %v4379_v47 }
 0x89a   :  { %4285 = vmatprep.subr.mxu0 %v3230_v43  ;;  %v4362_v43 = vld [vmem:[%s6501_s11 + $0x60] sm:$0xff]  ;;  %4992 = vmatpush3.msra.mxu1 %v4363_v48 }
 0x89b   :  { %4286 = vmatpush1.msra.mxu0 %v3229_v44  ;;  %v4377_v44 = vld [vmem:[%s6501_s11 + $0xd8] sm:$0xff]  ;;  %4993 = vmatprep.subr.mxu1 %v4378_v49 }
 0x89c   :  { %4287 = vmatprep.subr.mxu0 %v3228_v51  ;;  %v4361_v51 = vld [vmem:[%s6501_s11 + $0x58] sm:$0xff]  ;;  %4994 = vmatpush3.msra.mxu1 %v4362_v43 }
 0x89d   :  { %4288 = vmatpush1.msra.mxu0 %v3227_v53  ;;  %v4376_v53 = vld [vmem:[%s6501_s11 + $0xd0] sm:$0xff]  ;;  %4995 = vmatprep.subr.mxu1 %v4377_v44 }
 0x89e   :  { %4289 = vmatprep.subr.mxu0 %v3226_v54  ;;  %v4360_v54 = vld [vmem:[%s6501_s11 + $0x50] sm:$0xff]  ;;  %4996 = vmatpush3.msra.mxu1 %v4361_v51 }
 0x89f   :  { %4290 = vmatpush1.msra.mxu0 %v3225_v45  ;;  %v4375_v45 = vld [vmem:[%s6501_s11 + $0xc8] sm:$0xff]  ;;  %4997 = vmatprep.subr.mxu1 %v4376_v53 }
 0x8a0   :  { %4291 = vmatprep.subr.mxu0 %v3224_v50  ;;  %v4359_v50 = vld [vmem:[%s6501_s11 + $0x48] sm:$0xff]  ;;  %4998 = vmatpush3.msra.mxu1 %v4360_v54 }
 0x8a1   :  { %4292 = vmatpush1.msra.mxu0 %v3223_v52  ;;  %v4374_v52 = vld [vmem:[%s6501_s11 + $0xc0] sm:$0xff]  ;;  %4999 = vmatprep.subr.mxu1 %v4375_v45 }
 0x8a2   :  { %4293 = vmatprep.subr.mxu0 %v3222_v56  ;;  %v4358_v56 = vld [vmem:[%s6501_s11 + $0x40] sm:$0xff]  ;;  %5000 = vmatpush3.msra.mxu1 %v4359_v50 }
 0x8a3   :  { %4294 = vmatpush1.msra.mxu0 %v3221_v34  ;;  %v4373_v34 = vld [vmem:[%s6501_s11 + $0xb8] sm:$0xff]  ;;  %5001 = vmatprep.subr.mxu1 %v4374_v52 }
 0x8a4   :  { %4295 = vmatprep.subr.mxu0 %v3220_v55  ;;  %v4357_v55 = vld [vmem:[%s6501_s11 + $0x38] sm:$0xff]  ;;  %5002 = vmatpush3.msra.mxu1 %v4358_v56 }
 0x8a5   :  { %4296 = vmatpush1.msra.mxu0 %v3219_v37  ;;  %v4372_v37 = vld [vmem:[%s6501_s11 + $0xb0] sm:$0xff]  ;;  %5003 = vmatprep.subr.mxu1 %v4373_v34 }
 0x8a6   :  { %4297 = vmatprep.subr.mxu0 %v3218_v59  ;;  %v4356_v59 = vld [vmem:[%s6501_s11 + $0x30] sm:$0xff]  ;;  %5004 = vmatpush3.msra.mxu1 %v4357_v55 }
 0x8a7   :  { %4298 = vmatpush1.msra.mxu0 %v3217_v60  ;;  %v4371_v60 = vld [vmem:[%s6501_s11 + $0xa8] sm:$0xff]  ;;  %5005 = vmatprep.subr.mxu1 %v4372_v37 }
 0x8a8   :  { %4299 = vmatprep.subr.mxu0 %v3216_v61  ;;  %v4355_v61 = vld [vmem:[%s6501_s11 + $0x28] sm:$0xff]  ;;  %5006 = vmatpush3.msra.mxu1 %v4356_v59 }
 0x8a9   :  { %4300 = vmatpush1.msra.mxu0 %v3215_v62  ;;  %v4370_v62 = vld [vmem:[%s6501_s11 + $0xa0] sm:$0xff]  ;;  %5007 = vmatprep.subr.mxu1 %v4371_v60 }
 0x8aa   :  { %4301 = vmatprep.subr.mxu0 %v3214_v63  ;;  %v4354_v63 = vld [vmem:[%s6501_s11 + $0x20] sm:$0xff]  ;;  %5008 = vmatpush3.msra.mxu1 %v4355_v61 }
 0x8ab   :  { %4302 = vmatpush1.msra.mxu0 %v3213_v0  ;;  %5009 = vmatprep.subr.mxu1 %v4370_v62  ;;  %v4369_v0 = vld [vmem:[%s6501_s11 + $0x98] sm:$0xff] }
 0x8ac   :  { %4303 = vmatprep.subr.mxu0 %v3212_v1  ;;  %5010 = vmatpush3.msra.mxu1 %v4354_v63  ;;  %v4353_v1 = vld [vmem:[%s6501_s11 + $0x18] sm:$0xff] }
 0x8ad   :  { %4304 = vmatpush1.msra.mxu0 %v3211_v2  ;;  %5011 = vmatprep.subr.mxu1 %v4369_v0  ;;  %v4368_v2 = vld [vmem:[%s6501_s11 + $0x90] sm:$0xff] }
 0x8ae   :  { %4305 = vmatprep.subr.mxu0 %v3210_v3  ;;  %5012 = vmatpush3.msra.mxu1 %v4353_v1  ;;  %v4352_v3 = vld [vmem:[%s6501_s11 + $0x10] sm:$0xff] }
 0x8af   :  { %4306 = vmatpush1.msra.mxu0 %v3209_v4  ;;  %5013 = vmatprep.subr.mxu1 %v4368_v2  ;;  %v4367_v4 = vld [vmem:[%s6501_s11 + $0x88] sm:$0xff] }
 0x8b0   :  { %4307 = vmatprep.subr.mxu0 %v3208_v20  ;;  %5014 = vmatpush3.msra.mxu1 %v4352_v3  ;;  %v4351_v20 = vld [vmem:[%s6501_s11 + $0x8] sm:$0xff] }
 0x8b1   :  { %4308 = vmatpush1.msra.mxu0 %v3207_v38  ;;  %5015 = vmatprep.subr.mxu1 %v4367_v4  ;;  %v4366_v38 = vld [vmem:[%s6501_s11 + $0x80] sm:$0xff] }
 0x8b2   :  { %4309 = vmatprep.subr.mxu0 %v3270_v46  ;;  %5016 = vmatpush3.msra.mxu1 %v4351_v20  ;;  %v4350_v46 = vld [vmem:[%s6501_s11] sm:$0xff] }
 0x8b3   :  { %4310 = vmatpush2.msra.mxu0 %v3269_v5  ;;  %5017 = vmatprep.subr.mxu1 %v4366_v38  ;;  %v5816_v5 = vmov 0.0  }
 0x8b4   :  { %4311 = vmatprep.subr.mxu0 %v3268_v57  ;;  %5018 = vmatpush3.msra.mxu1 %v4350_v46  ;;  %v3273_v57 = vlaneseq }
 0x8b5   :  { %4312 = vmatpush2.msra.mxu0 %v3267_v58  ;;  %5500 = vmatprep.subr.mxu1 %v5816_v5 }
 0x8b6   :  { %4313 = vmatprep.subr.mxu0 %v3266_v6  ;;  %v3274_v58 = vshrl.u32 %v3273_v57, 7 }
 0x8b7   :  { %4314 = vmatpush2.msra.mxu0 %v3265_v7  ;;  %v3271_v7 = vld [vmem:[#allocation17] sm:$0x3] }
 0x8b8   :  { %4315 = vmatprep.subr.mxu0 %v3264_v9  ;;  %v3275_v6 = vsub.s32 0, %v3274_v58  ;;  %v3279_v9 = vsub.s32 1, %v3274_v58 }
 0x8b9   :  { %4316 = vmatpush2.msra.mxu0 %v3263_v8  ;;  %v3349_v8 = vpop.f32.mrf.mxu0 }
 0x8ba   :  { %4317 = vmatprep.subr.mxu0 %v3262_v40  ;;  %v3276_v40 = vrot.slane %v3271_v7, %v3275_v6 }
 0x8bb   :  { %4318 = vmatpush2.msra.mxu0 %v3261_v10  ;;  %v3280_v10 = vrot.slane %v3271_v7, %v3279_v9 }
 0x8bc   :  { %4319 = vmatprep.subr.mxu0 %v3260_v11  ;;  %v3351_v11 = vpop.f32.mrf.mxu0 }
 0x8bd   :  { %4320 = vmatpush2.msra.mxu0 %v3259_v12  ;;  %v3420_v12 = vpop.f32.mrf.mxu1 }
 0x8be   :  { %4321 = vmatprep.subr.mxu0 %v3258_v13  ;;  %v3350_v13 = vadd.f32 %v3349_v8, %v3276_v40  ;;  %v4470_v40 = vld [vmem:[%s6503_s13 + $0x50] sm:$0xf] }
 0x8bf   :  { %4322 = vmatpush2.msra.mxu0 %v3257_v14  ;;  %v3491_v14 = vpop.f32.mrf.mxu0 }
 0x8c0   :  { %4323 = vmatprep.subr.mxu0 %v3256_v15  ;;  %v3352_v15 = vadd.f32 %v3351_v11, %v3280_v10  ;;  %v4469_v10 = vld [vmem:[%s6503_s13 + $0x48] sm:$0xff]  ;;  %v4468_v11 = vld [vmem:[%s6503_s13 + $0x40] sm:$0xff] }
 0x8c1   :  { %4324 = vmatpush2.msra.mxu0 %v3255_v16  ;;  %v3422_v16 = vpop.f32.mrf.mxu1 }
 0x8c2   :  { %4325 = vmatprep.subr.mxu0 %v3254_v17  ;;  %v3421_v17 = vadd.f32 %v3420_v12, %v3350_v13  ;;  %v4467_v12 = vld [vmem:[%s6503_s13 + $0x38] sm:$0xff]  ;;  %v4466_v13 = vld [vmem:[%s6503_s13 + $0x30] sm:$0xff] }
 0x8c3   :  { %4326 = vmatpush2.msra.mxu0 %v3253_v18  ;;  %v3493_v18 = vpop.f32.mrf.mxu0 }
 0x8c4   :  { %4327 = vmatprep.subr.mxu0 %v3252_v19  ;;  %v3562_v19 = vpop.f32.mrf.mxu1 }
 0x8c5   :  { %4328 = vmatpush2.msra.mxu0 %v3251_v28  ;;  %v3423_v28 = vadd.f32 %v3422_v16, %v3352_v15  ;;  %v4464_v15 = vld [vmem:[%s6503_s13 + $0x20] sm:$0xff]  ;;  %v4463_v16 = vld [vmem:[%s6503_s13 + $0x18] sm:$0xff] }
 0x8c6   :  { %4329 = vmatprep.subr.mxu0 %v3250_v21  ;;  %v3492_v21 = vadd.f32 %v3491_v14, %v3421_v17  ;;  %v4465_v14 = vld [vmem:[%s6503_s13 + $0x28] sm:$0xff]  ;;  %v4462_v17 = vld [vmem:[%s6503_s13 + $0x10] sm:$0xff] }
 0x8c7   :  { %4330 = vmatpush2.msra.mxu0 %v3249_v22  ;;  %v3633_v22 = vpop.f32.mrf.mxu0 }
 0x8c8   :  { %4331 = vmatprep.subr.mxu0 %v3248_v23  ;;  %v3494_v23 = vadd.f32 %v3493_v18, %v3423_v28  ;;  %v4461_v18 = vld [vmem:[%s6503_s13 + $0x8] sm:$0xff] }
 0x8c9   :  { %4332 = vmatpush2.msra.mxu0 %v3247_v41  ;;  %v3564_v41 = vpop.f32.mrf.mxu1 }
 0x8ca   :  { %4333 = vmatprep.subr.mxu0 %v3246_v24  ;;  %v3563_v24 = vadd.f32 %v3562_v19, %v3492_v21  ;;  %v4460_v19 = vld [vmem:[%s6503_s13] sm:$0xff]  ;;  %s5818_s13 = smov [#allocation22]  }
 0x8cb   :  { %4334 = vmatpush2.msra.mxu0 %v3245_v25  ;;  %v3635_v25 = vpop.f32.mrf.mxu0  ;;  %v4722_v21 = vld [vmem:[#allocation19] ss:$0 sm:$0xff]  ;;  %s4570_s1 = sshll.u32 %s5818_s13, 4  ;;  %s4571_s1 = int_to_ptr.vmem [resolvable:$true] %s4570_s1 }
 0x8cc   :  { %4335 = vmatprep.subr.mxu0 %v3244_v26  ;;  %v3704_v26 = vpop.f32.mrf.mxu1  ;;  %s5758_s21 = scalar_lea.vmem %s4571_s1, 32  ;;  %p5763_p10 = scmp.lt.s32.totalorder %s4571_s1, %s4571_s1 }
 0x8cd   :  { %4336 = vmatpush2.msra.mxu0 %v3243_v27  ;;  %v3565_v27 = vadd.f32 %v3564_v41, %v3494_v23  ;;  %p5759_p9 = scmp.ne.s32.totalorder %s4571_s1, %s5758_s21  ;;  %p5764_p11 = scmp.lt.s32.totalorder %s5758_s21, %s5758_s21 }
 0x8ce   :  { %4337 = vmatprep.subr.mxu0 %v3242_v31  ;;  %v3634_v31 = vadd.f32 %v3633_v22, %v3563_v24 }
 0x8cf   :  { %4338 = vmatpush2.msra.mxu0 %v3241_v36  ;;  %v3775_v36 = vpop.f32.mrf.mxu0  ;;  %p5765_p12 = por %p5764_p11, %p5763_p10 }
 0x8d0   :  { %4339 = vmatprep.subr.mxu0 %v3240_v39  ;;  %v3636_v39 = vadd.f32 %v3635_v25, %v3565_v27  ;;  %v4723_v25 = vld [vmem:[#allocation20] ss:$0 sm:$0xff] }
 0x8d1   :  { %4340 = vmatpush2.msra.mxu0 %v3239_v32  ;;  %v3706_v32 = vpop.f32.mrf.mxu1  ;;  %v3777_v30 = vpop.f32.mrf.mxu0  ;;  %p5766_p13 = pnand %p5765_p12, %p5759_p9 }
 0x8d2   :  { %4342 = vmatmul.mubr.f32.vlgmr.msra.gmra.mxu0 %v2308_v42  ;;  %v3705_v42 = vadd.f32 %v3704_v26, %v3634_v31  ;;  %v3707_v33 = vadd.f32 %v3706_v32, %v3636_v39 }
 0x8d3   :  { %v3846_v29 = vpop.f32.mrf.mxu1  ;;  %v3917_v47 = vpop.f32.mrf.mxu0 }
 0x8d4   :  { %v3776_v35 = vadd.f32 %v3775_v36, %v3705_v42  ;;  %v3778_v48 = vadd.f32 %v3777_v30, %v3707_v33 }
 0x8d5   :  { %v3848_v49 = vpop.f32.mrf.mxu1  ;;  %v3919_v44 = vpop.f32.mrf.mxu0 }
 0x8d6   :  { %v3847_v43 = vadd.f32 %v3846_v29, %v3776_v35  ;;  %v3849_v53 = vadd.f32 %v3848_v49, %v3778_v48 }
 0x8d7   :  { %v3988_v51 = vpop.f32.mrf.mxu1 }
 0x8d8   :  { %v3918_v54 = vadd.f32 %v3917_v47, %v3847_v43  ;;  %v3920_v50 = vadd.f32 %v3919_v44, %v3849_v53 }
 0x8d9   :  { %v3990_v52 = vpop.f32.mrf.mxu1 }
 0x8da   :  { %v3989_v56 = vadd.f32 %v3988_v51, %v3918_v54  ;;  %v3991_v37 = vadd.f32 %v3990_v52, %v3920_v50 }
 0x90e   :  { %v4059_v45 = vpop.f32.mrf.mxu0 }
 0x90f   :  { %v4060_v59 = vadd.f32 %v4059_v45, %v3989_v56 }
 0x910   :  { %v4061_v34 = vpop.f32.mrf.mxu0 }
 0x911   :  { %v4130_v55 = vpop.f32.mrf.mxu1  ;;  %v4062_v61 = vadd.f32 %v4061_v34, %v3991_v37 }
 0x912   :  { %v4131_v63 = vadd.f32 %v4130_v55, %v4060_v59 }
 0x913   :  { %v4132_v62 = vpop.f32.mrf.mxu1 }
 0x914   :  { %v4133_v2 = vadd.f32 %v4132_v62, %v4062_v61 }
 0x950   :  { %v4201_v60 = vpop.f32.mrf.mxu0 }
 0x951   :  { %v4202_v3 = vadd.f32 %v4201_v60, %v4131_v63 }
 0x952   :  { %v4203_v0 = vpop.f32.mrf.mxu0 }
 0x953   :  { %v4272_v1 = vpop.f32.mrf.mxu1  ;;  %v4204_v4 = vadd.f32 %v4203_v0, %v4133_v2 }
 0x954   :  { %v4273_v38 = vadd.f32 %v4272_v1, %v4202_v3 }
 0x955   :  { %v4274_v20 = vpop.f32.mrf.mxu1 }
 0x956   :  { %v4275_v57 = vadd.f32 %v4274_v20, %v4204_v4 }
 0x992   :  { %v4343_v46 = vpop.f32.mrf.mxu0 }
 0x993   :  { %v4344_v58 = vadd.f32 %v4343_v46, %v4273_v38 }
 0x994   :  { %v4345_v6 = vpop.f32.mrf.mxu0 }
 0x995   :  { %v4346_v7 = vadd.f32 %v4345_v6, %v4275_v57  ;;  %v4348_v8 = vmax.f32 %v4344_v58, 0.0 }
 0x997   :  { %v4349_v9 = vmax.f32 %v4346_v7, 0.0 }
 0x999   :  { %4453 = vmatprep.mubr.f32.mxu1 %v4349_v9 }
 0x99a   :  { %4454 = vmatmul.mubr.f32.vlgmr.msra.gmra.mxu1 %v4348_v8 }
 0x99b   :  { %5501 = vmatpush3.msk.msra.mxu1 %vm4482_vm6, %v4470_v40  ;;  %5522 = vmatprep.mubr.msk.f32.mxu1 %vm5817_vm7, %v5816_v5 }
 0x99c   :  { %5502 = vmatprep.subr.mxu1 %v5816_v5 }
 0x99d   :  { %5503 = vmatpush3.msra.mxu1 %v4469_v10 }
 0x99e   :  { %5504 = vmatprep.subr.mxu1 %v5816_v5 }
 0x99f   :  { %5505 = vmatpush3.msra.mxu1 %v4468_v11 }
 0x9a0   :  { %5506 = vmatprep.subr.mxu1 %v5816_v5 }
 0x9a1   :  { %5507 = vmatpush3.msra.mxu1 %v4467_v12 }
 0x9a2   :  { %5508 = vmatprep.subr.mxu1 %v5816_v5 }
 0x9a3   :  { %5509 = vmatpush3.msra.mxu1 %v4466_v13 }
 0x9a4   :  { %5510 = vmatprep.subr.mxu1 %v5816_v5 }
 0x9a5   :  { %5511 = vmatpush3.msra.mxu1 %v4465_v14 }
 0x9a6   :  { %5512 = vmatprep.subr.mxu1 %v5816_v5 }
 0x9a7   :  { %5513 = vmatpush3.msra.mxu1 %v4464_v15 }
 0x9a8   :  { %5514 = vmatprep.subr.mxu1 %v5816_v5 }
 0x9a9   :  { %5515 = vmatpush3.msra.mxu1 %v4463_v16 }
 0x9aa   :  { %5516 = vmatprep.subr.mxu1 %v5816_v5 }
 0x9ab   :  { %5517 = vmatpush3.msra.mxu1 %v4462_v17 }
 0x9ac   :  { %5518 = vmatprep.subr.mxu1 %v5816_v5 }
 0x9ad   :  { %5519 = vmatpush3.msra.mxu1 %v4461_v18 }
 0x9ae   :  { %5520 = vmatprep.subr.mxu1 %v5816_v5 }
 0x9af   :  { %5521 = vmatpush3.msra.mxu1 %v4460_v19 }
 0xa5a   :  { %v5019_v28 = vpop.f32.mrf.mxu1 }
 0xa5c   :  { %v5020_v22 = vpop.f32.mrf.mxu1 }
 0xa5d   :  { %v5021_v23 = vadd.f32 %v5020_v22, %v5019_v28 }
 0xa5f   :  { %v4456_v41 = vadd.f32 %v5021_v23, %v4722_v21 }
 0xa61   :  { %v4459_v24 = vmax.f32 %v4456_v41, 0.0 }
 0xa63   :  { %5523 = vmatmul.mubr.msk.f32.vlgmr.msra.gmra.mxu1 %vm4478_vm8, %v4459_v24 }
 0xb23   :  { %v4552_v26 = vpop.f32.mrf.mxu1 }
 0xb24   :  { %v4553_v27 = vadd.f32 %v4723_v25, %v4552_v26 }
 0xb25   :  { %v5524_v31 = vpop.f32.mrf.mxu1 }
 0xb26   :  { %v4726_v36 = vmul.f32 -1.442695, %v4553_v27 }
 0xb28   :  { %5554 = vpow2.f32 %v4726_v36 }
 0xb35   :  { %v5555_v39 = vpop.eup %5554 }
 0xb36   :  { %v4559_v32 = vadd.f32 1.0, %v5555_v39 }
 0xb38   :  { %5556 = vrcp.f32 %v4559_v32 }
 0xb45   :  { %v5557_v5 = vpop.eup %5556 }
 0xb46   :  { %4563 = vst.msk [vmem:[#allocation22] sm:$0x3] %vm4562_vm9, %v5557_v5 }
 0xb47   :  { %5769 = shalt.err (!%p5766_p13)
}
 0xb48   :  { %4573 = dma.vmem_to_hbm [thread:$0]  %s4571_s1, 32, %s6505_s15, [#allocation7]  }
 0xb49   :  { %5794 = dma.done.wait [#allocation7], 32  }
 0xb4a   :  { %5795 = vsyncadd [#allocation7], 4294967264 }
 0xb4b   :  { %4577 = vsyncpa [#allocation6], 1 }
 0xb4c   :  { %4578 = vsyncpa [#allocation9], 1 }
 0xb4d   :  { %4579 = vsyncpa [#allocation12], 1 }
 0xb4e   :  { %4580 = vsyncpa [#allocation15], 1 }
 0xb4f   :  { %4581 = vsyncpa [#allocation18], 1 }
 0xb50   :  { %4582 = vsyncpa [#allocation21], 1 }
 0xb51   :  { %4583 = vsyncpa [#allocation7], 1 }

</bundles_post_ra>
